<compile_context>
chip_gen: v6e
topology: v6e:2x2x1
jax: 0.10.0
libtpu: 0.0.40
codegen_flags: <defaults>
</compile_context>

<pallas_src>
import functools
import math

import jax
import jax.numpy as jnp
from jax import lax
from jax.experimental import pallas as pl
from jax.experimental.pallas import tpu as pltpu

# ---------------- config (module-implied dims; synthesis shrunk) ----------------
D = 512            # latent / style dim (hard-coded by lat_comp shape (80, 1, 512))
L = 18             # number of style layers (all receive the identical w row)
K = 80             # number of PCA components
N_MAP = 8          # StyleGAN2 mapping-network depth
LR_MUL = 0.01      # mapping-net EqualLinear lr multiplier
C = 32             # synthesis channels (small)
H = W = 4          # base resolution (small)
KSIZE = 3
TAPS = KSIZE * KSIZE
TRUNC = 0.7
SQRT2 = math.sqrt(2.0)

_VSPEC = pl.BlockSpec(memory_space=pltpu.MemorySpace.VMEM)   # whole array in VMEM


def _lrelu(x):
    # fused_leaky_relu (bias already added by caller): lrelu(0.2) * sqrt(2)
    return jnp.where(x >= 0.0, x, 0.2 * x) * SQRT2


# ====================== single fused kernel: full forward pass ======================

def _forward_kernel(vals_ref, comp_ref, x_ref, mwt_ref, mb_ref, mean_ref,
                    c1_awt_ref, c1_ab_ref, c1_rep_ref, patch_ref, c1_w2d_ref,
                    c1_wsq_ref, c1_b_ref,
                    rgb_awt_ref, rgb_ab_ref, rgb_w_ref, rgb_b_ref,
                    *rest, truncation, a_scale, c1_w_scale, rgb_w_scale,
                    noise_strength, use_noise):
    if use_noise:
        noise_ref, out_ref = rest
    else:
        (out_ref,) = rest

    # -------- PCAStyleGANEdits: all 18 rows identical -> one row e = vals @ lat_comp --------
    e = jnp.dot(vals_ref[...], comp_ref[...], preferred_element_type=jnp.float32)   # [1, D]

    # -------- model.get_latent: PixelNorm + 8 x (EqualLinear + fused leaky relu) --------
    x = x_ref[...]
    h = x * lax.rsqrt(jnp.mean(x * x, axis=1, keepdims=True) + 1e-8)
    # lin_scale / lr_mul pre-folded into the bf16 weights / f32 biases on host;
    # f32 accumulation via preferred_element_type.  Fully unrolled, weights resident.
    for l in range(N_MAP):
        y = jnp.dot(h.astype(jnp.bfloat16), mwt_ref[l],
                    preferred_element_type=jnp.float32)
        h = _lrelu(y + mb_ref[l])

    # -------- repeat_interleave(18) + edits + truncation: rows identical, keep one --------
    # NOTE: matches the torch module ordering: w_new = w + edits is formed FIRST and the
    # truncation lerp around lat_mean is applied to w_new inside the model (edits scaled by 0.7).
    row = h + e
    row = mean_ref[...] + truncation * (row - mean_ref[...])                         # [1, D]

    # -------- StyledConv: 3x3 modulated + demodulated conv (+ noise) + fused lrelu --------
    s = jnp.dot(row, c1_awt_ref[...],
                preferred_element_type=jnp.float32) * a_scale + c1_ab_ref[...]       # [1, C]
    # Replicate the per-Cin style across the 9 taps with a constant 0/1 matrix (one
    # tiny MXU op) so the modulation is a single lane-axis broadcast multiply.
    s9 = jnp.dot(s, c1_rep_ref[...], preferred_element_type=jnp.float32)             # [1, 9C]
    # conv(x, W*s) == conv(x*s, W) as ONE im2col GEMM:  [HW, 9C] x [9C, C]
    hh = jnp.dot(patch_ref[...] * s9, c1_w2d_ref[...],
                 preferred_element_type=jnp.float32) * c1_w_scale                    # [HW, C]
    # demod[out] = rsqrt(sum_{cin,kh,kw} (w_scale * W * s)^2 + eps); weight-square sums
    # are host-precomputed, so this is a single [1,C]x[C,C] matmul.
    d2 = jnp.dot(s * s, c1_wsq_ref[...], preferred_element_type=jnp.float32)         # [1, C]
    hh = hh * lax.rsqrt(c1_w_scale * c1_w_scale * d2 + 1e-8)
    if use_noise:                                     # statically skipped when strength == 0.0
        hh = hh + noise_strength * noise_ref[...]
    hh = _lrelu(hh + c1_b_ref[...])

    # -------- ToRGB: 1x1 modulated conv, no demodulation, no activation --------
    s2 = jnp.dot(row, rgb_awt_ref[...],
                 preferred_element_type=jnp.float32) * a_scale + rgb_ab_ref[...]     # [1, C]
    rgb = jnp.dot(hh * s2, rgb_w_ref[...],
                  preferred_element_type=jnp.float32) * rgb_w_scale                  # [HW, 8]
    # TODO(synk): at real resolutions make this output lane-dense ([HW_tile, 128]-padded
    # Cout) and keep the 3-channel slice / NCHW transpose on the host; at 4x4 the masked
    # 8-lane store is negligible.
    out_ref[...] = rgb + rgb_b_ref[...]


@functools.partial(jax.jit, static_argnames=("noise_strength", "use_noise"))
def _forward_jit(params, vals, rnd, noise1, *, noise_strength, use_noise):
    kernel = functools.partial(
        _forward_kernel,
        truncation=TRUNC,
        a_scale=1.0 / math.sqrt(D),
        c1_w_scale=1.0 / math.sqrt(C * TAPS),
        rgb_w_scale=1.0 / math.sqrt(C),
        noise_strength=noise_strength, use_noise=use_noise)
    args = [vals, params["lat_comp"], rnd,
            params["map_wt"], params["map_b"], params["lat_mean"],
            params["c1_affine_wt"], params["c1_affine_b"], params["c1_rep"],
            params["patches2d"], params["c1_w2d"], params["c1_wsq"], params["c1_bias"],
            params["rgb_affine_wt"], params["rgb_affine_b"],
            params["rgb_w"], params["rgb_bias"]]
    if use_noise:
        args.append(noise1)
    rgb = pl.pallas_call(
        kernel,
        out_shape=jax.ShapeDtypeStruct((H * W, 8), jnp.float32),
        in_specs=[_VSPEC] * len(args),
        out_specs=_VSPEC,
    )(*args)
    rgb = rgb[:, :3]                                              # drop Cout padding
    return jnp.transpose(rgb.reshape(H, W, 3), (2, 0, 1))[None]   # NCHW [1, 3, H, W]


# ================================ host-side setup ================================

def _im2col_patches(x):
    # x: [C, H, W] -> im2col patches [H*W, 9*C]; column = (kh*3+kw)*C + cin, SAME padding.
    c, h, w = x.shape
    xpad = jnp.pad(x, ((0, 0), (1, 1), (1, 1)))
    taps = [xpad[:, kh:kh + h, kw:kw + w] for kh in range(KSIZE) for kw in range(KSIZE)]
    pat = jnp.stack(taps, axis=0)                      # [9, C, H, W]
    pat = jnp.transpose(pat, (2, 3, 0, 1))             # [H, W, 9, C]
    return pat.reshape(h * w, TAPS * c)


def init_params(key):
    ks = jax.random.split(key, 10)
    p = {}
    p["lat_comp"] = jax.random.normal(ks[0], (K, D), jnp.float32) * 0.05   # PCA dirs (squeezed (80,1,512))
    p["lat_mean"] = jax.random.normal(ks[1], (1, D), jnp.float32) * 0.1
    # mapping net: EqualLinear weights [out,in]; stored transposed [layer,in,out] with
    # lin_scale = (1/sqrt(D))*lr_mul folded in BEFORE the bf16 cast (keeps magnitudes O(0.05)).
    map_w = jax.random.normal(ks[2], (N_MAP, D, D), jnp.float32) / LR_MUL
    lin_scale = (1.0 / math.sqrt(D)) * LR_MUL
    p["map_wt"] = (jnp.transpose(map_w, (0, 2, 1)) * lin_scale).astype(jnp.bfloat16)
    p["map_b"] = jnp.zeros((N_MAP, 1, D), jnp.float32)          # lr_mul folded (zeros unchanged)
    # StyledConv (3x3 modulated, demodulated, noise + fused lrelu)
    p["c1_affine_wt"] = jnp.transpose(jax.random.normal(ks[3], (C, D), jnp.float32))   # [D, C]
    p["c1_affine_b"] = jnp.ones((1, C), jnp.float32)                                    # bias_init=1
    c1_w = jax.random.normal(ks[4], (C, C, KSIZE, KSIZE), jnp.float32)                  # [out,in,kh,kw]
    # im2col weight [9*Cin, Cout]: row = (kh*3+kw)*Cin + cin (matches patches2d columns)
    p["c1_w2d"] = jnp.transpose(c1_w, (2, 3, 1, 0)).reshape(TAPS * C, C)
    # demod weight-square sums [Cin, Cout] = sum_{kh,kw} W^2  (precomputed on host)
    p["c1_wsq"] = jnp.transpose(jnp.sum(c1_w * c1_w, axis=(2, 3)))
    # constant 0/1 tap-replication matrix: (s @ rep)[t*C + c] = s[c]
    p["c1_rep"] = jnp.tile(jnp.eye(C, dtype=jnp.float32), (1, TAPS))                    # [C, 9C]
    p["c1_bias"] = jnp.zeros((1, C), jnp.float32)
    # ToRGB (1x1 modulated, no demod, no activation); [Cin, Cout] with Cout zero-padded 3 -> 8
    p["rgb_affine_wt"] = jnp.transpose(jax.random.normal(ks[5], (C, D), jnp.float32))
    p["rgb_affine_b"] = jnp.ones((1, C), jnp.float32)
    rgb_w = jax.random.normal(ks[6], (3, C), jnp.float32)                               # [out=3, in]
    p["rgb_w"] = jnp.pad(jnp.transpose(rgb_w), ((0, 0), (0, 8 - 3)))                    # [C, 8], pad zeros
    p["rgb_bias"] = jnp.zeros((1, 8), jnp.float32)
    const_input = jax.random.normal(ks[7], (C, H, W), jnp.float32)
    p["const_input"] = const_input
    p["patches2d"] = _im2col_patches(const_input)    # ConstantInput is a parameter -> im2col once
    p["noise_strength"] = 0.0                        # NoiseInjection weight init is zeros
    return p


def pca_stylegan_forward(params, edits, seed=0):
    # PCAStyleGANEdits coefficients assembled host-side (ids/values are Python scalars).
    vals = [0.0] * K
    for entry in edits:
        vals[int(entry["id"])] += float(entry["value"])
    vals = jnp.asarray([vals], jnp.float32)                       # [1, K]

    # torch.manual_seed(seed); torch.randn(1, 512)  (deterministic, not bit-identical)
    rnd = jax.random.normal(jax.random.PRNGKey(seed), (1, D), jnp.float32)

    ns = float(params["noise_strength"])
    use_noise = ns != 0.0
    noise1 = None
    if use_noise:
        noise1 = jax.random.normal(jax.random.PRNGKey(seed + 1), (H * W, 1), jnp.float32)

    # One fused pallas_call + epilogue under a single jit dispatch.
    return _forward_jit(params, vals, rnd, noise1,
                        noise_strength=ns, use_noise=use_noise)


if __name__ == "__main__":
    params = init_params(jax.random.PRNGKey(0))
    edits = [{"id": 3, "value": 1.5}, {"id": 10, "value": -0.7}, {"id": 3, "value": 0.25}]
    img = pca_stylegan_forward(params, edits, seed=0)
    jax.block_until_ready(img)
    assert img.shape == (1, 3, H, W) and img.dtype == jnp.float32
    assert bool(jnp.all(jnp.isfinite(img)))
    print("KERNEL_OK")
</pallas_src>

<mosaic_0001>
module attributes {stable_mosaic.version = 11 : i64} {
  func.func @_forward_kernel(%arg0: memref<1x80xf32, #tpu.memory_space<vmem>>, %arg1: memref<80x512xf32, #tpu.memory_space<vmem>>, %arg2: memref<1x512xf32, #tpu.memory_space<vmem>>, %arg3: memref<8x512x512xbf16, #tpu.memory_space<vmem>>, %arg4: memref<8x1x512xf32, #tpu.memory_space<vmem>>, %arg5: memref<1x512xf32, #tpu.memory_space<vmem>>, %arg6: memref<512x32xf32, #tpu.memory_space<vmem>>, %arg7: memref<1x32xf32, #tpu.memory_space<vmem>>, %arg8: memref<32x288xf32, #tpu.memory_space<vmem>>, %arg9: memref<16x288xf32, #tpu.memory_space<vmem>>, %arg10: memref<288x32xf32, #tpu.memory_space<vmem>>, %arg11: memref<32x32xf32, #tpu.memory_space<vmem>>, %arg12: memref<1x32xf32, #tpu.memory_space<vmem>>, %arg13: memref<512x32xf32, #tpu.memory_space<vmem>>, %arg14: memref<1x32xf32, #tpu.memory_space<vmem>>, %arg15: memref<32x8xf32, #tpu.memory_space<vmem>>, %arg16: memref<1x8xf32, #tpu.memory_space<vmem>>, %arg17: memref<16x8xf32, #tpu.memory_space<vmem>>) attributes {dimension_semantics = [], scalar_prefetch = 0 : i64, scratch_operands = 0 : i64, tpu.core_type = #tpu.core_type<tc>} {
    %c0 = arith.constant 0 : index
    %c0_0 = arith.constant 0 : index
    %0 = vector.load %arg0[%c0, %c0_0] : memref<1x80xf32, #tpu.memory_space<vmem>>, vector<1x80xf32>
    %c0_1 = arith.constant 0 : index
    %c0_2 = arith.constant 0 : index
    %1 = vector.load %arg1[%c0_1, %c0_2] : memref<80x512xf32, #tpu.memory_space<vmem>>, vector<80x512xf32>
    %cst = arith.constant dense<0.000000e+00> : vector<1x512xf32>
    %2 = tpu.matmul %0, %1, %cst {dimension_numbers = #tpu.dot_dimension_numbers<[1], [0], [0], [1], [0, 0, 1, 1], [], []>} : vector<1x80xf32>, vector<80x512xf32>, vector<1x512xf32> -> vector<1x512xf32>
    %c0_3 = arith.constant 0 : index
    %c0_4 = arith.constant 0 : index
    %3 = vector.load %arg2[%c0_3, %c0_4] : memref<1x512xf32, #tpu.memory_space<vmem>>, vector<1x512xf32>
    %4 = arith.mulf %3, %3 : vector<1x512xf32>
    %cst_5 = arith.constant dense<0.000000e+00> : vector<1xf32>
    %5 = vector.multi_reduction <add>, %4, %cst_5 [1] : vector<1x512xf32> to vector<1xf32>
    %6 = vector.shape_cast %5 : vector<1xf32> to vector<1x1xf32>
    %cst_6 = arith.constant 5.120000e+02 : f32
    %7 = vector.broadcast %cst_6 : f32 to vector<1x1xf32>
    %8 = arith.divf %6, %7 : vector<1x1xf32>
    %cst_7 = arith.constant 9.99999993E-9 : f32
    %9 = vector.broadcast %cst_7 : f32 to vector<1x1xf32>
    %10 = arith.addf %8, %9 : vector<1x1xf32>
    %11 = math.rsqrt %10 : vector<1x1xf32>
    %12 = vector.broadcast %11 : vector<1x1xf32> to vector<1x512xf32>
    %13 = arith.mulf %3, %12 : vector<1x512xf32>
    %14 = arith.truncf %13 : vector<1x512xf32> to vector<1x512xbf16>
    %c0_8 = arith.constant 0 : index
    %c0_9 = arith.constant 0 : index
    %c0_10 = arith.constant 0 : index
    %15 = vector.load %arg3[%c0_8, %c0_9, %c0_10] : memref<8x512x512xbf16, #tpu.memory_space<vmem>>, vector<1x512x512xbf16>
    %16 = vector.shape_cast %15 : vector<1x512x512xbf16> to vector<512x512xbf16>
    %cst_11 = arith.constant dense<0.000000e+00> : vector<1x512xf32>
    %17 = tpu.matmul %14, %16, %cst_11 {dimension_numbers = #tpu.dot_dimension_numbers<[1], [0], [0], [1], [0, 0, 1, 1], [], []>} : vector<1x512xbf16>, vector<512x512xbf16>, vector<1x512xf32> -> vector<1x512xf32>
    %c0_12 = arith.constant 0 : index
    %c0_13 = arith.constant 0 : index
    %c0_14 = arith.constant 0 : index
    %18 = vector.load %arg4[%c0_12, %c0_13, %c0_14] : memref<8x1x512xf32, #tpu.memory_space<vmem>>, vector<1x1x512xf32>
    %19 = vector.shape_cast %18 : vector<1x1x512xf32> to vector<1x512xf32>
    %20 = arith.addf %17, %19 : vector<1x512xf32>
    %cst_15 = arith.constant 0.000000e+00 : f32
    %21 = vector.broadcast %cst_15 : f32 to vector<1x512xf32>
    %22 = arith.cmpf oge, %20, %21 : vector<1x512xf32>
    %cst_16 = arith.constant 2.000000e-01 : f32
    %23 = vector.broadcast %cst_16 : f32 to vector<1x512xf32>
    %24 = arith.mulf %23, %20 : vector<1x512xf32>
    %25 = arith.select %22, %20, %24 : vector<1x512xi1>, vector<1x512xf32>
    %cst_17 = arith.constant 1.41421354 : f32
    %26 = vector.broadcast %cst_17 : f32 to vector<1x512xf32>
    %27 = arith.mulf %25, %26 : vector<1x512xf32>
    %28 = arith.truncf %27 : vector<1x512xf32> to vector<1x512xbf16>
    %c1 = arith.constant 1 : index
    %c0_18 = arith.constant 0 : index
    %c0_19 = arith.constant 0 : index
    %29 = vector.load %arg3[%c1, %c0_18, %c0_19] : memref<8x512x512xbf16, #tpu.memory_space<vmem>>, vector<1x512x512xbf16>
    %30 = vector.shape_cast %29 : vector<1x512x512xbf16> to vector<512x512xbf16>
    %cst_20 = arith.constant dense<0.000000e+00> : vector<1x512xf32>
    %31 = tpu.matmul %28, %30, %cst_20 {dimension_numbers = #tpu.dot_dimension_numbers<[1], [0], [0], [1], [0, 0, 1, 1], [], []>} : vector<1x512xbf16>, vector<512x512xbf16>, vector<1x512xf32> -> vector<1x512xf32>
    %c1_21 = arith.constant 1 : index
    %c0_22 = arith.constant 0 : index
    %c0_23 = arith.constant 0 : index
    %32 = vector.load %arg4[%c1_21, %c0_22, %c0_23] : memref<8x1x512xf32, #tpu.memory_space<vmem>>, vector<1x1x512xf32>
    %33 = vector.shape_cast %32 : vector<1x1x512xf32> to vector<1x512xf32>
    %34 = arith.addf %31, %33 : vector<1x512xf32>
    %cst_24 = arith.constant 0.000000e+00 : f32
    %35 = vector.broadcast %cst_24 : f32 to vector<1x512xf32>
    %36 = arith.cmpf oge, %34, %35 : vector<1x512xf32>
    %cst_25 = arith.constant 2.000000e-01 : f32
    %37 = vector.broadcast %cst_25 : f32 to vector<1x512xf32>
    %38 = arith.mulf %37, %34 : vector<1x512xf32>
    %39 = arith.select %36, %34, %38 : vector<1x512xi1>, vector<1x512xf32>
    %cst_26 = arith.constant 1.41421354 : f32
    %40 = vector.broadcast %cst_26 : f32 to vector<1x512xf32>
    %41 = arith.mulf %39, %40 : vector<1x512xf32>
    %42 = arith.truncf %41 : vector<1x512xf32> to vector<1x512xbf16>
    %c2 = arith.constant 2 : index
    %c0_27 = arith.constant 0 : index
    %c0_28 = arith.constant 0 : index
    %43 = vector.load %arg3[%c2, %c0_27, %c0_28] : memref<8x512x512xbf16, #tpu.memory_space<vmem>>, vector<1x512x512xbf16>
    %44 = vector.shape_cast %43 : vector<1x512x512xbf16> to vector<512x512xbf16>
    %cst_29 = arith.constant dense<0.000000e+00> : vector<1x512xf32>
    %45 = tpu.matmul %42, %44, %cst_29 {dimension_numbers = #tpu.dot_dimension_numbers<[1], [0], [0], [1], [0, 0, 1, 1], [], []>} : vector<1x512xbf16>, vector<512x512xbf16>, vector<1x512xf32> -> vector<1x512xf32>
    %c2_30 = arith.constant 2 : index
    %c0_31 = arith.constant 0 : index
    %c0_32 = arith.constant 0 : index
    %46 = vector.load %arg4[%c2_30, %c0_31, %c0_32] : memref<8x1x512xf32, #tpu.memory_space<vmem>>, vector<1x1x512xf32>
    %47 = vector.shape_cast %46 : vector<1x1x512xf32> to vector<1x512xf32>
    %48 = arith.addf %45, %47 : vector<1x512xf32>
    %cst_33 = arith.constant 0.000000e+00 : f32
    %49 = vector.broadcast %cst_33 : f32 to vector<1x512xf32>
    %50 = arith.cmpf oge, %48, %49 : vector<1x512xf32>
    %cst_34 = arith.constant 2.000000e-01 : f32
    %51 = vector.broadcast %cst_34 : f32 to vector<1x512xf32>
    %52 = arith.mulf %51, %48 : vector<1x512xf32>
    %53 = arith.select %50, %48, %52 : vector<1x512xi1>, vector<1x512xf32>
    %cst_35 = arith.constant 1.41421354 : f32
    %54 = vector.broadcast %cst_35 : f32 to vector<1x512xf32>
    %55 = arith.mulf %53, %54 : vector<1x512xf32>
    %56 = arith.truncf %55 : vector<1x512xf32> to vector<1x512xbf16>
    %c3 = arith.constant 3 : index
    %c0_36 = arith.constant 0 : index
    %c0_37 = arith.constant 0 : index
    %57 = vector.load %arg3[%c3, %c0_36, %c0_37] : memref<8x512x512xbf16, #tpu.memory_space<vmem>>, vector<1x512x512xbf16>
    %58 = vector.shape_cast %57 : vector<1x512x512xbf16> to vector<512x512xbf16>
    %cst_38 = arith.constant dense<0.000000e+00> : vector<1x512xf32>
    %59 = tpu.matmul %56, %58, %cst_38 {dimension_numbers = #tpu.dot_dimension_numbers<[1], [0], [0], [1], [0, 0, 1, 1], [], []>} : vector<1x512xbf16>, vector<512x512xbf16>, vector<1x512xf32> -> vector<1x512xf32>
    %c3_39 = arith.constant 3 : index
    %c0_40 = arith.constant 0 : index
    %c0_41 = arith.constant 0 : index
    %60 = vector.load %arg4[%c3_39, %c0_40, %c0_41] : memref<8x1x512xf32, #tpu.memory_space<vmem>>, vector<1x1x512xf32>
    %61 = vector.shape_cast %60 : vector<1x1x512xf32> to vector<1x512xf32>
    %62 = arith.addf %59, %61 : vector<1x512xf32>
    %cst_42 = arith.constant 0.000000e+00 : f32
    %63 = vector.broadcast %cst_42 : f32 to vector<1x512xf32>
    %64 = arith.cmpf oge, %62, %63 : vector<1x512xf32>
    %cst_43 = arith.constant 2.000000e-01 : f32
    %65 = vector.broadcast %cst_43 : f32 to vector<1x512xf32>
    %66 = arith.mulf %65, %62 : vector<1x512xf32>
    %67 = arith.select %64, %62, %66 : vector<1x512xi1>, vector<1x512xf32>
    %cst_44 = arith.constant 1.41421354 : f32
    %68 = vector.broadcast %cst_44 : f32 to vector<1x512xf32>
    %69 = arith.mulf %67, %68 : vector<1x512xf32>
    %70 = arith.truncf %69 : vector<1x512xf32> to vector<1x512xbf16>
    %c4 = arith.constant 4 : index
    %c0_45 = arith.constant 0 : index
    %c0_46 = arith.constant 0 : index
    %71 = vector.load %arg3[%c4, %c0_45, %c0_46] : memref<8x512x512xbf16, #tpu.memory_space<vmem>>, vector<1x512x512xbf16>
    %72 = vector.shape_cast %71 : vector<1x512x512xbf16> to vector<512x512xbf16>
    %cst_47 = arith.constant dense<0.000000e+00> : vector<1x512xf32>
    %73 = tpu.matmul %70, %72, %cst_47 {dimension_numbers = #tpu.dot_dimension_numbers<[1], [0], [0], [1], [0, 0, 1, 1], [], []>} : vector<1x512xbf16>, vector<512x512xbf16>, vector<1x512xf32> -> vector<1x512xf32>
    %c4_48 = arith.constant 4 : index
    %c0_49 = arith.constant 0 : index
    %c0_50 = arith.constant 0 : index
    %74 = vector.load %arg4[%c4_48, %c0_49, %c0_50] : memref<8x1x512xf32, #tpu.memory_space<vmem>>, vector<1x1x512xf32>
    %75 = vector.shape_cast %74 : vector<1x1x512xf32> to vector<1x512xf32>
    %76 = arith.addf %73, %75 : vector<1x512xf32>
    %cst_51 = arith.constant 0.000000e+00 : f32
    %77 = vector.broadcast %cst_51 : f32 to vector<1x512xf32>
    %78 = arith.cmpf oge, %76, %77 : vector<1x512xf32>
    %cst_52 = arith.constant 2.000000e-01 : f32
    %79 = vector.broadcast %cst_52 : f32 to vector<1x512xf32>
    %80 = arith.mulf %79, %76 : vector<1x512xf32>
    %81 = arith.select %78, %76, %80 : vector<1x512xi1>, vector<1x512xf32>
    %cst_53 = arith.constant 1.41421354 : f32
    %82 = vector.broadcast %cst_53 : f32 to vector<1x512xf32>
    %83 = arith.mulf %81, %82 : vector<1x512xf32>
    %84 = arith.truncf %83 : vector<1x512xf32> to vector<1x512xbf16>
    %c5 = arith.constant 5 : index
    %c0_54 = arith.constant 0 : index
    %c0_55 = arith.constant 0 : index
    %85 = vector.load %arg3[%c5, %c0_54, %c0_55] : memref<8x512x512xbf16, #tpu.memory_space<vmem>>, vector<1x512x512xbf16>
    %86 = vector.shape_cast %85 : vector<1x512x512xbf16> to vector<512x512xbf16>
    %cst_56 = arith.constant dense<0.000000e+00> : vector<1x512xf32>
    %87 = tpu.matmul %84, %86, %cst_56 {dimension_numbers = #tpu.dot_dimension_numbers<[1], [0], [0], [1], [0, 0, 1, 1], [], []>} : vector<1x512xbf16>, vector<512x512xbf16>, vector<1x512xf32> -> vector<1x512xf32>
    %c5_57 = arith.constant 5 : index
    %c0_58 = arith.constant 0 : index
    %c0_59 = arith.constant 0 : index
    %88 = vector.load %arg4[%c5_57, %c0_58, %c0_59] : memref<8x1x512xf32, #tpu.memory_space<vmem>>, vector<1x1x512xf32>
    %89 = vector.shape_cast %88 : vector<1x1x512xf32> to vector<1x512xf32>
    %90 = arith.addf %87, %89 : vector<1x512xf32>
    %cst_60 = arith.constant 0.000000e+00 : f32
    %91 = vector.broadcast %cst_60 : f32 to vector<1x512xf32>
    %92 = arith.cmpf oge, %90, %91 : vector<1x512xf32>
    %cst_61 = arith.constant 2.000000e-01 : f32
    %93 = vector.broadcast %cst_61 : f32 to vector<1x512xf32>
    %94 = arith.mulf %93, %90 : vector<1x512xf32>
    %95 = arith.select %92, %90, %94 : vector<1x512xi1>, vector<1x512xf32>
    %cst_62 = arith.constant 1.41421354 : f32
    %96 = vector.broadcast %cst_62 : f32 to vector<1x512xf32>
    %97 = arith.mulf %95, %96 : vector<1x512xf32>
    %98 = arith.truncf %97 : vector<1x512xf32> to vector<1x512xbf16>
    %c6 = arith.constant 6 : index
    %c0_63 = arith.constant 0 : index
    %c0_64 = arith.constant 0 : index
    %99 = vector.load %arg3[%c6, %c0_63, %c0_64] : memref<8x512x512xbf16, #tpu.memory_space<vmem>>, vector<1x512x512xbf16>
    %100 = vector.shape_cast %99 : vector<1x512x512xbf16> to vector<512x512xbf16>
    %cst_65 = arith.constant dense<0.000000e+00> : vector<1x512xf32>
    %101 = tpu.matmul %98, %100, %cst_65 {dimension_numbers = #tpu.dot_dimension_numbers<[1], [0], [0], [1], [0, 0, 1, 1], [], []>} : vector<1x512xbf16>, vector<512x512xbf16>, vector<1x512xf32> -> vector<1x512xf32>
    %c6_66 = arith.constant 6 : index
    %c0_67 = arith.constant 0 : index
    %c0_68 = arith.constant 0 : index
    %102 = vector.load %arg4[%c6_66, %c0_67, %c0_68] : memref<8x1x512xf32, #tpu.memory_space<vmem>>, vector<1x1x512xf32>
    %103 = vector.shape_cast %102 : vector<1x1x512xf32> to vector<1x512xf32>
    %104 = arith.addf %101, %103 : vector<1x512xf32>
    %cst_69 = arith.constant 0.000000e+00 : f32
    %105 = vector.broadcast %cst_69 : f32 to vector<1x512xf32>
    %106 = arith.cmpf oge, %104, %105 : vector<1x512xf32>
    %cst_70 = arith.constant 2.000000e-01 : f32
    %107 = vector.broadcast %cst_70 : f32 to vector<1x512xf32>
    %108 = arith.mulf %107, %104 : vector<1x512xf32>
    %109 = arith.select %106, %104, %108 : vector<1x512xi1>, vector<1x512xf32>
    %cst_71 = arith.constant 1.41421354 : f32
    %110 = vector.broadcast %cst_71 : f32 to vector<1x512xf32>
    %111 = arith.mulf %109, %110 : vector<1x512xf32>
    %112 = arith.truncf %111 : vector<1x512xf32> to vector<1x512xbf16>
    %c7 = arith.constant 7 : index
    %c0_72 = arith.constant 0 : index
    %c0_73 = arith.constant 0 : index
    %113 = vector.load %arg3[%c7, %c0_72, %c0_73] : memref<8x512x512xbf16, #tpu.memory_space<vmem>>, vector<1x512x512xbf16>
    %114 = vector.shape_cast %113 : vector<1x512x512xbf16> to vector<512x512xbf16>
    %cst_74 = arith.constant dense<0.000000e+00> : vector<1x512xf32>
    %115 = tpu.matmul %112, %114, %cst_74 {dimension_numbers = #tpu.dot_dimension_numbers<[1], [0], [0], [1], [0, 0, 1, 1], [], []>} : vector<1x512xbf16>, vector<512x512xbf16>, vector<1x512xf32> -> vector<1x512xf32>
    %c7_75 = arith.constant 7 : index
    %c0_76 = arith.constant 0 : index
    %c0_77 = arith.constant 0 : index
    %116 = vector.load %arg4[%c7_75, %c0_76, %c0_77] : memref<8x1x512xf32, #tpu.memory_space<vmem>>, vector<1x1x512xf32>
    %117 = vector.shape_cast %116 : vector<1x1x512xf32> to vector<1x512xf32>
    %118 = arith.addf %115, %117 : vector<1x512xf32>
    %cst_78 = arith.constant 0.000000e+00 : f32
    %119 = vector.broadcast %cst_78 : f32 to vector<1x512xf32>
    %120 = arith.cmpf oge, %118, %119 : vector<1x512xf32>
    %cst_79 = arith.constant 2.000000e-01 : f32
    %121 = vector.broadcast %cst_79 : f32 to vector<1x512xf32>
    %122 = arith.mulf %121, %118 : vector<1x512xf32>
    %123 = arith.select %120, %118, %122 : vector<1x512xi1>, vector<1x512xf32>
    %cst_80 = arith.constant 1.41421354 : f32
    %124 = vector.broadcast %cst_80 : f32 to vector<1x512xf32>
    %125 = arith.mulf %123, %124 : vector<1x512xf32>
    %126 = arith.addf %125, %2 : vector<1x512xf32>
    %c0_81 = arith.constant 0 : index
    %c0_82 = arith.constant 0 : index
    %127 = vector.load %arg5[%c0_81, %c0_82] : memref<1x512xf32, #tpu.memory_space<vmem>>, vector<1x512xf32>
    %c0_83 = arith.constant 0 : index
    %c0_84 = arith.constant 0 : index
    %128 = vector.load %arg5[%c0_83, %c0_84] : memref<1x512xf32, #tpu.memory_space<vmem>>, vector<1x512xf32>
    %129 = arith.subf %126, %128 : vector<1x512xf32>
    %cst_85 = arith.constant 0.699999988 : f32
    %130 = vector.broadcast %cst_85 : f32 to vector<1x512xf32>
    %131 = arith.mulf %130, %129 : vector<1x512xf32>
    %132 = arith.addf %127, %131 : vector<1x512xf32>
    %c0_86 = arith.constant 0 : index
    %c0_87 = arith.constant 0 : index
    %133 = vector.load %arg6[%c0_86, %c0_87] : memref<512x32xf32, #tpu.memory_space<vmem>>, vector<512x32xf32>
    %cst_88 = arith.constant dense<0.000000e+00> : vector<1x32xf32>
    %134 = tpu.matmul %132, %133, %cst_88 {dimension_numbers = #tpu.dot_dimension_numbers<[1], [0], [0], [1], [0, 0, 1, 1], [], []>} : vector<1x512xf32>, vector<512x32xf32>, vector<1x32xf32> -> vector<1x32xf32>
    %cst_89 = arith.constant 0.0441941731 : f32
    %135 = vector.broadcast %cst_89 : f32 to vector<1x32xf32>
    %136 = arith.mulf %134, %135 : vector<1x32xf32>
    %c0_90 = arith.constant 0 : index
    %c0_91 = arith.constant 0 : index
    %137 = vector.load %arg7[%c0_90, %c0_91] : memref<1x32xf32, #tpu.memory_space<vmem>>, vector<1x32xf32>
    %138 = arith.addf %136, %137 : vector<1x32xf32>
    %c0_92 = arith.constant 0 : index
    %c0_93 = arith.constant 0 : index
    %139 = vector.load %arg8[%c0_92, %c0_93] : memref<32x288xf32, #tpu.memory_space<vmem>>, vector<32x288xf32>
    %cst_94 = arith.constant dense<0.000000e+00> : vector<1x288xf32>
    %140 = tpu.matmul %138, %139, %cst_94 {dimension_numbers = #tpu.dot_dimension_numbers<[1], [0], [0], [1], [0, 0, 1, 1], [], []>} : vector<1x32xf32>, vector<32x288xf32>, vector<1x288xf32> -> vector<1x288xf32>
    %c0_95 = arith.constant 0 : index
    %c0_96 = arith.constant 0 : index
    %141 = vector.load %arg9[%c0_95, %c0_96] : memref<16x288xf32, #tpu.memory_space<vmem>>, vector<16x288xf32>
    %142 = vector.broadcast %140 : vector<1x288xf32> to vector<16x288xf32>
    %143 = arith.mulf %141, %142 : vector<16x288xf32>
    %c0_97 = arith.constant 0 : index
    %c0_98 = arith.constant 0 : index
    %144 = vector.load %arg10[%c0_97, %c0_98] : memref<288x32xf32, #tpu.memory_space<vmem>>, vector<288x32xf32>
    %cst_99 = arith.constant dense<0.000000e+00> : vector<16x32xf32>
    %145 = tpu.matmul %143, %144, %cst_99 {dimension_numbers = #tpu.dot_dimension_numbers<[1], [0], [0], [1], [0, 0, 1, 1], [], []>} : vector<16x288xf32>, vector<288x32xf32>, vector<16x32xf32> -> vector<16x32xf32>
    %cst_100 = arith.constant 0.0589255653 : f32
    %146 = vector.broadcast %cst_100 : f32 to vector<16x32xf32>
    %147 = arith.mulf %145, %146 : vector<16x32xf32>
    %148 = arith.mulf %138, %138 : vector<1x32xf32>
    %c0_101 = arith.constant 0 : index
    %c0_102 = arith.constant 0 : index
    %149 = vector.load %arg11[%c0_101, %c0_102] : memref<32x32xf32, #tpu.memory_space<vmem>>, vector<32x32xf32>
    %cst_103 = arith.constant dense<0.000000e+00> : vector<1x32xf32>
    %150 = tpu.matmul %148, %149, %cst_103 {dimension_numbers = #tpu.dot_dimension_numbers<[1], [0], [0], [1], [0, 0, 1, 1], [], []>} : vector<1x32xf32>, vector<32x32xf32>, vector<1x32xf32> -> vector<1x32xf32>
    %cst_104 = arith.constant 0.00347222225 : f32
    %151 = vector.broadcast %cst_104 : f32 to vector<1x32xf32>
    %152 = arith.mulf %151, %150 : vector<1x32xf32>
    %cst_105 = arith.constant 9.99999993E-9 : f32
    %153 = vector.broadcast %cst_105 : f32 to vector<1x32xf32>
    %154 = arith.addf %152, %153 : vector<1x32xf32>
    %155 = math.rsqrt %154 : vector<1x32xf32>
    %156 = vector.broadcast %155 : vector<1x32xf32> to vector<16x32xf32>
    %157 = arith.mulf %147, %156 : vector<16x32xf32>
    %c0_106 = arith.constant 0 : index
    %c0_107 = arith.constant 0 : index
    %158 = vector.load %arg12[%c0_106, %c0_107] : memref<1x32xf32, #tpu.memory_space<vmem>>, vector<1x32xf32>
    %159 = vector.broadcast %158 : vector<1x32xf32> to vector<16x32xf32>
    %160 = arith.addf %157, %159 : vector<16x32xf32>
    %cst_108 = arith.constant 0.000000e+00 : f32
    %161 = vector.broadcast %cst_108 : f32 to vector<16x32xf32>
    %162 = arith.cmpf oge, %160, %161 : vector<16x32xf32>
    %cst_109 = arith.constant 2.000000e-01 : f32
    %163 = vector.broadcast %cst_109 : f32 to vector<16x32xf32>
    %164 = arith.mulf %163, %160 : vector<16x32xf32>
    %165 = arith.select %162, %160, %164 : vector<16x32xi1>, vector<16x32xf32>
    %cst_110 = arith.constant 1.41421354 : f32
    %166 = vector.broadcast %cst_110 : f32 to vector<16x32xf32>
    %167 = arith.mulf %165, %166 : vector<16x32xf32>
    %c0_111 = arith.constant 0 : index
    %c0_112 = arith.constant 0 : index
    %168 = vector.load %arg13[%c0_111, %c0_112] : memref<512x32xf32, #tpu.memory_space<vmem>>, vector<512x32xf32>
    %cst_113 = arith.constant dense<0.000000e+00> : vector<1x32xf32>
    %169 = tpu.matmul %132, %168, %cst_113 {dimension_numbers = #tpu.dot_dimension_numbers<[1], [0], [0], [1], [0, 0, 1, 1], [], []>} : vector<1x512xf32>, vector<512x32xf32>, vector<1x32xf32> -> vector<1x32xf32>
    %cst_114 = arith.constant 0.0441941731 : f32
    %170 = vector.broadcast %cst_114 : f32 to vector<1x32xf32>
    %171 = arith.mulf %169, %170 : vector<1x32xf32>
    %c0_115 = arith.constant 0 : index
    %c0_116 = arith.constant 0 : index
    %172 = vector.load %arg14[%c0_115, %c0_116] : memref<1x32xf32, #tpu.memory_space<vmem>>, vector<1x32xf32>
    %173 = arith.addf %171, %172 : vector<1x32xf32>
    %174 = vector.broadcast %173 : vector<1x32xf32> to vector<16x32xf32>
    %175 = arith.mulf %167, %174 : vector<16x32xf32>
    %c0_117 = arith.constant 0 : index
    %c0_118 = arith.constant 0 : index
    %176 = vector.load %arg15[%c0_117, %c0_118] : memref<32x8xf32, #tpu.memory_space<vmem>>, vector<32x8xf32>
    %cst_119 = arith.constant dense<0.000000e+00> : vector<16x8xf32>
    %177 = tpu.matmul %175, %176, %cst_119 {dimension_numbers = #tpu.dot_dimension_numbers<[1], [0], [0], [1], [0, 0, 1, 1], [], []>} : vector<16x32xf32>, vector<32x8xf32>, vector<16x8xf32> -> vector<16x8xf32>
    %cst_120 = arith.constant 0.176776692 : f32
    %178 = vector.broadcast %cst_120 : f32 to vector<16x8xf32>
    %179 = arith.mulf %177, %178 : vector<16x8xf32>
    %c0_121 = arith.constant 0 : index
    %c0_122 = arith.constant 0 : index
    %180 = vector.load %arg16[%c0_121, %c0_122] : memref<1x8xf32, #tpu.memory_space<vmem>>, vector<1x8xf32>
    %181 = vector.broadcast %180 : vector<1x8xf32> to vector<16x8xf32>
    %182 = arith.addf %179, %181 : vector<16x8xf32>
    %c0_123 = arith.constant 0 : index
    %c0_124 = arith.constant 0 : index
    %183 = vector.load %arg17[%c0_123, %c0_124] : memref<16x8xf32, #tpu.memory_space<vmem>>, vector<16x8xf32>
    tpu.vector_store %arg17[%c0_123, %c0_124], %182 {strides = array<i32>} : memref<16x8xf32, #tpu.memory_space<vmem>>, vector<16x8xf32>,
    return
  }
}

</mosaic_0001>

<bundles_post_ra>
// kernel: _forward_jit.1
= control target key start
LH: loop header
LB: loop body
LE: loop exit
PB: predicated region body
PF: predicated region fallthrough
CT: control target
= control target key end

     0   :  { %s13438_s0 = inlined_call_operand.hbm [shape: f32[1,80], index: 0, kind: input, shape index: {}]   ;;  %s13439_s1 = inlined_call_operand.hbm [shape: f32[80,512], index: 1, kind: input, shape index: {}]   ;;  %s13440_s2 = inlined_call_operand.hbm [shape: f32[1,512], index: 2, kind: input, shape index: {}]   ;;  %s13441_s3 = inlined_call_operand.hbm [shape: bf16[8,512,512], index: 3, kind: input, shape index: {}]   ;;  %s13442_s4 = inlined_call_operand.hbm [shape: f32[8,1,512], index: 4, kind: input, shape index: {}]   ;;  %s13443_s5 = inlined_call_operand.hbm [shape: f32[1,512], index: 5, kind: input, shape index: {}]   ;;  %s13444_s6 = inlined_call_operand.vmem [shape: f32[512,32], index: 6, kind: input, shape index: {}]   ;;  %s13445_s7 = inlined_call_operand.hbm [shape: f32[1,32], index: 7, kind: input, shape index: {}]   ;;  %s13446_s8 = inlined_call_operand.hbm [shape: f32[32,288], index: 8, kind: input, shape index: {}]   ;;  %s13447_s9 = inlined_call_operand.hbm [shape: f32[16,288], index: 9, kind: input, shape index: {}]   ;;  %s13448_s10 = inlined_call_operand.vmem [shape: f32[288,32], index: 10, kind: input, shape index: {}]   ;;  %s13449_s11 = inlined_call_operand.hbm [shape: f32[32,32], index: 11, kind: input, shape index: {}]   ;;  %s13450_s12 = inlined_call_operand.hbm [shape: f32[1,32], index: 12, kind: input, shape index: {}]   ;;  %s13451_s13 = inlined_call_operand.vmem [shape: f32[512,32], index: 13, kind: input, shape index: {}]   ;;  %s13452_s14 = inlined_call_operand.hbm [shape: f32[1,32], index: 14, kind: input, shape index: {}]   ;;  %s13453_s15 = inlined_call_operand.vmem [shape: f32[32,8], index: 15, kind: input, shape index: {}]   ;;  %s13454_s16 = inlined_call_operand.hbm [shape: f32[1,8], index: 16, kind: input, shape index: {}]   ;;  %s13455_s17 = inlined_call_operand.vmem [shape: f32[16,8], index: 17, kind: output, shape index: {}]  }
   0x1   :  { %13456 = sst [smem:[#allocation29_spill]] %s13438_s0 }
   0x2   :  { %13457 = sst [smem:[#allocation30_spill]] %s13439_s1 }
   0x3   :  { %22 = vsyncpa [#allocation3], 0 }
   0x4   :  { %23 = vsyncpa [#allocation5], 0 }
   0x5   :  { %24 = vsyncpa [#allocation8], 0 }
   0x6   :  { %25 = vsyncpa [#allocation11], 0 }
   0x7   :  { %26 = vsyncpa [#allocation14], 0 }
   0x8   :  { %27 = vsyncpa [#allocation17], 0 }
   0x9   :  { %28 = vsyncpa [#allocation20], 0  ;;  %s12490_s24 = smov [#allocation4]  }
   0xa   :  { %s44_s25 = sshll.u32 %s12490_s24, 4  ;;  %s45_s25 = int_to_ptr.vmem [resolvable:$true] %s44_s25 }
   0xb   :  { %s12224_s26 = scalar_lea.vmem %s45_s25, 5120  ;;  %p12229_p1 = scmp.lt.s32.totalorder %s45_s25, %s45_s25 }
   0xc   :  { %p12225_p0 = scmp.ne.s32.totalorder %s45_s25, %s12224_s26  ;;  %p12230_p2 = scmp.lt.s32.totalorder %s12224_s26, %s12224_s26 }
   0xe   :  { %p12231_p3 = por %p12230_p2, %p12229_p1 }
  0x10   :  { %p12232_p4 = pnand %p12231_p3, %p12225_p0 }
  0x12   :  { %12235 = shalt.err (!%p12232_p4)
}
  0x13   :  { %s12491_s27 = smov 512   ;;  %s12492_s28 = smov 32  }
  0x14   :  { %s13458_s30 = sld [smem:[#allocation30_spill]]  ;;  %s12493_s18 = smov [#allocation7]  }
  0x15   :  { %s66_s19 = sshll.u32 %s12493_s18, 4  ;;  %s67_s19 = int_to_ptr.vmem [resolvable:$true] %s66_s19 }
  0x16   :  { %s12244_s1 = scalar_lea.vmem %s67_s19, 131072  ;;  %p12249_p6 = scmp.lt.s32.totalorder %s67_s19, %s67_s19 }
  0x17   :  { %p12245_p5 = scmp.ne.s32.totalorder %s67_s19, %s12244_s1  ;;  %p12250_p7 = scmp.lt.s32.totalorder %s12244_s1, %s12244_s1 }
  0x19   :  { %p12251_p8 = por %p12250_p7, %p12249_p6 }
  0x1a   :  { %50 = dma.hbm_to_vmem [thread:$0]  %s13458_s30, 5120, %s45_s25, [#allocation5], %s12491_s27, %s12491_s27, %s12492_s28  }
  0x1b   :  { %p12252_p9 = pnand %p12251_p8, %p12245_p5 }
  0x1d   :  { %12255 = shalt.err (!%p12252_p9)
}
  0x1e   :  { %s12494_s20 = smov 256   ;;  %s12495_s21 = smov 16  }
  0x1f   :  { %72 = dma.hbm_to_vmem [thread:$0]  %s13441_s3, 131072, %s67_s19, [#allocation8], %s12494_s20, %s12494_s20, %s12495_s21  }
  0x20   :  { %s12496_s24 = smov [#allocation10]   ;;  %s12497_s29 = smov [#allocation13]  }
  0x21   :  { %s91_s26 = sshll.u32 %s12496_s24, 4  ;;  %s112_s25 = sshll.u32 %s12497_s29, 4  ;;  %s92_s26 = int_to_ptr.vmem [resolvable:$true] %s91_s26  ;;  %s113_s25 = int_to_ptr.vmem [resolvable:$true] %s112_s25 }
  0x22   :  { %s12264_s27 = scalar_lea.vmem %s92_s26, 64  ;;  %p12269_p11 = scmp.lt.s32.totalorder %s92_s26, %s92_s26 }
  0x23   :  { %p12265_p10 = scmp.ne.s32.totalorder %s92_s26, %s12264_s27  ;;  %p12270_p12 = scmp.lt.s32.totalorder %s12264_s27, %s12264_s27 }
  0x25   :  { %p12271_p13 = por %p12270_p12, %p12269_p11 }
  0x27   :  { %p12272_p0 = pnand %p12271_p13, %p12265_p10 }
  0x29   :  { %12275 = shalt.err (!%p12272_p0)
}
  0x2a   :  { %94 = dma.hbm_to_vmem [thread:$0]  %s13443_s5, 64, %s92_s26, [#allocation11]  }
  0x2b   :  { %s12284_s30 = scalar_lea.vmem %s113_s25, 1536  ;;  %p12289_p2 = scmp.lt.s32.totalorder %s113_s25, %s113_s25 }
  0x2c   :  { %p12285_p1 = scmp.ne.s32.totalorder %s113_s25, %s12284_s30  ;;  %p12290_p3 = scmp.lt.s32.totalorder %s12284_s30, %s12284_s30 }
  0x2e   :  { %p12291_p4 = por %p12290_p3, %p12289_p2 }
  0x30   :  { %p12292_p5 = pnand %p12291_p4, %p12285_p1 }
  0x32   :  { %12295 = shalt.err (!%p12292_p5)
}
  0x33   :  { %s12498_s3 = smov 384   ;;  %s12499_s18 = smov 24  }
  0x34   :  { %118 = dma.hbm_to_vmem [thread:$0]  %s13446_s8, 1536, %s113_s25, [#allocation14], %s12498_s3, %s12498_s3, %s12499_s18  }
  0x35   :  { %s12500_s20 = smov [#allocation16]  }
  0x36   :  { %s138_s21 = sshll.u32 %s12500_s20, 4  ;;  %s139_s21 = int_to_ptr.vmem [resolvable:$true] %s138_s21 }
  0x37   :  { %s12304_s5 = scalar_lea.vmem %s139_s21, 512  ;;  %p12309_p7 = scmp.lt.s32.totalorder %s139_s21, %s139_s21 }
  0x38   :  { %p12305_p6 = scmp.ne.s32.totalorder %s139_s21, %s12304_s5  ;;  %p12310_p8 = scmp.lt.s32.totalorder %s12304_s5, %s12304_s5 }
  0x3a   :  { %p12311_p9 = por %p12310_p8, %p12309_p7 }
  0x3c   :  { %p12312_p10 = pnand %p12311_p9, %p12305_p6 }
  0x3e   :  { %12315 = shalt.err (!%p12312_p10)
}
  0x3f   :  { %s12501_s22 = smov 128   ;;  %s12502_s23 = smov 8  }
  0x40   :  { %144 = dma.hbm_to_vmem [thread:$0]  %s13449_s11, 512, %s139_s21, [#allocation17], %s12501_s22, %s12501_s22, %s12502_s23  }
  0x41   :  { %s12503_s29 = smov [#allocation19]   ;;  %s12504_s8 = smov [#allocation2]  }
  0x42   :  { %s163_s27 = sshll.u32 %s12503_s29, 4  ;;  %s35_s25 = sshll.u32 %s12504_s8, 4  ;;  %s164_s27 = int_to_ptr.vmem [resolvable:$true] %s163_s27  ;;  %s36_s25 = int_to_ptr.vmem [resolvable:$true] %s35_s25 }
  0x43   :  { %s12324_s28 = scalar_lea.vmem %s164_s27, 16  ;;  %s12328_s0 = scalar_lea.vmem %s164_s27, 32 }
  0x44   :  { %p12325_p11 = scmp.ne.s32.totalorder %s164_s27, %s12324_s28  ;;  %p12329_p12 = scmp.lt.s32.totalorder %s164_s27, %s164_s27 }
  0x45   :  { %p12330_p13 = scmp.lt.s32.totalorder %s12328_s0, %s12324_s28 }
  0x47   :  { %p12331_p0 = por %p12330_p13, %p12329_p12 }
  0x49   :  { %p12332_p1 = pnand %p12331_p0, %p12325_p11 }
  0x4b   :  { %12335 = shalt.err (!%p12332_p1)
}
  0x4c   :  { %166 = dma.hbm_to_vmem [thread:$0]  %s13452_s14, 16, %s164_s27, [#allocation20]  }
  0x4d   :  { %s12344_s1 = scalar_lea.vmem %s36_s25, 16  ;;  %s12348_s11 = scalar_lea.vmem %s36_s25, 32 }
  0x4e   :  { %p12345_p2 = scmp.ne.s32.totalorder %s36_s25, %s12344_s1  ;;  %p12349_p3 = scmp.lt.s32.totalorder %s36_s25, %s36_s25 }
  0x4f   :  { %p12350_p4 = scmp.lt.s32.totalorder %s12348_s11, %s12344_s1 }
  0x51   :  { %p12351_p5 = por %p12350_p4, %p12349_p3 }
  0x53   :  { %p12352_p6 = pnand %p12351_p5, %p12345_p2 }
  0x55   :  { %12355 = shalt.err (!%p12352_p6)
}
  0x56   :  { %s13459_s5 = sld [smem:[#allocation29_spill]]  ;;  %s12505_s22 = smov [#allocation6]  }
  0x57   :  { %s57_s23 = sshll.u32 %s12505_s22, 4  ;;  %s12506_s24 = smov [#allocation9]   ;;  %s58_s23 = int_to_ptr.vmem [resolvable:$true] %s57_s23 }
  0x58   :  { %s78_s26 = sshll.u32 %s12506_s24, 4  ;;  %s12364_s29 = scalar_lea.vmem %s58_s23, 64  ;;  %s79_s26 = int_to_ptr.vmem [resolvable:$true] %s78_s26 }
  0x59   :  { %p12365_p7 = scmp.ne.s32.totalorder %s58_s23, %s12364_s29  ;;  %p12369_p8 = scmp.lt.s32.totalorder %s58_s23, %s58_s23 }
  0x5a   :  { %p12370_p9 = scmp.lt.s32.totalorder %s12364_s29, %s12364_s29 }
  0x5c   :  { %38 = dma.hbm_to_vmem [thread:$0]  %s13459_s5, 16, %s36_s25, [#allocation3]  }
  0x5d   :  { %p12371_p10 = por %p12370_p9, %p12369_p8 }
  0x5f   :  { %p12372_p11 = pnand %p12371_p10, %p12365_p7 }
  0x61   :  { %12375 = shalt.err (!%p12372_p11)
}
  0x62   :  { %60 = dma.hbm_to_vmem [thread:$0]  %s13440_s2, 64, %s58_s23, [#allocation5]  }
  0x63   :  { %s12384_s8 = scalar_lea.vmem %s79_s26, 512  ;;  %p12389_p13 = scmp.lt.s32.totalorder %s79_s26, %s79_s26 }
  0x64   :  { %p12385_p12 = scmp.ne.s32.totalorder %s79_s26, %s12384_s8  ;;  %p12390_p0 = scmp.lt.s32.totalorder %s12384_s8, %s12384_s8 }
  0x66   :  { %p12391_p1 = por %p12390_p0, %p12389_p13 }
  0x68   :  { %p12392_p2 = pnand %p12391_p1, %p12385_p12 }
  0x6a   :  { %12395 = shalt.err (!%p12392_p2)
}
  0x6b   :  { %s12507_s25 = smov 64   ;;  %s12508_s28 = smov 4  }
  0x6c   :  { %84 = dma.hbm_to_vmem [thread:$0]  %s13442_s4, 512, %s79_s26, [#allocation8], %s12507_s25, %s12507_s25, %s12508_s28  }
  0x6d   :  { %s12509_s19 = smov [#allocation12]   ;;  %s12510_s11 = smov [#allocation15]  }
  0x6e   :  { %s103_s1 = sshll.u32 %s12509_s19, 4  ;;  %s124_s20 = sshll.u32 %s12510_s11, 4  ;;  %s104_s1 = int_to_ptr.vmem [resolvable:$true] %s103_s1  ;;  %s125_s20 = int_to_ptr.vmem [resolvable:$true] %s124_s20 }
  0x6f   :  { %s12404_s2 = scalar_lea.vmem %s104_s1, 16  ;;  %s12408_s21 = scalar_lea.vmem %s104_s1, 32 }
  0x70   :  { %p12405_p3 = scmp.ne.s32.totalorder %s104_s1, %s12404_s2  ;;  %p12409_p4 = scmp.lt.s32.totalorder %s104_s1, %s104_s1 }
  0x71   :  { %p12410_p5 = scmp.lt.s32.totalorder %s12408_s21, %s12404_s2 }
  0x73   :  { %p12411_p6 = por %p12410_p5, %p12409_p4 }
  0x75   :  { %p12412_p7 = pnand %p12411_p6, %p12405_p3 }
  0x77   :  { %12415 = shalt.err (!%p12412_p7)
}
  0x78   :  { %106 = dma.hbm_to_vmem [thread:$0]  %s13445_s7, 16, %s104_s1, [#allocation11]  }
  0x79   :  { %s12424_s23 = scalar_lea.vmem %s125_s20, 768  ;;  %p12429_p9 = scmp.lt.s32.totalorder %s125_s20, %s125_s20 }
  0x7a   :  { %p12425_p8 = scmp.ne.s32.totalorder %s125_s20, %s12424_s23  ;;  %p12430_p10 = scmp.lt.s32.totalorder %s12424_s23, %s12424_s23 }
  0x7c   :  { %p12431_p11 = por %p12430_p10, %p12429_p9 }
  0x7e   :  { %p12432_p12 = pnand %p12431_p11, %p12425_p8 }
  0x80   :  { %12435 = shalt.err (!%p12432_p12)
}
  0x81   :  { %130 = dma.hbm_to_vmem [thread:$0]  %s13447_s9, 768, %s125_s20, [#allocation14], %s12498_s3, %s12498_s3, %s12499_s18  }
  0x82   :  { %s12511_s26 = smov [#allocation18]   ;;  %s12512_s14 = smov [#allocation21]  }
  0x83   :  { %s151_s29 = sshll.u32 %s12511_s26, 4  ;;  %s175_s7 = sshll.u32 %s12512_s14, 4  ;;  %s152_s29 = int_to_ptr.vmem [resolvable:$true] %s151_s29  ;;  %s176_s7 = int_to_ptr.vmem [resolvable:$true] %s175_s7 }
  0x84   :  { %s12444_s27 = scalar_lea.vmem %s152_s29, 16  ;;  %s12448_s8 = scalar_lea.vmem %s152_s29, 32 }
  0x85   :  { %p12445_p13 = scmp.ne.s32.totalorder %s152_s29, %s12444_s27  ;;  %p12449_p0 = scmp.lt.s32.totalorder %s152_s29, %s152_s29 }
  0x86   :  { %p12450_p1 = scmp.lt.s32.totalorder %s12448_s8, %s12444_s27 }
  0x88   :  { %p12451_p2 = por %p12450_p1, %p12449_p0 }
  0x8a   :  { %p12452_p3 = pnand %p12451_p2, %p12445_p13 }
  0x8c   :  { %12455 = shalt.err (!%p12452_p3)
}
  0x8d   :  { %154 = dma.hbm_to_vmem [thread:$0]  %s13450_s12, 16, %s152_s29, [#allocation17]  }
  0x8e   :  { %s12464_s0 = scalar_lea.vmem %s176_s7, 16  ;;  %s12468_s9 = scalar_lea.vmem %s176_s7, 32 }
  0x8f   :  { %p12465_p4 = scmp.ne.s32.totalorder %s176_s7, %s12464_s0  ;;  %p12469_p5 = scmp.lt.s32.totalorder %s176_s7, %s176_s7 }
  0x90   :  { %p12470_p6 = scmp.lt.s32.totalorder %s12468_s9, %s12464_s0 }
  0x92   :  { %p12471_p7 = por %p12470_p6, %p12469_p5 }
  0x94   :  { %p12472_p8 = pnand %p12471_p7, %p12465_p4 }
  0x96   :  { %12475 = shalt.err (!%p12472_p8)
}
  0x97   :  { %178 = dma.hbm_to_vmem [thread:$0]  %s13454_s16, 16, %s176_s7, [#allocation20]  }
  0x98   :  { %12476 = dma.done.wait [#allocation3], 16  }
  0x99   :  { %12477 = vsyncadd [#allocation3], 4294967280 }
  0x9a   :  { %12478 = dma.done.wait [#allocation5], 5184  }
  0x9b   :  { %12479 = vsyncadd [#allocation5], 4294962112 }
  0x9c   :  { %12480 = dma.done.wait [#allocation8], 131584  }
  0x9d   :  { %12481 = vsyncadd [#allocation8], 4294835712 }
  0x9e   :  { %12482 = dma.done.wait [#allocation11], 80  }
  0x9f   :  { %12483 = vsyncadd [#allocation11], 4294967216 }
  0xa0   :  { %12484 = dma.done.wait [#allocation14], 2304  }
  0xa1   :  { %12485 = vsyncadd [#allocation14], 4294964992 }
  0xa2   :  { %12486 = dma.done.wait [#allocation17], 528  }
  0xa3   :  { %12487 = vsyncadd [#allocation17], 4294966768 }
  0xa4   :  { %12488 = dma.done.wait [#allocation20], 32  }
  0xa5   :  { %12489 = vsyncadd [#allocation20], 4294967264  ;;  %v408_v0 = vlaneseq  ;;  %v12513_v1 = vmov 0.0   ;;  %v405_v7 = vld [vmem:[#allocation6] sm:$0xf]  ;;  %v256_v8 = vld [vmem:[#allocation4 + $0x128] sm:$0xff] }
  0xa6   :  { %327 = vmatprep.mubr.f32.mxu0 %v12513_v1  ;;  %398 = vmatprep.mubr.f32.mxu1 %v12513_v1  ;;  %v255_v9 = vld [vmem:[#allocation4 + $0x120] sm:$0xff]  ;;  %v406_v10 = vmul.f32 %v405_v7, %v405_v7  ;;  %v258_v11 = vld [vmem:[#allocation4 + $0x138] sm:$0xff]  ;;  %v252_v12 = vld [vmem:[#allocation4 + $0x108] sm:$0xff]  ;;  %vm428_vm0 = vcmask 1040384   ;;  %vm259_vm1 = vcmask 654336  }
  0xa7   :  { %v12653_v2 = vshrl.u32 %v408_v0, 7  ;;  %275 = vmatprep.subr.mxu0 %v256_v8  ;;  %v257_v13 = vld [vmem:[#allocation4 + $0x130] sm:$0xff]  ;;  %346 = vmatprep.subr.mxu1 %v258_v11  ;;  %v251_v14 = vld [vmem:[#allocation4 + $0x100] sm:$0xff]  ;;  %v254_v15 = vld [vmem:[#allocation4 + $0x118] sm:$0xff] }
  0xa8   :  { %276 = vmatpush1.msra.mxu0 %v255_v9  ;;  %v248_v16 = vld [vmem:[#allocation4 + $0xe8] sm:$0xff]  ;;  %v253_v21 = vld [vmem:[#allocation4 + $0x110] sm:$0xff]  ;;  %v247_v22 = vld [vmem:[#allocation4 + $0xe0] sm:$0xff]  ;;  %347 = vmatpush1.msra.mxu1 %v257_v13 }
  0xa9   :  { %v12656_v3 = vsub.s32 0, %v12653_v2  ;;  %v12659_v4 = vsub.s32 1, %v12653_v2  ;;  %v12662_v5 = vsub.s32 2, %v12653_v2  ;;  %v12665_v6 = vsub.s32 3, %v12653_v2  ;;  %277 = vmatprep.subr.mxu0 %v252_v12  ;;  %v250_v23 = vld [vmem:[#allocation4 + $0xf8] sm:$0xff]  ;;  %v244_v24 = vld [vmem:[#allocation4 + $0xc8] sm:$0xff]  ;;  %348 = vmatprep.subr.mxu1 %v254_v15 }
  0xaa   :  { %278 = vmatpush1.msra.mxu0 %v251_v14  ;;  %v249_v28 = vld [vmem:[#allocation4 + $0xf0] sm:$0xff]  ;;  %v243_v29 = vld [vmem:[#allocation4 + $0xc0] sm:$0xff]  ;;  %349 = vmatpush1.msra.mxu1 %v253_v21  ;;  %v246_v31 = vld [vmem:[#allocation4 + $0xd8] sm:$0xff] }
  0xab   :  { %v411_v17 = vrot.slane %v406_v10, %v12656_v3  ;;  %v415_v18 = vrot.slane %v406_v10, %v12659_v4  ;;  %v419_v19 = vrot.slane %v406_v10, %v12662_v5  ;;  %v423_v20 = vrot.slane %v406_v10, %v12665_v6  ;;  %279 = vmatprep.subr.mxu0 %v248_v16  ;;  %v240_v32 = vld [vmem:[#allocation4 + $0xa8] sm:$0xff]  ;;  %v245_v34 = vld [vmem:[#allocation4 + $0xd0] sm:$0xff]  ;;  %v239_v35 = vld [vmem:[#allocation4 + $0xa0] sm:$0xff] }
  0xac   :  { %280 = vmatpush1.msra.mxu0 %v247_v22  ;;  %350 = vmatprep.subr.mxu1 %v250_v23  ;;  %v242_v37 = vld [vmem:[#allocation4 + $0xb8] sm:$0xff]  ;;  %v236_v38 = vld [vmem:[#allocation4 + $0x88] sm:$0xff]  ;;  %v241_v39 = vld [vmem:[#allocation4 + $0xb0] sm:$0xff] }
  0xad   :  { %v429_v25 = vsel %vm428_vm0, %v411_v17, 0.0  ;;  %v430_v26 = vsel %vm428_vm0, %v415_v18, 0.0  ;;  %v432_v27 = vsel %vm428_vm0, %v419_v19, 0.0  ;;  %v434_v33 = vsel %vm428_vm0, %v423_v20, 0.0  ;;  %281 = vmatprep.subr.mxu0 %v244_v24  ;;  %351 = vmatpush1.msra.mxu1 %v249_v28  ;;  %v235_v41 = vld [vmem:[#allocation4 + $0x80] sm:$0xff]  ;;  %v238_v42 = vld [vmem:[#allocation4 + $0x98] sm:$0xff] }
  0xae   :  { %v431_v30 = vadd.f32 %v430_v26, %v429_v25  ;;  %282 = vmatpush1.msra.mxu0 %v243_v29  ;;  %352 = vmatprep.subr.mxu1 %v246_v31  ;;  %v232_v43 = vld [vmem:[#allocation4 + $0x68] sm:$0xff]  ;;  %v237_v44 = vld [vmem:[#allocation4 + $0x90] sm:$0xff]  ;;  %v231_v45 = vld [vmem:[#allocation4 + $0x60] sm:$0xff] }
  0xaf   :  { %283 = vmatprep.subr.mxu0 %v240_v32  ;;  %353 = vmatpush1.msra.mxu1 %v245_v34  ;;  %v234_v46 = vld [vmem:[#allocation4 + $0x78] sm:$0xff]  ;;  %v228_v47 = vld [vmem:[#allocation4 + $0x48] sm:$0xff]  ;;  %v233_v48 = vld [vmem:[#allocation4 + $0x70] sm:$0xff] }
  0xb0   :  { %v433_v36 = vadd.f32 %v432_v27, %v431_v30  ;;  %284 = vmatpush1.msra.mxu0 %v239_v35  ;;  %354 = vmatprep.subr.mxu1 %v242_v37  ;;  %v227_v49 = vld [vmem:[#allocation4 + $0x40] sm:$0xff]  ;;  %v230_v50 = vld [vmem:[#allocation4 + $0x58] sm:$0xff]  ;;  %v224_v51 = vld [vmem:[#allocation4 + $0x28] sm:$0xff] }
  0xb1   :  { %285 = vmatprep.subr.mxu0 %v236_v38  ;;  %355 = vmatpush1.msra.mxu1 %v241_v39  ;;  %v229_v52 = vld [vmem:[#allocation4 + $0x50] sm:$0xff]  ;;  %v223_v53 = vld [vmem:[#allocation4 + $0x20] sm:$0xff]  ;;  %v226_v54 = vld [vmem:[#allocation4 + $0x38] sm:$0xff] }
  0xb2   :  { %v435_v40 = vadd.f32 %v434_v33, %v433_v36  ;;  %286 = vmatpush1.msra.mxu0 %v235_v41  ;;  %356 = vmatprep.subr.mxu1 %v238_v42  ;;  %v220_v55 = vld [vmem:[#allocation4 + $0x8] sm:$0xff]  ;;  %v225_v56 = vld [vmem:[#allocation4 + $0x30] sm:$0xff]  ;;  %v219_v57 = vld [vmem:[#allocation4] sm:$0xff] }
  0xb3   :  { %287 = vmatprep.subr.mxu0 %v232_v43  ;;  %357 = vmatpush1.msra.mxu1 %v237_v44  ;;  %v222_v58 = vld [vmem:[#allocation4 + $0x18] sm:$0xff]  ;;  %v221_v60 = vld [vmem:[#allocation4 + $0x10] sm:$0xff] }
  0xb4   :  { %436 = vadd.xlane.f32.xlu0 %v435_v40  ;;  %288 = vmatpush1.msra.mxu0 %v231_v45  ;;  %v218_v59 = vld [vmem:[#allocation2] sm:$0x1]  ;;  %v10677_v61 = vld [vmem:[#allocation7 + $0xe4] ss:$16 sps:$4 sm:$0xff]   ;;  %v10675_v63 = vld [vmem:[#allocation7 + $0xe0] ss:$16 sps:$4 sm:$0xff]  }
  0xb5   :  { %358 = vmatprep.subr.mxu1 %v234_v46  ;;  %289 = vmatprep.subr.mxu0 %v228_v47  ;;  %v10680_v62 = vld [vmem:[#allocation7 + $0x2e4] ss:$16 sps:$4 sm:$0xff]   ;;  %v10678_v0 = vld [vmem:[#allocation7 + $0x2e0] ss:$16 sps:$4 sm:$0xff]  }
  0xb6   :  { %359 = vmatpush1.msra.mxu1 %v233_v48  ;;  %290 = vmatpush1.msra.mxu0 %v227_v49  ;;  %v10683_v7 = vld [vmem:[#allocation7 + $0xc4] ss:$16 sps:$4 sm:$0xff]   ;;  %v10681_v9 = vld [vmem:[#allocation7 + $0xc0] ss:$16 sps:$4 sm:$0xff]  }
  0xb7   :  { %360 = vmatprep.subr.mxu1 %v230_v50  ;;  %291 = vmatprep.subr.mxu0 %v224_v51  ;;  %v10686_v8 = vld [vmem:[#allocation7 + $0x2c4] ss:$16 sps:$4 sm:$0xff]   ;;  %v10684_v10 = vld [vmem:[#allocation7 + $0x2c0] ss:$16 sps:$4 sm:$0xff]  }
  0xb8   :  { %361 = vmatpush1.msra.mxu1 %v229_v52  ;;  %292 = vmatpush1.msra.mxu0 %v223_v53  ;;  %v10689_v11 = vld [vmem:[#allocation7 + $0xa4] ss:$16 sps:$4 sm:$0xff]   ;;  %v10687_v13 = vld [vmem:[#allocation7 + $0xa0] ss:$16 sps:$4 sm:$0xff]  }
  0xb9   :  { %362 = vmatprep.subr.mxu1 %v226_v54  ;;  %293 = vmatprep.subr.mxu0 %v220_v55  ;;  %v10692_v12 = vld [vmem:[#allocation7 + $0x2a4] ss:$16 sps:$4 sm:$0xff]   ;;  %v10690_v14 = vld [vmem:[#allocation7 + $0x2a0] ss:$16 sps:$4 sm:$0xff]  }
  0xba   :  { %363 = vmatpush1.msra.mxu1 %v225_v56  ;;  %294 = vmatpush1.msra.mxu0 %v219_v57  ;;  %v10695_v15 = vld [vmem:[#allocation7 + $0x84] ss:$16 sps:$4 sm:$0xff]   ;;  %v10693_v17 = vld [vmem:[#allocation7 + $0x80] ss:$16 sps:$4 sm:$0xff]  }
  0xbb   :  { %364 = vmatprep.subr.mxu1 %v222_v58  ;;  %9370 = vmatmul.mubr.msk.f32.vlgmr.msra.gmra.mxu0 %vm259_vm1, %v218_v59  ;;  %v10698_v16 = vld [vmem:[#allocation7 + $0x284] ss:$16 sps:$4 sm:$0xff]   ;;  %v10696_v18 = vld [vmem:[#allocation7 + $0x280] ss:$16 sps:$4 sm:$0xff]  }
  0xbc   :  { %365 = vmatpush1.msra.mxu1 %v221_v60  ;;  %1264 = vmatprep.subr.bf16.mxu0 %v10677_v61  ;;  %v10701_v19 = vld [vmem:[#allocation7 + $0x64] ss:$16 sps:$4 sm:$0xff]   ;;  %v10699_v21 = vld [vmem:[#allocation7 + $0x60] ss:$16 sps:$4 sm:$0xff]  }
  0xbd   :  { %1305 = vmatprep.subr.bf16.mxu1 %v10680_v62  ;;  %9371 = vmatmul.mubr.msk.f32.vlgmr.msra.gmra.mxu1 %vm259_vm1, %v218_v59  ;;  %v10704_v20 = vld [vmem:[#allocation7 + $0x264] ss:$16 sps:$4 sm:$0xff]   ;;  %v10702_v22 = vld [vmem:[#allocation7 + $0x260] ss:$16 sps:$4 sm:$0xff]  }
  0xbe   :  { %1265 = vmatpush1.bf16.msra.mxu0 %v10675_v63  ;;  %1306 = vmatpush1.bf16.msra.mxu1 %v10678_v0  ;;  %v10707_v23 = vld [vmem:[#allocation7 + $0x44] ss:$16 sps:$4 sm:$0xff]   ;;  %v10705_v25 = vld [vmem:[#allocation7 + $0x40] ss:$16 sps:$4 sm:$0xff]  }
  0xbf   :  { %1266 = vmatprep.subr.bf16.mxu0 %v10683_v7  ;;  %1307 = vmatprep.subr.bf16.mxu1 %v10686_v8  ;;  %v10710_v24 = vld [vmem:[#allocation7 + $0x244] ss:$16 sps:$4 sm:$0xff]   ;;  %v10708_v26 = vld [vmem:[#allocation7 + $0x240] ss:$16 sps:$4 sm:$0xff]  }
  0xc0   :  { %v10713_v27 = vld [vmem:[#allocation7 + $0x24] ss:$16 sps:$4 sm:$0xff]   ;;  %v10711_v29 = vld [vmem:[#allocation7 + $0x20] ss:$16 sps:$4 sm:$0xff]  }
  0xc1   :  { %v10716_v28 = vld [vmem:[#allocation7 + $0x224] ss:$16 sps:$4 sm:$0xff]   ;;  %v10714_v30 = vld [vmem:[#allocation7 + $0x220] ss:$16 sps:$4 sm:$0xff]  }
  0xc2   :  { %1267 = vmatpush1.bf16.msra.mxu0 %v10681_v9  ;;  %1308 = vmatpush1.bf16.msra.mxu1 %v10684_v10  ;;  %v10719_v31 = vld [vmem:[#allocation7 + $0x4] ss:$16 sps:$4 sm:$0xff]   ;;  %v10717_v33 = vld [vmem:[#allocation7] ss:$16 sps:$4 sm:$0xff]   ;;  %v10773_v9 = vld [vmem:[#allocation7 + $0xec] ss:$16 sps:$4 sm:$0xff]  }
  0xc3   :  { %1268 = vmatprep.subr.bf16.mxu0 %v10689_v11  ;;  %1309 = vmatprep.subr.bf16.mxu1 %v10692_v12  ;;  %v10722_v32 = vld [vmem:[#allocation7 + $0x204] ss:$16 sps:$4 sm:$0xff]   ;;  %v10720_v34 = vld [vmem:[#allocation7 + $0x200] ss:$16 sps:$4 sm:$0xff]   ;;  %v10776_v10 = vld [vmem:[#allocation7 + $0x2ec] ss:$16 sps:$4 sm:$0xff]  }
  0xc4   :  { %v10725_v35 = vld [vmem:[#allocation7 + $0x1e4] ss:$16 sps:$4 sm:$0xff]   ;;  %v10723_v37 = vld [vmem:[#allocation7 + $0x1e0] ss:$16 sps:$4 sm:$0xff]  }
  0xc5   :  { %v10728_v36 = vld [vmem:[#allocation7 + $0x3e4] ss:$16 sps:$4 sm:$0xff]   ;;  %v10726_v38 = vld [vmem:[#allocation7 + $0x3e0] ss:$16 sps:$4 sm:$0xff]  }
  0xc6   :  { %1269 = vmatpush1.bf16.msra.mxu0 %v10687_v13  ;;  %1310 = vmatpush1.bf16.msra.mxu1 %v10690_v14  ;;  %v10731_v39 = vld [vmem:[#allocation7 + $0x1c4] ss:$16 sps:$4 sm:$0xff]   ;;  %v10729_v41 = vld [vmem:[#allocation7 + $0x1c0] ss:$16 sps:$4 sm:$0xff]  }
  0xc7   :  { %1270 = vmatprep.subr.bf16.mxu0 %v10695_v15  ;;  %1311 = vmatprep.subr.bf16.mxu1 %v10698_v16  ;;  %v10734_v40 = vld [vmem:[#allocation7 + $0x3c4] ss:$16 sps:$4 sm:$0xff]   ;;  %v10732_v42 = vld [vmem:[#allocation7 + $0x3c0] ss:$16 sps:$4 sm:$0xff]   ;;  %v12215_v16 = vld [vmem:[#allocation6] sm:$0xf] }
  0xc8   :  { %v10737_v43 = vld [vmem:[#allocation7 + $0x1a4] ss:$16 sps:$4 sm:$0xff]   ;;  %v10735_v45 = vld [vmem:[#allocation7 + $0x1a0] ss:$16 sps:$4 sm:$0xff]  }
  0xc9   :  { %v10740_v44 = vld [vmem:[#allocation7 + $0x3a4] ss:$16 sps:$4 sm:$0xff]   ;;  %v10738_v46 = vld [vmem:[#allocation7 + $0x3a0] ss:$16 sps:$4 sm:$0xff]  }
  0xca   :  { %1271 = vmatpush1.bf16.msra.mxu0 %v10693_v17  ;;  %1312 = vmatpush1.bf16.msra.mxu1 %v10696_v18  ;;  %v10743_v47 = vld [vmem:[#allocation7 + $0x184] ss:$16 sps:$4 sm:$0xff]   ;;  %v10741_v49 = vld [vmem:[#allocation7 + $0x180] ss:$16 sps:$4 sm:$0xff]  }
  0xcb   :  { %1272 = vmatprep.subr.bf16.mxu0 %v10701_v19  ;;  %1313 = vmatprep.subr.bf16.mxu1 %v10704_v20  ;;  %v10746_v48 = vld [vmem:[#allocation7 + $0x384] ss:$16 sps:$4 sm:$0xff]   ;;  %v10744_v50 = vld [vmem:[#allocation7 + $0x380] ss:$16 sps:$4 sm:$0xff]   ;;  %v10771_v20 = vld [vmem:[#allocation7 + $0xe8] ss:$16 sps:$4 sm:$0xff]  }
  0xcc   :  { %v10749_v51 = vld [vmem:[#allocation7 + $0x164] ss:$16 sps:$4 sm:$0xff]   ;;  %v10747_v53 = vld [vmem:[#allocation7 + $0x160] ss:$16 sps:$4 sm:$0xff]  }
  0xcd   :  { %v10752_v52 = vld [vmem:[#allocation7 + $0x364] ss:$16 sps:$4 sm:$0xff]   ;;  %v10750_v54 = vld [vmem:[#allocation7 + $0x360] ss:$16 sps:$4 sm:$0xff]  }
  0xce   :  { %1273 = vmatpush1.bf16.msra.mxu0 %v10699_v21  ;;  %1314 = vmatpush1.bf16.msra.mxu1 %v10702_v22  ;;  %v10755_v55 = vld [vmem:[#allocation7 + $0x144] ss:$16 sps:$4 sm:$0xff]   ;;  %v10753_v57 = vld [vmem:[#allocation7 + $0x140] ss:$16 sps:$4 sm:$0xff]   ;;  %v10774_v21 = vld [vmem:[#allocation7 + $0x2e8] ss:$16 sps:$4 sm:$0xff]  }
  0xcf   :  { %1274 = vmatprep.subr.bf16.mxu0 %v10707_v23  ;;  %1315 = vmatprep.subr.bf16.mxu1 %v10710_v24  ;;  %v10758_v56 = vld [vmem:[#allocation7 + $0x344] ss:$16 sps:$4 sm:$0xff]   ;;  %v10756_v58 = vld [vmem:[#allocation7 + $0x340] ss:$16 sps:$4 sm:$0xff]  }
  0xd0   :  { %v10761_v59 = vld [vmem:[#allocation7 + $0x124] ss:$16 sps:$4 sm:$0xff]   ;;  %v10759_v61 = vld [vmem:[#allocation7 + $0x120] ss:$16 sps:$4 sm:$0xff]  }
  0xd1   :  { %v10764_v60 = vld [vmem:[#allocation7 + $0x324] ss:$16 sps:$4 sm:$0xff]   ;;  %v10762_v62 = vld [vmem:[#allocation7 + $0x320] ss:$16 sps:$4 sm:$0xff]  }
  0xd2   :  { %1275 = vmatpush1.bf16.msra.mxu0 %v10705_v25  ;;  %1316 = vmatpush1.bf16.msra.mxu1 %v10708_v26  ;;  %v10767_v63 = vld [vmem:[#allocation7 + $0x104] ss:$16 sps:$4 sm:$0xff]   ;;  %v10765_v7 = vld [vmem:[#allocation7 + $0x100] ss:$16 sps:$4 sm:$0xff]  }
  0xd3   :  { %1276 = vmatprep.subr.bf16.mxu0 %v10713_v27  ;;  %1317 = vmatprep.subr.bf16.mxu1 %v10716_v28  ;;  %v10770_v0 = vld [vmem:[#allocation7 + $0x304] ss:$16 sps:$4 sm:$0xff]   ;;  %v10768_v8 = vld [vmem:[#allocation7 + $0x300] ss:$16 sps:$4 sm:$0xff]   ;;  %v10779_v28 = vld [vmem:[#allocation7 + $0xcc] ss:$16 sps:$4 sm:$0xff]  }
  0xd6   :  { %1277 = vmatpush1.bf16.msra.mxu0 %v10711_v29  ;;  %1318 = vmatpush1.bf16.msra.mxu1 %v10714_v30  ;;  %v10782_v29 = vld [vmem:[#allocation7 + $0x2cc] ss:$16 sps:$4 sm:$0xff]   ;;  %v10777_v30 = vld [vmem:[#allocation7 + $0xc8] ss:$16 sps:$4 sm:$0xff]  }
  0xd7   :  { %1278 = vmatprep.subr.bf16.mxu0 %v10719_v31  ;;  %1319 = vmatprep.subr.bf16.mxu1 %v10722_v32  ;;  %v10780_v31 = vld [vmem:[#allocation7 + $0x2c8] ss:$16 sps:$4 sm:$0xff]   ;;  %v10785_v32 = vld [vmem:[#allocation7 + $0xac] ss:$16 sps:$4 sm:$0xff]  }
  0xda   :  { %1279 = vmatpush1.bf16.msra.mxu0 %v10717_v33  ;;  %1320 = vmatpush1.bf16.msra.mxu1 %v10720_v34  ;;  %v10788_v33 = vld [vmem:[#allocation7 + $0x2ac] ss:$16 sps:$4 sm:$0xff]   ;;  %v10783_v34 = vld [vmem:[#allocation7 + $0xa8] ss:$16 sps:$4 sm:$0xff]  }
  0xdb   :  { %1280 = vmatprep.subr.bf16.mxu0 %v10725_v35  ;;  %1321 = vmatprep.subr.bf16.mxu1 %v10728_v36  ;;  %v10786_v35 = vld [vmem:[#allocation7 + $0x2a8] ss:$16 sps:$4 sm:$0xff]   ;;  %v10791_v36 = vld [vmem:[#allocation7 + $0x8c] ss:$16 sps:$4 sm:$0xff]  }
  0xde   :  { %1281 = vmatpush2.bf16.msra.mxu0 %v10723_v37  ;;  %1322 = vmatpush2.bf16.msra.mxu1 %v10726_v38  ;;  %v10794_v37 = vld [vmem:[#allocation7 + $0x28c] ss:$16 sps:$4 sm:$0xff]   ;;  %v10789_v38 = vld [vmem:[#allocation7 + $0x88] ss:$16 sps:$4 sm:$0xff]  }
  0xdf   :  { %1282 = vmatprep.subr.bf16.mxu0 %v10731_v39  ;;  %1323 = vmatprep.subr.bf16.mxu1 %v10734_v40  ;;  %v10792_v39 = vld [vmem:[#allocation7 + $0x288] ss:$16 sps:$4 sm:$0xff]   ;;  %v10797_v40 = vld [vmem:[#allocation7 + $0x6c] ss:$16 sps:$4 sm:$0xff]  }
  0xe2   :  { %1283 = vmatpush2.bf16.msra.mxu0 %v10729_v41  ;;  %1324 = vmatpush2.bf16.msra.mxu1 %v10732_v42  ;;  %v10800_v41 = vld [vmem:[#allocation7 + $0x26c] ss:$16 sps:$4 sm:$0xff]   ;;  %v10795_v42 = vld [vmem:[#allocation7 + $0x68] ss:$16 sps:$4 sm:$0xff]  }
  0xe3   :  { %1284 = vmatprep.subr.bf16.mxu0 %v10737_v43  ;;  %1325 = vmatprep.subr.bf16.mxu1 %v10740_v44  ;;  %v10798_v43 = vld [vmem:[#allocation7 + $0x268] ss:$16 sps:$4 sm:$0xff]   ;;  %v10803_v44 = vld [vmem:[#allocation7 + $0x4c] ss:$16 sps:$4 sm:$0xff]  }
  0xe6   :  { %1285 = vmatpush2.bf16.msra.mxu0 %v10735_v45  ;;  %1326 = vmatpush2.bf16.msra.mxu1 %v10738_v46  ;;  %v10806_v45 = vld [vmem:[#allocation7 + $0x24c] ss:$16 sps:$4 sm:$0xff]   ;;  %v10801_v46 = vld [vmem:[#allocation7 + $0x48] ss:$16 sps:$4 sm:$0xff]  }
  0xe7   :  { %1286 = vmatprep.subr.bf16.mxu0 %v10743_v47  ;;  %1327 = vmatprep.subr.bf16.mxu1 %v10746_v48  ;;  %v10804_v47 = vld [vmem:[#allocation7 + $0x248] ss:$16 sps:$4 sm:$0xff]   ;;  %v10809_v48 = vld [vmem:[#allocation7 + $0x2c] ss:$16 sps:$4 sm:$0xff]  }
  0xea   :  { %1287 = vmatpush2.bf16.msra.mxu0 %v10741_v49  ;;  %1328 = vmatpush2.bf16.msra.mxu1 %v10744_v50  ;;  %v10812_v49 = vld [vmem:[#allocation7 + $0x22c] ss:$16 sps:$4 sm:$0xff]   ;;  %v10807_v50 = vld [vmem:[#allocation7 + $0x28] ss:$16 sps:$4 sm:$0xff]  }
  0xeb   :  { %1288 = vmatprep.subr.bf16.mxu0 %v10749_v51  ;;  %1329 = vmatprep.subr.bf16.mxu1 %v10752_v52  ;;  %v10810_v51 = vld [vmem:[#allocation7 + $0x228] ss:$16 sps:$4 sm:$0xff]   ;;  %v10815_v52 = vld [vmem:[#allocation7 + $0xc] ss:$16 sps:$4 sm:$0xff]  }
  0xee   :  { %1289 = vmatpush2.bf16.msra.mxu0 %v10747_v53  ;;  %1330 = vmatpush2.bf16.msra.mxu1 %v10750_v54  ;;  %v10818_v53 = vld [vmem:[#allocation7 + $0x20c] ss:$16 sps:$4 sm:$0xff]   ;;  %v10813_v54 = vld [vmem:[#allocation7 + $0x8] ss:$16 sps:$4 sm:$0xff]  }
  0xef   :  { %1290 = vmatprep.subr.bf16.mxu0 %v10755_v55  ;;  %1331 = vmatprep.subr.bf16.mxu1 %v10758_v56  ;;  %v10816_v55 = vld [vmem:[#allocation7 + $0x208] ss:$16 sps:$4 sm:$0xff]   ;;  %v10821_v56 = vld [vmem:[#allocation7 + $0x1ec] ss:$16 sps:$4 sm:$0xff]  }
  0xf2   :  { %1291 = vmatpush2.bf16.msra.mxu0 %v10753_v57  ;;  %1332 = vmatpush2.bf16.msra.mxu1 %v10756_v58  ;;  %v10824_v57 = vld [vmem:[#allocation7 + $0x3ec] ss:$16 sps:$4 sm:$0xff]   ;;  %v10819_v58 = vld [vmem:[#allocation7 + $0x1e8] ss:$16 sps:$4 sm:$0xff]  }
  0xf3   :  { %1292 = vmatprep.subr.bf16.mxu0 %v10761_v59  ;;  %1333 = vmatprep.subr.bf16.mxu1 %v10764_v60  ;;  %v10822_v59 = vld [vmem:[#allocation7 + $0x3e8] ss:$16 sps:$4 sm:$0xff]   ;;  %v10827_v60 = vld [vmem:[#allocation7 + $0x1cc] ss:$16 sps:$4 sm:$0xff]  }
  0xf6   :  { %1293 = vmatpush2.bf16.msra.mxu0 %v10759_v61  ;;  %1334 = vmatpush2.bf16.msra.mxu1 %v10762_v62  ;;  %v10830_v61 = vld [vmem:[#allocation7 + $0x3cc] ss:$16 sps:$4 sm:$0xff]   ;;  %v10825_v62 = vld [vmem:[#allocation7 + $0x1c8] ss:$16 sps:$4 sm:$0xff]  }
  0xf7   :  { %1294 = vmatprep.subr.bf16.mxu0 %v10767_v63  ;;  %1335 = vmatprep.subr.bf16.mxu1 %v10770_v0  ;;  %v10828_v63 = vld [vmem:[#allocation7 + $0x3c8] ss:$16 sps:$4 sm:$0xff]   ;;  %v10833_v0 = vld [vmem:[#allocation7 + $0x1ac] ss:$16 sps:$4 sm:$0xff]  }
  0xfa   :  { %1295 = vmatpush2.bf16.msra.mxu0 %v10765_v7  ;;  %1336 = vmatpush2.bf16.msra.mxu1 %v10768_v8  ;;  %v10836_v7 = vld [vmem:[#allocation7 + $0x3ac] ss:$16 sps:$4 sm:$0xff]   ;;  %v10831_v8 = vld [vmem:[#allocation7 + $0x1a8] ss:$16 sps:$4 sm:$0xff]  }
  0xfb   :  { %1346 = vmatprep.subr.bf16.mxu0 %v10773_v9  ;;  %1387 = vmatprep.subr.bf16.mxu1 %v10776_v10  ;;  %v10834_v9 = vld [vmem:[#allocation7 + $0x3a8] ss:$16 sps:$4 sm:$0xff]   ;;  %v10839_v10 = vld [vmem:[#allocation7 + $0x18c] ss:$16 sps:$4 sm:$0xff]  }
 0x13d   :  { %v437_v11 = vpop.xlane.xlu0 %436 }
 0x13e   :  { %v439_v12 = vmul.f32 0.001953125, %v437_v11  ;;  %v10842_v11 = vld [vmem:[#allocation7 + $0x38c] ss:$16 sps:$4 sm:$0xff]  }
 0x140   :  { %v440_v13 = vadd.f32 1e-08, %v439_v12  ;;  %v10837_v12 = vld [vmem:[#allocation7 + $0x188] ss:$16 sps:$4 sm:$0xff]  }
 0x142   :  { %12211 = vrsqrt.f32 %v440_v13  ;;  %v10840_v13 = vld [vmem:[#allocation7 + $0x388] ss:$16 sps:$4 sm:$0xff]  }
 0x14f   :  { %v12212_v14 = vpop.eup %12211 }
 0x150   :  { %v446_v15 = vrot.slane %v12212_v14, %v12656_v3  ;;  %v10845_v14 = vld [vmem:[#allocation7 + $0x16c] ss:$16 sps:$4 sm:$0xff]  }
 0x152   :  { %v448_v17 = vmul.f32 %v12215_v16, %v446_v15  ;;  %v10848_v15 = vld [vmem:[#allocation7 + $0x36c] ss:$16 sps:$4 sm:$0xff]   ;;  %v10843_v16 = vld [vmem:[#allocation7 + $0x168] ss:$16 sps:$4 sm:$0xff]  }
 0x154   :  { %v457_v18 = vrot.slane %v448_v17, %v12659_v4  ;;  %v465_v19 = vrot.slane %v448_v17, %v12665_v6  ;;  %v453_v22 = vrot.slane %v448_v17, %v12656_v3  ;;  %v461_v23 = vrot.slane %v448_v17, %v12662_v5  ;;  %v10846_v17 = vld [vmem:[#allocation7 + $0x368] ss:$16 sps:$4 sm:$0xff]  }
 0x156   :  { %v471_v24 = vpack.c.bf16 %v457_v18, %v457_v18  ;;  %v473_v25 = vpack.c.bf16 %v465_v19, %v465_v19  ;;  %v12680_v26 = vpack.c.bf16 %v453_v22, %v453_v22  ;;  %v12682_v27 = vpack.c.bf16 %v461_v23, %v461_v23  ;;  %v10851_v18 = vld [vmem:[#allocation7 + $0x14c] ss:$16 sps:$4 sm:$0xff]  }
 0x157   :  { %v10854_v19 = vld [vmem:[#allocation7 + $0x34c] ss:$16 sps:$4 sm:$0xff]  }
 0x158   :  { %1296 = vmatprep.mubr.bf16.mxu0 %v471_v24  ;;  %1337 = vmatprep.mubr.bf16.mxu1 %v473_v25  ;;  %v10857_v22 = vld [vmem:[#allocation7 + $0x12c] ss:$16 sps:$4 sm:$0xff]  }
 0x159   :  { %1297 = vmatmul.mubr.bf16.vlgmr.msra.gmra.mxu0 %v12680_v26  ;;  %1338 = vmatmul.mubr.bf16.vlgmr.msra.gmra.mxu1 %v12682_v27  ;;  %v10860_v23 = vld [vmem:[#allocation7 + $0x32c] ss:$16 sps:$4 sm:$0xff]  }
 0x15a   :  { %1347 = vmatpush1.bf16.msra.mxu0 %v10771_v20  ;;  %1388 = vmatpush1.bf16.msra.mxu1 %v10774_v21  ;;  %v10849_v20 = vld [vmem:[#allocation7 + $0x148] ss:$16 sps:$4 sm:$0xff]  }
 0x15b   :  { %1378 = vmatprep.mubr.bf16.mxu0 %v471_v24  ;;  %1419 = vmatprep.mubr.bf16.mxu1 %v473_v25  ;;  %v10852_v21 = vld [vmem:[#allocation7 + $0x348] ss:$16 sps:$4 sm:$0xff]  }
 0x15c   :  { %1348 = vmatprep.subr.bf16.mxu0 %v10779_v28  ;;  %1389 = vmatprep.subr.bf16.mxu1 %v10782_v29  ;;  %v10855_v24 = vld [vmem:[#allocation7 + $0x128] ss:$16 sps:$4 sm:$0xff]   ;;  %v10863_v28 = vld [vmem:[#allocation7 + $0x10c] ss:$16 sps:$4 sm:$0xff]  }
 0x15d   :  { %v10858_v25 = vld [vmem:[#allocation7 + $0x328] ss:$16 sps:$4 sm:$0xff]   ;;  %v10866_v29 = vld [vmem:[#allocation7 + $0x30c] ss:$16 sps:$4 sm:$0xff]  }
 0x15e   :  { %1349 = vmatpush1.bf16.msra.mxu0 %v10777_v30  ;;  %1390 = vmatpush1.bf16.msra.mxu1 %v10780_v31  ;;  %v10861_v30 = vld [vmem:[#allocation7 + $0x108] ss:$16 sps:$4 sm:$0xff]  }
 0x15f   :  { %1350 = vmatprep.subr.bf16.mxu0 %v10785_v32  ;;  %1391 = vmatprep.subr.bf16.mxu1 %v10788_v33  ;;  %v10864_v31 = vld [vmem:[#allocation7 + $0x308] ss:$16 sps:$4 sm:$0xff]   ;;  %v10869_v32 = vld [vmem:[#allocation7 + $0x4e4] ss:$16 sps:$4 sm:$0xff]   ;;  %v10867_v33 = vld [vmem:[#allocation7 + $0x4e0] ss:$16 sps:$4 sm:$0xff]  }
 0x162   :  { %1351 = vmatpush1.bf16.msra.mxu0 %v10783_v34  ;;  %1392 = vmatpush1.bf16.msra.mxu1 %v10786_v35  ;;  %v10872_v34 = vld [vmem:[#allocation7 + $0x4c4] ss:$16 sps:$4 sm:$0xff]   ;;  %v10870_v35 = vld [vmem:[#allocation7 + $0x4c0] ss:$16 sps:$4 sm:$0xff]  }
 0x163   :  { %1352 = vmatprep.subr.bf16.mxu0 %v10791_v36  ;;  %1393 = vmatprep.subr.bf16.mxu1 %v10794_v37  ;;  %v10875_v36 = vld [vmem:[#allocation7 + $0x4a4] ss:$16 sps:$4 sm:$0xff]   ;;  %v10873_v37 = vld [vmem:[#allocation7 + $0x4a0] ss:$16 sps:$4 sm:$0xff]  }
 0x166   :  { %1353 = vmatpush1.bf16.msra.mxu0 %v10789_v38  ;;  %1394 = vmatpush1.bf16.msra.mxu1 %v10792_v39  ;;  %v10878_v38 = vld [vmem:[#allocation7 + $0x484] ss:$16 sps:$4 sm:$0xff]   ;;  %v10876_v39 = vld [vmem:[#allocation7 + $0x480] ss:$16 sps:$4 sm:$0xff]  }
 0x167   :  { %1354 = vmatprep.subr.bf16.mxu0 %v10797_v40  ;;  %1395 = vmatprep.subr.bf16.mxu1 %v10800_v41  ;;  %v10881_v40 = vld [vmem:[#allocation7 + $0x464] ss:$16 sps:$4 sm:$0xff]   ;;  %v10915_v41 = vld [vmem:[#allocation7 + $0x6e0] ss:$16 sps:$4 sm:$0xff]  }
 0x16a   :  { %1355 = vmatpush1.bf16.msra.mxu0 %v10795_v42  ;;  %1396 = vmatpush1.bf16.msra.mxu1 %v10798_v43  ;;  %v10917_v42 = vld [vmem:[#allocation7 + $0x6e4] ss:$16 sps:$4 sm:$0xff]   ;;  %v10879_v43 = vld [vmem:[#allocation7 + $0x460] ss:$16 sps:$4 sm:$0xff]  }
 0x16b   :  { %1356 = vmatprep.subr.bf16.mxu0 %v10803_v44  ;;  %1397 = vmatprep.subr.bf16.mxu1 %v10806_v45  ;;  %v10921_v44 = vld [vmem:[#allocation7 + $0x6c0] ss:$16 sps:$4 sm:$0xff]   ;;  %v10923_v45 = vld [vmem:[#allocation7 + $0x6c4] ss:$16 sps:$4 sm:$0xff]  }
 0x16e   :  { %1357 = vmatpush1.bf16.msra.mxu0 %v10801_v46  ;;  %1398 = vmatpush1.bf16.msra.mxu1 %v10804_v47  ;;  %v10887_v46 = vld [vmem:[#allocation7 + $0x424] ss:$16 sps:$4 sm:$0xff]   ;;  %v10885_v47 = vld [vmem:[#allocation7 + $0x420] ss:$16 sps:$4 sm:$0xff]  }
 0x16f   :  { %1358 = vmatprep.subr.bf16.mxu0 %v10809_v48  ;;  %1399 = vmatprep.subr.bf16.mxu1 %v10812_v49  ;;  %v10927_v48 = vld [vmem:[#allocation7 + $0x6a0] ss:$16 sps:$4 sm:$0xff]   ;;  %v10929_v49 = vld [vmem:[#allocation7 + $0x6a4] ss:$16 sps:$4 sm:$0xff]  }
 0x172   :  { %1359 = vmatpush1.bf16.msra.mxu0 %v10807_v50  ;;  %1400 = vmatpush1.bf16.msra.mxu1 %v10810_v51  ;;  %v10890_v50 = vld [vmem:[#allocation7 + $0x404] ss:$16 sps:$4 sm:$0xff]   ;;  %v10888_v51 = vld [vmem:[#allocation7 + $0x400] ss:$16 sps:$4 sm:$0xff]  }
 0x173   :  { %1360 = vmatprep.subr.bf16.mxu0 %v10815_v52  ;;  %1401 = vmatprep.subr.bf16.mxu1 %v10818_v53  ;;  %v10933_v52 = vld [vmem:[#allocation7 + $0x680] ss:$16 sps:$4 sm:$0xff]   ;;  %v10935_v53 = vld [vmem:[#allocation7 + $0x684] ss:$16 sps:$4 sm:$0xff]  }
 0x176   :  { %1361 = vmatpush1.bf16.msra.mxu0 %v10813_v54  ;;  %1402 = vmatpush1.bf16.msra.mxu1 %v10816_v55  ;;  %v10893_v54 = vld [vmem:[#allocation7 + $0x5e4] ss:$16 sps:$4 sm:$0xff]   ;;  %v10891_v55 = vld [vmem:[#allocation7 + $0x5e0] ss:$16 sps:$4 sm:$0xff]  }
 0x177   :  { %1362 = vmatprep.subr.bf16.mxu0 %v10821_v56  ;;  %1403 = vmatprep.subr.bf16.mxu1 %v10824_v57  ;;  %v10939_v56 = vld [vmem:[#allocation7 + $0x660] ss:$16 sps:$4 sm:$0xff]   ;;  %v10941_v57 = vld [vmem:[#allocation7 + $0x664] ss:$16 sps:$4 sm:$0xff]  }
 0x17a   :  { %1363 = vmatpush2.bf16.msra.mxu0 %v10819_v58  ;;  %1404 = vmatpush2.bf16.msra.mxu1 %v10822_v59  ;;  %v10896_v58 = vld [vmem:[#allocation7 + $0x5c4] ss:$16 sps:$4 sm:$0xff]   ;;  %v10894_v59 = vld [vmem:[#allocation7 + $0x5c0] ss:$16 sps:$4 sm:$0xff]  }
 0x17b   :  { %1364 = vmatprep.subr.bf16.mxu0 %v10827_v60  ;;  %1405 = vmatprep.subr.bf16.mxu1 %v10830_v61  ;;  %v10945_v60 = vld [vmem:[#allocation7 + $0x640] ss:$16 sps:$4 sm:$0xff]   ;;  %v10947_v61 = vld [vmem:[#allocation7 + $0x644] ss:$16 sps:$4 sm:$0xff]  }
 0x17e   :  { %1365 = vmatpush2.bf16.msra.mxu0 %v10825_v62  ;;  %1406 = vmatpush2.bf16.msra.mxu1 %v10828_v63  ;;  %v10899_v62 = vld [vmem:[#allocation7 + $0x5a4] ss:$16 sps:$4 sm:$0xff]   ;;  %v10897_v63 = vld [vmem:[#allocation7 + $0x5a0] ss:$16 sps:$4 sm:$0xff]  }
 0x17f   :  { %1366 = vmatprep.subr.bf16.mxu0 %v10833_v0  ;;  %1407 = vmatprep.subr.bf16.mxu1 %v10836_v7  ;;  %v10951_v0 = vld [vmem:[#allocation7 + $0x620] ss:$16 sps:$4 sm:$0xff]   ;;  %v10953_v7 = vld [vmem:[#allocation7 + $0x624] ss:$16 sps:$4 sm:$0xff]  }
 0x182   :  { %1367 = vmatpush2.bf16.msra.mxu0 %v10831_v8  ;;  %1408 = vmatpush2.bf16.msra.mxu1 %v10834_v9  ;;  %v10902_v8 = vld [vmem:[#allocation7 + $0x584] ss:$16 sps:$4 sm:$0xff]   ;;  %v10900_v9 = vld [vmem:[#allocation7 + $0x580] ss:$16 sps:$4 sm:$0xff]  }
 0x183   :  { %1368 = vmatprep.subr.bf16.mxu0 %v10839_v10  ;;  %1409 = vmatprep.subr.bf16.mxu1 %v10842_v11  ;;  %v10957_v10 = vld [vmem:[#allocation7 + $0x600] ss:$16 sps:$4 sm:$0xff]   ;;  %v10959_v11 = vld [vmem:[#allocation7 + $0x604] ss:$16 sps:$4 sm:$0xff]  }
 0x186   :  { %1369 = vmatpush2.bf16.msra.mxu0 %v10837_v12  ;;  %1410 = vmatpush2.bf16.msra.mxu1 %v10840_v13  ;;  %v10905_v12 = vld [vmem:[#allocation7 + $0x564] ss:$16 sps:$4 sm:$0xff]   ;;  %v10903_v13 = vld [vmem:[#allocation7 + $0x560] ss:$16 sps:$4 sm:$0xff]  }
 0x187   :  { %1370 = vmatprep.subr.bf16.mxu0 %v10845_v14  ;;  %1411 = vmatprep.subr.bf16.mxu1 %v10848_v15  ;;  %v10963_v14 = vld [vmem:[#allocation7 + $0x7e0] ss:$16 sps:$4 sm:$0xff]   ;;  %v10965_v15 = vld [vmem:[#allocation7 + $0x7e4] ss:$16 sps:$4 sm:$0xff]  }
 0x18a   :  { %1371 = vmatpush2.bf16.msra.mxu0 %v10843_v16  ;;  %1412 = vmatpush2.bf16.msra.mxu1 %v10846_v17  ;;  %v10908_v16 = vld [vmem:[#allocation7 + $0x544] ss:$16 sps:$4 sm:$0xff]   ;;  %v10906_v17 = vld [vmem:[#allocation7 + $0x540] ss:$16 sps:$4 sm:$0xff]  }
 0x18b   :  { %1372 = vmatprep.subr.bf16.mxu0 %v10851_v18  ;;  %1413 = vmatprep.subr.bf16.mxu1 %v10854_v19  ;;  %v10969_v18 = vld [vmem:[#allocation7 + $0x7c0] ss:$16 sps:$4 sm:$0xff]   ;;  %v10971_v19 = vld [vmem:[#allocation7 + $0x7c4] ss:$16 sps:$4 sm:$0xff]  }
 0x18e   :  { %1373 = vmatpush2.bf16.msra.mxu0 %v10849_v20  ;;  %1414 = vmatpush2.bf16.msra.mxu1 %v10852_v21  ;;  %v10911_v20 = vld [vmem:[#allocation7 + $0x524] ss:$16 sps:$4 sm:$0xff]   ;;  %v10909_v21 = vld [vmem:[#allocation7 + $0x520] ss:$16 sps:$4 sm:$0xff]  }
 0x18f   :  { %1374 = vmatprep.subr.bf16.mxu0 %v10857_v22  ;;  %1415 = vmatprep.subr.bf16.mxu1 %v10860_v23  ;;  %v10975_v22 = vld [vmem:[#allocation7 + $0x7a0] ss:$16 sps:$4 sm:$0xff]   ;;  %v10977_v23 = vld [vmem:[#allocation7 + $0x7a4] ss:$16 sps:$4 sm:$0xff]  }
 0x192   :  { %1375 = vmatpush2.bf16.msra.mxu0 %v10855_v24  ;;  %1416 = vmatpush2.bf16.msra.mxu1 %v10858_v25  ;;  %v10914_v24 = vld [vmem:[#allocation7 + $0x504] ss:$16 sps:$4 sm:$0xff]   ;;  %v10912_v25 = vld [vmem:[#allocation7 + $0x500] ss:$16 sps:$4 sm:$0xff]  }
 0x193   :  { %1376 = vmatprep.subr.bf16.mxu0 %v10863_v28  ;;  %1417 = vmatprep.subr.bf16.mxu1 %v10866_v29  ;;  %v10981_v28 = vld [vmem:[#allocation7 + $0x780] ss:$16 sps:$4 sm:$0xff]   ;;  %v10983_v29 = vld [vmem:[#allocation7 + $0x784] ss:$16 sps:$4 sm:$0xff]  }
 0x196   :  { %1377 = vmatpush2.bf16.msra.mxu0 %v10861_v30  ;;  %1418 = vmatpush2.bf16.msra.mxu1 %v10864_v31  ;;  %v10920_v30 = vld [vmem:[#allocation7 + $0x4ec] ss:$16 sps:$4 sm:$0xff]   ;;  %v10987_v31 = vld [vmem:[#allocation7 + $0x760] ss:$16 sps:$4 sm:$0xff]  }
 0x197   :  { %2240 = vmatprep.subr.bf16.mxu0 %v10869_v32  ;;  %2281 = vmatprep.subr.bf16.mxu1 %v10917_v42  ;;  %v10989_v32 = vld [vmem:[#allocation7 + $0x764] ss:$16 sps:$4 sm:$0xff]   ;;  %v12692_v42 = vpop.f32.mrf.mxu1 }
 0x199   :  { %1379 = vmatmul.mubr.bf16.vlgmr.msra.gmra.mxu0 %v12680_v26  ;;  %1420 = vmatmul.mubr.bf16.vlgmr.msra.gmra.mxu1 %v12682_v27  ;;  %v10884_v26 = vld [vmem:[#allocation7 + $0x444] ss:$16 sps:$4 sm:$0xff]   ;;  %v10882_v27 = vld [vmem:[#allocation7 + $0x440] ss:$16 sps:$4 sm:$0xff]  }
 0x19a   :  { %2241 = vmatpush1.bf16.msra.mxu0 %v10867_v33  ;;  %2282 = vmatpush1.bf16.msra.mxu1 %v10915_v41  ;;  %v10995_v33 = vld [vmem:[#allocation7 + $0x744] ss:$16 sps:$4 sm:$0xff]   ;;  %v12690_v41 = vpop.f32.mrf.mxu0 }
 0x19b   :  { %2242 = vmatprep.subr.bf16.mxu0 %v10872_v34  ;;  %2283 = vmatprep.subr.bf16.mxu1 %v10923_v45  ;;  %v10993_v34 = vld [vmem:[#allocation7 + $0x740] ss:$16 sps:$4 sm:$0xff]  }
 0x19e   :  { %2243 = vmatpush1.bf16.msra.mxu0 %v10870_v35  ;;  %2284 = vmatpush1.bf16.msra.mxu1 %v10921_v44  ;;  %v11001_v35 = vld [vmem:[#allocation7 + $0x724] ss:$16 sps:$4 sm:$0xff]  }
 0x19f   :  { %2244 = vmatprep.subr.bf16.mxu0 %v10875_v36  ;;  %2285 = vmatprep.subr.bf16.mxu1 %v10929_v49  ;;  %v10999_v36 = vld [vmem:[#allocation7 + $0x720] ss:$16 sps:$4 sm:$0xff]  }
 0x1a2   :  { %2245 = vmatpush1.bf16.msra.mxu0 %v10873_v37  ;;  %2286 = vmatpush1.bf16.msra.mxu1 %v10927_v48  ;;  %v11007_v37 = vld [vmem:[#allocation7 + $0x704] ss:$16 sps:$4 sm:$0xff]  }
 0x1a3   :  { %2246 = vmatprep.subr.bf16.mxu0 %v10878_v38  ;;  %2287 = vmatprep.subr.bf16.mxu1 %v10935_v53  ;;  %v11005_v38 = vld [vmem:[#allocation7 + $0x700] ss:$16 sps:$4 sm:$0xff]  }
 0x1a6   :  { %2247 = vmatpush1.bf16.msra.mxu0 %v10876_v39  ;;  %2288 = vmatpush1.bf16.msra.mxu1 %v10933_v52  ;;  %v11013_v39 = vld [vmem:[#allocation7 + $0x6ec] ss:$16 sps:$4 sm:$0xff]  }
 0x1a7   :  { %2248 = vmatprep.subr.bf16.mxu0 %v10881_v40  ;;  %2289 = vmatprep.subr.bf16.mxu1 %v10941_v57  ;;  %v12688_v40 = vld [vmem:[#allocation9] sm:$0xf] }
 0x1a8   :  { %v1251_v44 = vrot.slane %v12688_v40, %v12659_v4 }
 0x1aa   :  { %2249 = vmatpush1.bf16.msra.mxu0 %v10879_v43  ;;  %2290 = vmatpush1.bf16.msra.mxu1 %v10939_v56  ;;  %v1247_v43 = vrot.slane %v12688_v40, %v12656_v3 }
 0x1ab   :  { %2250 = vmatprep.subr.bf16.mxu0 %v10884_v26  ;;  %2291 = vmatprep.subr.bf16.mxu1 %v10947_v61  ;;  %v12696_v26 = vpop.f32.mrf.mxu0 }
 0x1ae   :  { %2251 = vmatpush1.bf16.msra.mxu0 %v10882_v27  ;;  %2292 = vmatpush1.bf16.msra.mxu1 %v10945_v60  ;;  %v12698_v27 = vpop.f32.mrf.mxu1 }
 0x1af   :  { %2252 = vmatprep.subr.bf16.mxu0 %v10887_v46  ;;  %2293 = vmatprep.subr.bf16.mxu1 %v10953_v7 }
 0x1b2   :  { %2253 = vmatpush1.bf16.msra.mxu0 %v10885_v47  ;;  %2294 = vmatpush1.bf16.msra.mxu1 %v10951_v0  ;;  %v10926_v0 = vld [vmem:[#allocation7 + $0x4cc] ss:$16 sps:$4 sm:$0xff]  }
 0x1b3   :  { %2254 = vmatprep.subr.bf16.mxu0 %v10890_v50  ;;  %2295 = vmatprep.subr.bf16.mxu1 %v10959_v11  ;;  %v10930_v11 = vld [vmem:[#allocation7 + $0x4a8] ss:$16 sps:$4 sm:$0xff]  }
 0x1b6   :  { %2255 = vmatpush1.bf16.msra.mxu0 %v10888_v51  ;;  %2296 = vmatpush1.bf16.msra.mxu1 %v10957_v10  ;;  %v10932_v10 = vld [vmem:[#allocation7 + $0x4ac] ss:$16 sps:$4 sm:$0xff]  }
 0x1b7   :  { %2256 = vmatprep.subr.bf16.mxu0 %v10893_v54  ;;  %2297 = vmatprep.subr.bf16.mxu1 %v10965_v15  ;;  %v10942_v15 = vld [vmem:[#allocation7 + $0x468] ss:$16 sps:$4 sm:$0xff]  }
 0x1ba   :  { %2257 = vmatpush2.bf16.msra.mxu0 %v10891_v55  ;;  %2298 = vmatpush2.bf16.msra.mxu1 %v10963_v14  ;;  %v10944_v14 = vld [vmem:[#allocation7 + $0x46c] ss:$16 sps:$4 sm:$0xff]  }
 0x1bb   :  { %2258 = vmatprep.subr.bf16.mxu0 %v10896_v58  ;;  %2299 = vmatprep.subr.bf16.mxu1 %v10971_v19  ;;  %v10954_v19 = vld [vmem:[#allocation7 + $0x428] ss:$16 sps:$4 sm:$0xff]  }
 0x1be   :  { %2259 = vmatpush2.bf16.msra.mxu0 %v10894_v59  ;;  %2300 = vmatpush2.bf16.msra.mxu1 %v10969_v18  ;;  %v10956_v18 = vld [vmem:[#allocation7 + $0x42c] ss:$16 sps:$4 sm:$0xff]  }
 0x1bf   :  { %2260 = vmatprep.subr.bf16.mxu0 %v10899_v62  ;;  %2301 = vmatprep.subr.bf16.mxu1 %v10977_v23  ;;  %v10966_v23 = vld [vmem:[#allocation7 + $0x5e8] ss:$16 sps:$4 sm:$0xff]  }
 0x1c2   :  { %2261 = vmatpush2.bf16.msra.mxu0 %v10897_v63  ;;  %2302 = vmatpush2.bf16.msra.mxu1 %v10975_v22  ;;  %v10918_v63 = vld [vmem:[#allocation7 + $0x4e8] ss:$16 sps:$4 sm:$0xff]   ;;  %v10968_v22 = vld [vmem:[#allocation7 + $0x5ec] ss:$16 sps:$4 sm:$0xff]  }
 0x1c3   :  { %2262 = vmatprep.subr.bf16.mxu0 %v10902_v8  ;;  %2303 = vmatprep.subr.bf16.mxu1 %v10983_v29  ;;  %v10978_v29 = vld [vmem:[#allocation7 + $0x5a8] ss:$16 sps:$4 sm:$0xff]  }
 0x1c6   :  { %2263 = vmatpush2.bf16.msra.mxu0 %v10900_v9  ;;  %2304 = vmatpush2.bf16.msra.mxu1 %v10981_v28  ;;  %v10924_v9 = vld [vmem:[#allocation7 + $0x4c8] ss:$16 sps:$4 sm:$0xff]   ;;  %v10980_v28 = vld [vmem:[#allocation7 + $0x5ac] ss:$16 sps:$4 sm:$0xff]  }
 0x1c7   :  { %2264 = vmatprep.subr.bf16.mxu0 %v10905_v12  ;;  %2305 = vmatprep.subr.bf16.mxu1 %v10989_v32  ;;  %v10938_v12 = vld [vmem:[#allocation7 + $0x48c] ss:$16 sps:$4 sm:$0xff]  }
 0x1c8   :  { %v10992_v32 = vld [vmem:[#allocation7 + $0x56c] ss:$16 sps:$4 sm:$0xff]  }
 0x1ca   :  { %2265 = vmatpush2.bf16.msra.mxu0 %v10903_v13  ;;  %2306 = vmatpush2.bf16.msra.mxu1 %v10987_v31  ;;  %v10936_v13 = vld [vmem:[#allocation7 + $0x488] ss:$16 sps:$4 sm:$0xff]  }
 0x1cb   :  { %2266 = vmatprep.subr.bf16.mxu0 %v10908_v16  ;;  %2307 = vmatprep.subr.bf16.mxu1 %v10995_v33  ;;  %v10950_v16 = vld [vmem:[#allocation7 + $0x44c] ss:$16 sps:$4 sm:$0xff]   ;;  %v10984_v31 = vld [vmem:[#allocation7 + $0x588] ss:$16 sps:$4 sm:$0xff]  }
 0x1cc   :  { %v10990_v33 = vld [vmem:[#allocation7 + $0x568] ss:$16 sps:$4 sm:$0xff]  }
 0x1ce   :  { %2267 = vmatpush2.bf16.msra.mxu0 %v10906_v17  ;;  %2308 = vmatpush2.bf16.msra.mxu1 %v10993_v34  ;;  %v10948_v17 = vld [vmem:[#allocation7 + $0x448] ss:$16 sps:$4 sm:$0xff]   ;;  %v10998_v34 = vld [vmem:[#allocation7 + $0x54c] ss:$16 sps:$4 sm:$0xff]  }
 0x1cf   :  { %2268 = vmatprep.subr.bf16.mxu0 %v10911_v20  ;;  %2309 = vmatprep.subr.bf16.mxu1 %v11001_v35  ;;  %v10962_v20 = vld [vmem:[#allocation7 + $0x40c] ss:$16 sps:$4 sm:$0xff]   ;;  %v1255_v35 = vrot.slane %v12688_v40, %v12662_v5 }
 0x1d2   :  { %2269 = vmatpush2.bf16.msra.mxu0 %v10909_v21  ;;  %2310 = vmatpush2.bf16.msra.mxu1 %v10999_v36  ;;  %v10960_v21 = vld [vmem:[#allocation7 + $0x408] ss:$16 sps:$4 sm:$0xff]  }
 0x1d3   :  { %2270 = vmatprep.subr.bf16.mxu0 %v10914_v24  ;;  %2311 = vmatprep.subr.bf16.mxu1 %v11007_v37  ;;  %v10974_v24 = vld [vmem:[#allocation7 + $0x5cc] ss:$16 sps:$4 sm:$0xff]   ;;  %v10996_v36 = vld [vmem:[#allocation7 + $0x548] ss:$16 sps:$4 sm:$0xff]   ;;  %v1259_v37 = vrot.slane %v12688_v40, %v12665_v6 }
 0x1d6   :  { %2271 = vmatpush2.bf16.msra.mxu0 %v10912_v25  ;;  %2312 = vmatpush2.bf16.msra.mxu1 %v11005_v38  ;;  %v10972_v25 = vld [vmem:[#allocation7 + $0x5c8] ss:$16 sps:$4 sm:$0xff]   ;;  %v11004_v38 = vld [vmem:[#allocation7 + $0x52c] ss:$16 sps:$4 sm:$0xff]  }
 0x1d7   :  { %2322 = vmatprep.subr.bf16.mxu0 %v10920_v30  ;;  %2363 = vmatprep.subr.bf16.mxu1 %v11013_v39  ;;  %v10986_v30 = vld [vmem:[#allocation7 + $0x58c] ss:$16 sps:$4 sm:$0xff]  }
 0x219   :  { %v1298_v45 = vpop.f32.mrf.mxu0  ;;  %v1339_v46 = vpop.f32.mrf.mxu1 }
 0x21a   :  { %v1299_v47 = vadd.f32 %v1298_v45, %v1247_v43 }
 0x21b   :  { %v1300_v48 = vpop.f32.mrf.mxu0  ;;  %v1341_v49 = vpop.f32.mrf.mxu1 }
 0x21c   :  { %v1340_v50 = vadd.f32 %v1339_v46, %v1299_v47  ;;  %v1301_v51 = vadd.f32 %v1300_v48, %v1251_v44  ;;  %v11002_v47 = vld [vmem:[#allocation7 + $0x528] ss:$16 sps:$4 sm:$0xff]  }
 0x21d   :  { %v1302_v52 = vpop.f32.mrf.mxu0  ;;  %v1343_v53 = vpop.f32.mrf.mxu1 }
 0x21e   :  { %vm1428_vm2 = vcmp.ge.f32.partialorder %v1340_v50, 0.0  ;;  %v1432_v54 = vmul.f32 0.2, %v1340_v50  ;;  %v1342_v55 = vadd.f32 %v1341_v49, %v1301_v51 }
 0x21f   :  { %v1303_v56 = vpop.f32.mrf.mxu0  ;;  %v1344_v57 = vpop.f32.mrf.mxu1 }
 0x220   :  { %v1436_v58 = vsel %vm1428_vm2, %v1340_v50, %v1432_v54  ;;  %vm1429_vm3 = vcmp.ge.f32.partialorder %v1342_v55, 0.0  ;;  %v1433_v59 = vmul.f32 0.2, %v1342_v55  ;;  %v11010_v50 = vld [vmem:[#allocation7 + $0x50c] ss:$16 sps:$4 sm:$0xff]  }
 0x221   :  { %v1440_v60 = vmul.f32 1.4142135, %v1436_v58  ;;  %v11008_v56 = vld [vmem:[#allocation7 + $0x508] ss:$16 sps:$4 sm:$0xff]  }
 0x222   :  { %v1437_v61 = vsel %vm1429_vm3, %v1342_v55, %v1433_v59 }
 0x223   :  { %v1441_v62 = vmul.f32 1.4142135, %v1437_v61  ;;  %v12702_v8 = vpack.c.bf16 %v1440_v60, %v1440_v60 }
 0x225   :  { %v1445_v7 = vpack.c.bf16 %v1441_v62, %v1441_v62 }
 0x227   :  { %2272 = vmatprep.mubr.bf16.mxu0 %v1445_v7 }
 0x228   :  { %2273 = vmatmul.mubr.bf16.vlgmr.msra.gmra.mxu0 %v12702_v8 }
 0x229   :  { %2323 = vmatpush1.bf16.msra.mxu0 %v10918_v63  ;;  %2354 = vmatprep.mubr.bf16.mxu0 %v1445_v7  ;;  %v11011_v63 = vld [vmem:[#allocation7 + $0x6e8] ss:$16 sps:$4 sm:$0xff]   ;;  %v11016_v7 = vld [vmem:[#allocation7 + $0x6cc] ss:$16 sps:$4 sm:$0xff]  }
 0x22a   :  { %2324 = vmatprep.subr.bf16.mxu0 %v10926_v0 }
 0x22d   :  { %2325 = vmatpush1.bf16.msra.mxu0 %v10924_v9  ;;  %v11014_v9 = vld [vmem:[#allocation7 + $0x6c8] ss:$16 sps:$4 sm:$0xff]  }
 0x22e   :  { %2326 = vmatprep.subr.bf16.mxu0 %v10932_v10  ;;  %v11019_v10 = vld [vmem:[#allocation7 + $0x6ac] ss:$16 sps:$4 sm:$0xff]  }
 0x231   :  { %2327 = vmatpush1.bf16.msra.mxu0 %v10930_v11  ;;  %v11017_v11 = vld [vmem:[#allocation7 + $0x6a8] ss:$16 sps:$4 sm:$0xff]  }
 0x232   :  { %2328 = vmatprep.subr.bf16.mxu0 %v10938_v12  ;;  %v11022_v12 = vld [vmem:[#allocation7 + $0x68c] ss:$16 sps:$4 sm:$0xff]  }
 0x235   :  { %2329 = vmatpush1.bf16.msra.mxu0 %v10936_v13  ;;  %v11059_v13 = vld [vmem:[#allocation7 + $0x8e0] ss:$16 sps:$4 sm:$0xff]  }
 0x236   :  { %2330 = vmatprep.subr.bf16.mxu0 %v10944_v14  ;;  %v11061_v14 = vld [vmem:[#allocation7 + $0x8e4] ss:$16 sps:$4 sm:$0xff]  }
 0x239   :  { %2331 = vmatpush1.bf16.msra.mxu0 %v10942_v15  ;;  %v11064_v15 = vld [vmem:[#allocation7 + $0x8c4] ss:$16 sps:$4 sm:$0xff]  }
 0x23a   :  { %2332 = vmatprep.subr.bf16.mxu0 %v10950_v16  ;;  %v11020_v16 = vld [vmem:[#allocation7 + $0x688] ss:$16 sps:$4 sm:$0xff]  }
 0x23d   :  { %2333 = vmatpush1.bf16.msra.mxu0 %v10948_v17  ;;  %v11062_v17 = vld [vmem:[#allocation7 + $0x8c0] ss:$16 sps:$4 sm:$0xff]  }
 0x23e   :  { %2334 = vmatprep.subr.bf16.mxu0 %v10956_v18  ;;  %v11025_v18 = vld [vmem:[#allocation7 + $0x66c] ss:$16 sps:$4 sm:$0xff]  }
 0x241   :  { %2335 = vmatpush1.bf16.msra.mxu0 %v10954_v19  ;;  %v11023_v19 = vld [vmem:[#allocation7 + $0x668] ss:$16 sps:$4 sm:$0xff]  }
 0x242   :  { %2336 = vmatprep.subr.bf16.mxu0 %v10962_v20  ;;  %v11065_v20 = vld [vmem:[#allocation7 + $0x8a0] ss:$16 sps:$4 sm:$0xff]  }
 0x245   :  { %2337 = vmatpush1.bf16.msra.mxu0 %v10960_v21  ;;  %v11028_v21 = vld [vmem:[#allocation7 + $0x64c] ss:$16 sps:$4 sm:$0xff]  }
 0x246   :  { %2338 = vmatprep.subr.bf16.mxu0 %v10968_v22  ;;  %v11070_v22 = vld [vmem:[#allocation7 + $0x884] ss:$16 sps:$4 sm:$0xff]  }
 0x249   :  { %2339 = vmatpush2.bf16.msra.mxu0 %v10966_v23  ;;  %v11026_v23 = vld [vmem:[#allocation7 + $0x648] ss:$16 sps:$4 sm:$0xff]  }
 0x24a   :  { %2340 = vmatprep.subr.bf16.mxu0 %v10974_v24  ;;  %v11068_v24 = vld [vmem:[#allocation7 + $0x880] ss:$16 sps:$4 sm:$0xff]  }
 0x24d   :  { %2341 = vmatpush2.bf16.msra.mxu0 %v10972_v25  ;;  %v11031_v25 = vld [vmem:[#allocation7 + $0x62c] ss:$16 sps:$4 sm:$0xff]  }
 0x24e   :  { %2342 = vmatprep.subr.bf16.mxu0 %v10980_v28  ;;  %v11073_v28 = vld [vmem:[#allocation7 + $0x864] ss:$16 sps:$4 sm:$0xff]  }
 0x251   :  { %2343 = vmatpush2.bf16.msra.mxu0 %v10978_v29  ;;  %v11029_v29 = vld [vmem:[#allocation7 + $0x628] ss:$16 sps:$4 sm:$0xff]  }
 0x252   :  { %2344 = vmatprep.subr.bf16.mxu0 %v10986_v30  ;;  %v11071_v30 = vld [vmem:[#allocation7 + $0x860] ss:$16 sps:$4 sm:$0xff]  }
 0x255   :  { %2345 = vmatpush2.bf16.msra.mxu0 %v10984_v31  ;;  %v11034_v31 = vld [vmem:[#allocation7 + $0x60c] ss:$16 sps:$4 sm:$0xff]  }
 0x256   :  { %2346 = vmatprep.subr.bf16.mxu0 %v10992_v32  ;;  %v11076_v32 = vld [vmem:[#allocation7 + $0x844] ss:$16 sps:$4 sm:$0xff]  }
 0x259   :  { %v1380_v39 = vpop.f32.mrf.mxu0  ;;  %v1421_v43 = vpop.f32.mrf.mxu1  ;;  %2347 = vmatpush2.bf16.msra.mxu0 %v10990_v33  ;;  %v11032_v33 = vld [vmem:[#allocation7 + $0x608] ss:$16 sps:$4 sm:$0xff]  }
 0x25a   :  { %v1381_v44 = vadd.f32 %v1380_v39, %v1255_v35  ;;  %2348 = vmatprep.subr.bf16.mxu0 %v10998_v34  ;;  %v11074_v34 = vld [vmem:[#allocation7 + $0x840] ss:$16 sps:$4 sm:$0xff]   ;;  %v11037_v35 = vld [vmem:[#allocation7 + $0x7ec] ss:$16 sps:$4 sm:$0xff]  }
 0x25b   :  { %v1382_v45 = vpop.f32.mrf.mxu0  ;;  %v1423_v46 = vpop.f32.mrf.mxu1  ;;  %v11040_v39 = vld [vmem:[#allocation7 + $0x7cc] ss:$16 sps:$4 sm:$0xff]  }
 0x25c   :  { %v1422_v48 = vadd.f32 %v1421_v43, %v1381_v44  ;;  %v1383_v49 = vadd.f32 %v1382_v45, %v1259_v37  ;;  %v11035_v37 = vld [vmem:[#allocation7 + $0x7e8] ss:$16 sps:$4 sm:$0xff]   ;;  %v11082_v43 = vld [vmem:[#allocation7 + $0x804] ss:$16 sps:$4 sm:$0xff]   ;;  %v11080_v45 = vld [vmem:[#allocation7 + $0x800] ss:$16 sps:$4 sm:$0xff]  }
 0x25d   :  { %v1384_v51 = vpop.f32.mrf.mxu0  ;;  %v1425_v52 = vpop.f32.mrf.mxu1  ;;  %2349 = vmatpush2.bf16.msra.mxu0 %v10996_v36  ;;  %v11079_v36 = vld [vmem:[#allocation7 + $0x824] ss:$16 sps:$4 sm:$0xff]   ;;  %v11038_v44 = vld [vmem:[#allocation7 + $0x7c8] ss:$16 sps:$4 sm:$0xff]  }
 0x25e   :  { %vm1430_vm4 = vcmp.ge.f32.partialorder %v1422_v48, 0.0  ;;  %v1434_v53 = vmul.f32 0.2, %v1422_v48  ;;  %v1424_v54 = vadd.f32 %v1423_v46, %v1383_v49  ;;  %2350 = vmatprep.subr.bf16.mxu0 %v11004_v38  ;;  %v11077_v38 = vld [vmem:[#allocation7 + $0x820] ss:$16 sps:$4 sm:$0xff]  }
 0x25f   :  { %v1385_v40 = vpop.f32.mrf.mxu0  ;;  %v1426_v55 = vpop.f32.mrf.mxu1  ;;  %v11043_v46 = vld [vmem:[#allocation7 + $0x7ac] ss:$16 sps:$4 sm:$0xff]   ;;  %v11083_v49 = vld [vmem:[#allocation7 + $0x9e0] ss:$16 sps:$4 sm:$0xff]   ;;  %v11088_v51 = vld [vmem:[#allocation7 + $0x9c4] ss:$16 sps:$4 sm:$0xff]  }
 0x260   :  { %v1438_v57 = vsel %vm1430_vm4, %v1422_v48, %v1434_v53  ;;  %vm1431_vm5 = vcmp.ge.f32.partialorder %v1424_v54, 0.0  ;;  %v1435_v58 = vmul.f32 0.2, %v1424_v54  ;;  %v11041_v48 = vld [vmem:[#allocation7 + $0x7a8] ss:$16 sps:$4 sm:$0xff]  }
 0x261   :  { %2351 = vmatpush2.bf16.msra.mxu0 %v11002_v47  ;;  %v1442_v59 = vmul.f32 1.4142135, %v1438_v57  ;;  %v11085_v47 = vld [vmem:[#allocation7 + $0x9e4] ss:$16 sps:$4 sm:$0xff]   ;;  %v11044_v52 = vld [vmem:[#allocation7 + $0x788] ss:$16 sps:$4 sm:$0xff]  }
 0x262   :  { %2352 = vmatprep.subr.bf16.mxu0 %v11010_v50  ;;  %v1439_v60 = vsel %vm1431_vm5, %v1424_v54, %v1435_v58  ;;  %v11046_v50 = vld [vmem:[#allocation7 + $0x78c] ss:$16 sps:$4 sm:$0xff]   ;;  %v11086_v53 = vld [vmem:[#allocation7 + $0x9c0] ss:$16 sps:$4 sm:$0xff]   ;;  %v11091_v40 = vld [vmem:[#allocation7 + $0x9a4] ss:$16 sps:$4 sm:$0xff]  }
 0x263   :  { %v1443_v61 = vmul.f32 1.4142135, %v1439_v60  ;;  %v12709_v0 = vpack.c.bf16 %v1442_v59, %v1442_v59  ;;  %v11049_v54 = vld [vmem:[#allocation7 + $0x76c] ss:$16 sps:$4 sm:$0xff]   ;;  %v11047_v55 = vld [vmem:[#allocation7 + $0x768] ss:$16 sps:$4 sm:$0xff]  }
 0x264   :  { %v11052_v57 = vld [vmem:[#allocation7 + $0x74c] ss:$16 sps:$4 sm:$0xff]   ;;  %v11094_v58 = vld [vmem:[#allocation7 + $0x984] ss:$16 sps:$4 sm:$0xff]   ;;  %v11050_v59 = vld [vmem:[#allocation7 + $0x748] ss:$16 sps:$4 sm:$0xff]  }
 0x265   :  { %2353 = vmatpush2.bf16.msra.mxu0 %v11008_v56  ;;  %v1447_v62 = vpack.c.bf16 %v1443_v61, %v1443_v61  ;;  %v11089_v56 = vld [vmem:[#allocation7 + $0x9a0] ss:$16 sps:$4 sm:$0xff]   ;;  %v11055_v61 = vld [vmem:[#allocation7 + $0x72c] ss:$16 sps:$4 sm:$0xff]  }
 0x266   :  { %3216 = vmatprep.subr.bf16.mxu0 %v11061_v14  ;;  %v11092_v60 = vld [vmem:[#allocation7 + $0x980] ss:$16 sps:$4 sm:$0xff]  }
 0x267   :  { %2313 = vmatprep.mubr.bf16.mxu1 %v1447_v62  ;;  %v11101_v14 = vld [vmem:[#allocation7 + $0x920] ss:$16 sps:$4 sm:$0xff]  }
 0x268   :  { %2314 = vmatmul.mubr.bf16.vlgmr.msra.gmra.mxu1 %v12709_v0  ;;  %2355 = vmatmul.mubr.bf16.vlgmr.msra.gmra.mxu0 %v12702_v8  ;;  %v11067_v8 = vld [vmem:[#allocation7 + $0x8a4] ss:$16 sps:$4 sm:$0xff]  }
 0x269   :  { %2364 = vmatpush1.bf16.msra.mxu1 %v11011_v63  ;;  %2395 = vmatprep.mubr.bf16.mxu1 %v1447_v62  ;;  %v11097_v62 = vld [vmem:[#allocation7 + $0x964] ss:$16 sps:$4 sm:$0xff]   ;;  %v11053_v63 = vld [vmem:[#allocation7 + $0x728] ss:$16 sps:$4 sm:$0xff]  }
 0x26a   :  { %2365 = vmatprep.subr.bf16.mxu1 %v11016_v7  ;;  %3217 = vmatpush1.bf16.msra.mxu0 %v11059_v13  ;;  %v11095_v7 = vld [vmem:[#allocation7 + $0x960] ss:$16 sps:$4 sm:$0xff]   ;;  %v11103_v13 = vld [vmem:[#allocation7 + $0x924] ss:$16 sps:$4 sm:$0xff]  }
 0x26b   :  { %3218 = vmatprep.subr.bf16.mxu0 %v11064_v15  ;;  %v11106_v15 = vld [vmem:[#allocation7 + $0x904] ss:$16 sps:$4 sm:$0xff]  }
 0x26d   :  { %2366 = vmatpush1.bf16.msra.mxu1 %v11014_v9  ;;  %v11058_v9 = vld [vmem:[#allocation7 + $0x70c] ss:$16 sps:$4 sm:$0xff]  }
 0x26e   :  { %2367 = vmatprep.subr.bf16.mxu1 %v11019_v10  ;;  %3219 = vmatpush1.bf16.msra.mxu0 %v11062_v17  ;;  %v11056_v10 = vld [vmem:[#allocation7 + $0x708] ss:$16 sps:$4 sm:$0xff]   ;;  %v11107_v17 = vld [vmem:[#allocation7 + $0xae0] ss:$16 sps:$4 sm:$0xff]  }
 0x26f   :  { %3220 = vmatprep.subr.bf16.mxu0 %v11067_v8  ;;  %v11112_v8 = vld [vmem:[#allocation7 + $0x8ec] ss:$16 sps:$4 sm:$0xff]  }
 0x271   :  { %2368 = vmatpush1.bf16.msra.mxu1 %v11017_v11  ;;  %v11100_v11 = vld [vmem:[#allocation7 + $0x944] ss:$16 sps:$4 sm:$0xff]  }
 0x272   :  { %2369 = vmatprep.subr.bf16.mxu1 %v11022_v12  ;;  %3221 = vmatpush1.bf16.msra.mxu0 %v11065_v20  ;;  %v11098_v12 = vld [vmem:[#allocation7 + $0x940] ss:$16 sps:$4 sm:$0xff]   ;;  %v11115_v20 = vld [vmem:[#allocation7 + $0xac4] ss:$16 sps:$4 sm:$0xff]  }
 0x273   :  { %3222 = vmatprep.subr.bf16.mxu0 %v11070_v22  ;;  %v11125_v22 = vld [vmem:[#allocation7 + $0xa80] ss:$16 sps:$4 sm:$0xff]  }
 0x275   :  { %2370 = vmatpush1.bf16.msra.mxu1 %v11020_v16  ;;  %v11104_v16 = vld [vmem:[#allocation7 + $0x900] ss:$16 sps:$4 sm:$0xff]  }
 0x276   :  { %2371 = vmatprep.subr.bf16.mxu1 %v11025_v18  ;;  %3223 = vmatpush1.bf16.msra.mxu0 %v11068_v24  ;;  %v11109_v18 = vld [vmem:[#allocation7 + $0xae4] ss:$16 sps:$4 sm:$0xff]   ;;  %v11131_v24 = vld [vmem:[#allocation7 + $0xa60] ss:$16 sps:$4 sm:$0xff]  }
 0x277   :  { %3224 = vmatprep.subr.bf16.mxu0 %v11073_v28  ;;  %v11137_v28 = vld [vmem:[#allocation7 + $0xa40] ss:$16 sps:$4 sm:$0xff]  }
 0x279   :  { %2372 = vmatpush1.bf16.msra.mxu1 %v11023_v19  ;;  %v11113_v19 = vld [vmem:[#allocation7 + $0xac0] ss:$16 sps:$4 sm:$0xff]  }
 0x27a   :  { %2373 = vmatprep.subr.bf16.mxu1 %v11028_v21  ;;  %3225 = vmatpush1.bf16.msra.mxu0 %v11071_v30  ;;  %v11121_v21 = vld [vmem:[#allocation7 + $0xaa4] ss:$16 sps:$4 sm:$0xff]   ;;  %v11143_v30 = vld [vmem:[#allocation7 + $0xa20] ss:$16 sps:$4 sm:$0xff]  }
 0x27b   :  { %3226 = vmatprep.subr.bf16.mxu0 %v11076_v32  ;;  %v11149_v32 = vld [vmem:[#allocation7 + $0xa00] ss:$16 sps:$4 sm:$0xff]  }
 0x27d   :  { %2374 = vmatpush1.bf16.msra.mxu1 %v11026_v23  ;;  %v11127_v23 = vld [vmem:[#allocation7 + $0xa84] ss:$16 sps:$4 sm:$0xff]  }
 0x27e   :  { %2375 = vmatprep.subr.bf16.mxu1 %v11031_v25  ;;  %3227 = vmatpush1.bf16.msra.mxu0 %v11074_v34  ;;  %v11133_v25 = vld [vmem:[#allocation7 + $0xa64] ss:$16 sps:$4 sm:$0xff]   ;;  %v11155_v34 = vld [vmem:[#allocation7 + $0xbe0] ss:$16 sps:$4 sm:$0xff]  }
 0x27f   :  { %3228 = vmatprep.subr.bf16.mxu0 %v11079_v36  ;;  %v11161_v36 = vld [vmem:[#allocation7 + $0xbc0] ss:$16 sps:$4 sm:$0xff]  }
 0x281   :  { %2376 = vmatpush1.bf16.msra.mxu1 %v11029_v29  ;;  %v11139_v29 = vld [vmem:[#allocation7 + $0xa44] ss:$16 sps:$4 sm:$0xff]  }
 0x282   :  { %2377 = vmatprep.subr.bf16.mxu1 %v11034_v31  ;;  %3229 = vmatpush1.bf16.msra.mxu0 %v11077_v38  ;;  %v11145_v31 = vld [vmem:[#allocation7 + $0xa24] ss:$16 sps:$4 sm:$0xff]   ;;  %v11167_v38 = vld [vmem:[#allocation7 + $0xba0] ss:$16 sps:$4 sm:$0xff]  }
 0x283   :  { %3230 = vmatprep.subr.bf16.mxu0 %v11082_v43  ;;  %v11173_v43 = vld [vmem:[#allocation7 + $0xb80] ss:$16 sps:$4 sm:$0xff]  }
 0x285   :  { %2378 = vmatpush1.bf16.msra.mxu1 %v11032_v33  ;;  %v11151_v33 = vld [vmem:[#allocation7 + $0xa04] ss:$16 sps:$4 sm:$0xff]  }
 0x286   :  { %2379 = vmatprep.subr.bf16.mxu1 %v11037_v35  ;;  %3231 = vmatpush1.bf16.msra.mxu0 %v11080_v45  ;;  %v11157_v35 = vld [vmem:[#allocation7 + $0xbe4] ss:$16 sps:$4 sm:$0xff]   ;;  %v11179_v45 = vld [vmem:[#allocation7 + $0xb60] ss:$16 sps:$4 sm:$0xff]  }
 0x287   :  { %3232 = vmatprep.subr.bf16.mxu0 %v11085_v47  ;;  %v11187_v47 = vld [vmem:[#allocation7 + $0xb44] ss:$16 sps:$4 sm:$0xff]  }
 0x289   :  { %2380 = vmatpush2.bf16.msra.mxu1 %v11035_v37  ;;  %v11163_v37 = vld [vmem:[#allocation7 + $0xbc4] ss:$16 sps:$4 sm:$0xff]  }
 0x28a   :  { %2381 = vmatprep.subr.bf16.mxu1 %v11040_v39  ;;  %3233 = vmatpush2.bf16.msra.mxu0 %v11083_v49  ;;  %v11169_v39 = vld [vmem:[#allocation7 + $0xba4] ss:$16 sps:$4 sm:$0xff]  }
 0x28b   :  { %3234 = vmatprep.subr.bf16.mxu0 %v11088_v51  ;;  %v11193_v51 = vld [vmem:[#allocation7 + $0xb24] ss:$16 sps:$4 sm:$0xff]  }
 0x28d   :  { %2382 = vmatpush2.bf16.msra.mxu1 %v11038_v44  ;;  %v11175_v44 = vld [vmem:[#allocation7 + $0xb84] ss:$16 sps:$4 sm:$0xff]  }
 0x28e   :  { %2383 = vmatprep.subr.bf16.mxu1 %v11043_v46  ;;  %3235 = vmatpush2.bf16.msra.mxu0 %v11086_v53  ;;  %v11181_v46 = vld [vmem:[#allocation7 + $0xb64] ss:$16 sps:$4 sm:$0xff]  }
 0x28f   :  { %3236 = vmatprep.subr.bf16.mxu0 %v11091_v40  ;;  %v11199_v40 = vld [vmem:[#allocation7 + $0xb04] ss:$16 sps:$4 sm:$0xff]  }
 0x291   :  { %2384 = vmatpush2.bf16.msra.mxu1 %v11041_v48  ;;  %v11185_v48 = vld [vmem:[#allocation7 + $0xb40] ss:$16 sps:$4 sm:$0xff]  }
 0x292   :  { %2385 = vmatprep.subr.bf16.mxu1 %v11046_v50  ;;  %3237 = vmatpush2.bf16.msra.mxu0 %v11089_v56  ;;  %v11205_v56 = vld [vmem:[#allocation7 + $0xaec] ss:$16 sps:$4 sm:$0xff]  }
 0x293   :  { %3238 = vmatprep.subr.bf16.mxu0 %v11094_v58 }
 0x295   :  { %2386 = vmatpush2.bf16.msra.mxu1 %v11044_v52  ;;  %v11191_v52 = vld [vmem:[#allocation7 + $0xb20] ss:$16 sps:$4 sm:$0xff]  }
 0x296   :  { %2387 = vmatprep.subr.bf16.mxu1 %v11049_v54  ;;  %3239 = vmatpush2.bf16.msra.mxu0 %v11092_v60 }
 0x297   :  { %3240 = vmatprep.subr.bf16.mxu0 %v11097_v62 }
 0x299   :  { %2388 = vmatpush2.bf16.msra.mxu1 %v11047_v55  ;;  %v11197_v55 = vld [vmem:[#allocation7 + $0xb00] ss:$16 sps:$4 sm:$0xff]  }
 0x29a   :  { %2389 = vmatprep.subr.bf16.mxu1 %v11052_v57  ;;  %3241 = vmatpush2.bf16.msra.mxu0 %v11095_v7  ;;  %v12714_v57 = vld [vmem:[#allocation9 + $0x4] sm:$0xf] }
 0x29b   :  { %3242 = vmatprep.subr.bf16.mxu0 %v11100_v11  ;;  %v2223_v58 = vrot.slane %v12714_v57, %v12656_v3 }
 0x29d   :  { %2390 = vmatpush2.bf16.msra.mxu1 %v11050_v59  ;;  %v2227_v59 = vrot.slane %v12714_v57, %v12659_v4 }
 0x29e   :  { %2391 = vmatprep.subr.bf16.mxu1 %v11055_v61  ;;  %3243 = vmatpush2.bf16.msra.mxu0 %v11098_v12 }
 0x29f   :  { %3244 = vmatprep.subr.bf16.mxu0 %v11103_v13 }
 0x2a1   :  { %2392 = vmatpush2.bf16.msra.mxu1 %v11053_v63 }
 0x2a2   :  { %2393 = vmatprep.subr.bf16.mxu1 %v11058_v9  ;;  %3245 = vmatpush2.bf16.msra.mxu0 %v11101_v14 }
 0x2a3   :  { %3246 = vmatprep.subr.bf16.mxu0 %v11106_v15 }
 0x2a5   :  { %2394 = vmatpush2.bf16.msra.mxu1 %v11056_v10 }
 0x2a6   :  { %3247 = vmatpush2.bf16.msra.mxu0 %v11104_v16  ;;  %3257 = vmatprep.subr.bf16.mxu1 %v11109_v18 }
 0x2a7   :  { %3298 = vmatprep.subr.bf16.mxu0 %v11112_v8 }
 0x2a8   :  { %2396 = vmatmul.mubr.bf16.vlgmr.msra.gmra.mxu1 %v12709_v0  ;;  %v11119_v0 = vld [vmem:[#allocation7 + $0xaa0] ss:$16 sps:$4 sm:$0xff]  }
 0x2a9   :  { %3258 = vmatpush1.bf16.msra.mxu1 %v11107_v17 }
 0x2aa   :  { %3259 = vmatprep.subr.bf16.mxu1 %v11115_v20 }
 0x2ad   :  { %3260 = vmatpush1.bf16.msra.mxu1 %v11113_v19 }
 0x2ae   :  { %3261 = vmatprep.subr.bf16.mxu1 %v11121_v21  ;;  %v11110_v21 = vld [vmem:[#allocation7 + $0x8e8] ss:$16 sps:$4 sm:$0xff]  }
 0x2b1   :  { %3262 = vmatpush1.bf16.msra.mxu1 %v11119_v0 }
 0x2b2   :  { %3263 = vmatprep.subr.bf16.mxu1 %v11127_v23  ;;  %v11118_v23 = vld [vmem:[#allocation7 + $0x8cc] ss:$16 sps:$4 sm:$0xff]  }
 0x2b5   :  { %3264 = vmatpush1.bf16.msra.mxu1 %v11125_v22 }
 0x2b6   :  { %3265 = vmatprep.subr.bf16.mxu1 %v11133_v25  ;;  %v11124_v25 = vld [vmem:[#allocation7 + $0x8ac] ss:$16 sps:$4 sm:$0xff]  }
 0x2b9   :  { %3266 = vmatpush1.bf16.msra.mxu1 %v11131_v24  ;;  %v11116_v24 = vld [vmem:[#allocation7 + $0x8c8] ss:$16 sps:$4 sm:$0xff]  }
 0x2ba   :  { %3267 = vmatprep.subr.bf16.mxu1 %v11139_v29  ;;  %v11130_v29 = vld [vmem:[#allocation7 + $0x88c] ss:$16 sps:$4 sm:$0xff]  }
 0x2bd   :  { %3268 = vmatpush1.bf16.msra.mxu1 %v11137_v28  ;;  %v11122_v28 = vld [vmem:[#allocation7 + $0x8a8] ss:$16 sps:$4 sm:$0xff]  }
 0x2be   :  { %3269 = vmatprep.subr.bf16.mxu1 %v11145_v31  ;;  %v11136_v31 = vld [vmem:[#allocation7 + $0x86c] ss:$16 sps:$4 sm:$0xff]  }
 0x2c1   :  { %3270 = vmatpush1.bf16.msra.mxu1 %v11143_v30  ;;  %v11128_v30 = vld [vmem:[#allocation7 + $0x888] ss:$16 sps:$4 sm:$0xff]  }
 0x2c2   :  { %3271 = vmatprep.subr.bf16.mxu1 %v11151_v33  ;;  %v11142_v33 = vld [vmem:[#allocation7 + $0x84c] ss:$16 sps:$4 sm:$0xff]  }
 0x2c5   :  { %3272 = vmatpush1.bf16.msra.mxu1 %v11149_v32  ;;  %v11134_v32 = vld [vmem:[#allocation7 + $0x868] ss:$16 sps:$4 sm:$0xff]  }
 0x2c6   :  { %3273 = vmatprep.subr.bf16.mxu1 %v11157_v35  ;;  %v11148_v35 = vld [vmem:[#allocation7 + $0x82c] ss:$16 sps:$4 sm:$0xff]  }
 0x2c9   :  { %3274 = vmatpush2.bf16.msra.mxu1 %v11155_v34  ;;  %v11140_v34 = vld [vmem:[#allocation7 + $0x848] ss:$16 sps:$4 sm:$0xff]  }
 0x2ca   :  { %3275 = vmatprep.subr.bf16.mxu1 %v11163_v37  ;;  %v11154_v37 = vld [vmem:[#allocation7 + $0x80c] ss:$16 sps:$4 sm:$0xff]  }
 0x2cd   :  { %3276 = vmatpush2.bf16.msra.mxu1 %v11161_v36  ;;  %v11146_v36 = vld [vmem:[#allocation7 + $0x828] ss:$16 sps:$4 sm:$0xff]  }
 0x2ce   :  { %3277 = vmatprep.subr.bf16.mxu1 %v11169_v39  ;;  %v11160_v39 = vld [vmem:[#allocation7 + $0x9ec] ss:$16 sps:$4 sm:$0xff]  }
 0x2d1   :  { %3278 = vmatpush2.bf16.msra.mxu1 %v11167_v38  ;;  %v11152_v38 = vld [vmem:[#allocation7 + $0x808] ss:$16 sps:$4 sm:$0xff]  }
 0x2d2   :  { %3279 = vmatprep.subr.bf16.mxu1 %v11175_v44  ;;  %v11166_v44 = vld [vmem:[#allocation7 + $0x9cc] ss:$16 sps:$4 sm:$0xff]  }
 0x2d5   :  { %3280 = vmatpush2.bf16.msra.mxu1 %v11173_v43  ;;  %v11158_v43 = vld [vmem:[#allocation7 + $0x9e8] ss:$16 sps:$4 sm:$0xff]  }
 0x2d6   :  { %3281 = vmatprep.subr.bf16.mxu1 %v11181_v46  ;;  %v11172_v46 = vld [vmem:[#allocation7 + $0x9ac] ss:$16 sps:$4 sm:$0xff]  }
 0x2d9   :  { %3282 = vmatpush2.bf16.msra.mxu1 %v11179_v45  ;;  %v11164_v45 = vld [vmem:[#allocation7 + $0x9c8] ss:$16 sps:$4 sm:$0xff]  }
 0x2da   :  { %3283 = vmatprep.subr.bf16.mxu1 %v11187_v47  ;;  %v11170_v47 = vld [vmem:[#allocation7 + $0x9a8] ss:$16 sps:$4 sm:$0xff]  }
 0x2dd   :  { %3284 = vmatpush2.bf16.msra.mxu1 %v11185_v48  ;;  %v11178_v48 = vld [vmem:[#allocation7 + $0x98c] ss:$16 sps:$4 sm:$0xff]  }
 0x2de   :  { %3285 = vmatprep.subr.bf16.mxu1 %v11193_v51  ;;  %v11182_v51 = vld [vmem:[#allocation7 + $0x968] ss:$16 sps:$4 sm:$0xff]  }
 0x2e1   :  { %3286 = vmatpush2.bf16.msra.mxu1 %v11191_v52  ;;  %v2231_v52 = vrot.slane %v12714_v57, %v12662_v5 }
 0x2e2   :  { %3287 = vmatprep.subr.bf16.mxu1 %v11199_v40  ;;  %v11188_v40 = vld [vmem:[#allocation7 + $0x948] ss:$16 sps:$4 sm:$0xff]  }
 0x2e5   :  { %3288 = vmatpush2.bf16.msra.mxu1 %v11197_v55 }
 0x2e6   :  { %3339 = vmatprep.subr.bf16.mxu1 %v11205_v56  ;;  %v11196_v56 = vld [vmem:[#allocation7 + $0x92c] ss:$16 sps:$4 sm:$0xff]  }
 0x2e8   :  { %v2274_v49 = vpop.f32.mrf.mxu0 }
 0x2e9   :  { %v2275_v60 = vadd.f32 %v2274_v49, %v2223_v58  ;;  %v11176_v49 = vld [vmem:[#allocation7 + $0x988] ss:$16 sps:$4 sm:$0xff]  }
 0x2ea   :  { %v2276_v50 = vpop.f32.mrf.mxu0 }
 0x2eb   :  { %v2277_v63 = vadd.f32 %v2276_v50, %v2227_v59  ;;  %v11184_v50 = vld [vmem:[#allocation7 + $0x96c] ss:$16 sps:$4 sm:$0xff]  }
 0x2ec   :  { %v2278_v53 = vpop.f32.mrf.mxu0 }
 0x2ed   :  { %v11190_v53 = vld [vmem:[#allocation7 + $0x94c] ss:$16 sps:$4 sm:$0xff]  }
 0x2ee   :  { %v2279_v54 = vpop.f32.mrf.mxu0 }
 0x2ef   :  { %v2235_v54 = vrot.slane %v12714_v57, %v12665_v6 }
 0x328   :  { %v2315_v61 = vpop.f32.mrf.mxu1  ;;  %v12720_v62 = vpop.f32.mrf.mxu0 }
 0x329   :  { %v2316_v7 = vadd.f32 %v2315_v61, %v2275_v60  ;;  %v2357_v55 = vadd.f32 %v12720_v62, %v2231_v52  ;;  %v11200_v62 = vld [vmem:[#allocation7 + $0x908] ss:$16 sps:$4 sm:$0xff]   ;;  %v11269_v52 = vld [vmem:[#allocation7 + $0xc20] ss:$16 sps:$4 sm:$0xff]  }
 0x32a   :  { %v2317_v9 = vpop.f32.mrf.mxu1  ;;  %v12722_v10 = vpop.f32.mrf.mxu0 }
 0x32b   :  { %vm2404_vm6 = vcmp.ge.f32.partialorder %v2316_v7, 0.0  ;;  %v2408_v11 = vmul.f32 0.2, %v2316_v7  ;;  %v2318_v12 = vadd.f32 %v2317_v9, %v2277_v63  ;;  %v2359_v59 = vadd.f32 %v12722_v10, %v2235_v54  ;;  %v11194_v63 = vld [vmem:[#allocation7 + $0x928] ss:$16 sps:$4 sm:$0xff]  }
 0x32c   :  { %v2319_v13 = vpop.f32.mrf.mxu1  ;;  %v2360_v14 = vpop.f32.mrf.mxu0  ;;  %v11274_v54 = vld [vmem:[#allocation7 + $0xc04] ss:$16 sps:$4 sm:$0xff]  }
 0x32d   :  { %v2412_v15 = vsel %vm2404_vm6, %v2316_v7, %v2408_v11  ;;  %vm2405_vm7 = vcmp.ge.f32.partialorder %v2318_v12, 0.0  ;;  %v2409_v16 = vmul.f32 0.2, %v2318_v12  ;;  %v11202_v11 = vld [vmem:[#allocation7 + $0x90c] ss:$16 sps:$4 sm:$0xff]  }
 0x32e   :  { %v2320_v17 = vpop.f32.mrf.mxu1  ;;  %v2361_v18 = vpop.f32.mrf.mxu0  ;;  %v2416_v8 = vmul.f32 1.4142135, %v2412_v15 }
 0x32f   :  { %v2413_v19 = vsel %vm2405_vm7, %v2318_v12, %v2409_v16  ;;  %v11203_v18 = vld [vmem:[#allocation7 + $0xae8] ss:$16 sps:$4 sm:$0xff]  }
 0x330   :  { %v2417_v20 = vmul.f32 1.4142135, %v2413_v19  ;;  %v12724_v22 = vpack.c.bf16 %v2416_v8, %v2416_v8  ;;  %v11208_v19 = vld [vmem:[#allocation7 + $0xacc] ss:$16 sps:$4 sm:$0xff]  }
 0x332   :  { %v2421_v0 = vpack.c.bf16 %v2417_v20, %v2417_v20  ;;  %v11206_v20 = vld [vmem:[#allocation7 + $0xac8] ss:$16 sps:$4 sm:$0xff]  }
 0x334   :  { %3248 = vmatprep.mubr.bf16.mxu0 %v2421_v0 }
 0x335   :  { %3249 = vmatmul.mubr.bf16.vlgmr.msra.gmra.mxu0 %v12724_v22 }
 0x336   :  { %3299 = vmatpush1.bf16.msra.mxu0 %v11110_v21  ;;  %3330 = vmatprep.mubr.bf16.mxu0 %v2421_v0  ;;  %v11211_v0 = vld [vmem:[#allocation7 + $0xaac] ss:$16 sps:$4 sm:$0xff]   ;;  %v11209_v21 = vld [vmem:[#allocation7 + $0xaa8] ss:$16 sps:$4 sm:$0xff]  }
 0x337   :  { %3300 = vmatprep.subr.bf16.mxu0 %v11118_v23  ;;  %v11214_v23 = vld [vmem:[#allocation7 + $0xa8c] ss:$16 sps:$4 sm:$0xff]  }
 0x33a   :  { %3301 = vmatpush1.bf16.msra.mxu0 %v11116_v24  ;;  %v11251_v24 = vld [vmem:[#allocation7 + $0xce0] ss:$16 sps:$4 sm:$0xff]  }
 0x33b   :  { %3302 = vmatprep.subr.bf16.mxu0 %v11124_v25  ;;  %v11253_v25 = vld [vmem:[#allocation7 + $0xce4] ss:$16 sps:$4 sm:$0xff]  }
 0x33e   :  { %3303 = vmatpush1.bf16.msra.mxu0 %v11122_v28  ;;  %v11256_v28 = vld [vmem:[#allocation7 + $0xcc4] ss:$16 sps:$4 sm:$0xff]  }
 0x33f   :  { %3304 = vmatprep.subr.bf16.mxu0 %v11130_v29  ;;  %v11212_v29 = vld [vmem:[#allocation7 + $0xa88] ss:$16 sps:$4 sm:$0xff]  }
 0x342   :  { %3305 = vmatpush1.bf16.msra.mxu0 %v11128_v30  ;;  %v11254_v30 = vld [vmem:[#allocation7 + $0xcc0] ss:$16 sps:$4 sm:$0xff]  }
 0x343   :  { %3306 = vmatprep.subr.bf16.mxu0 %v11136_v31  ;;  %v11217_v31 = vld [vmem:[#allocation7 + $0xa6c] ss:$16 sps:$4 sm:$0xff]  }
 0x346   :  { %3307 = vmatpush1.bf16.msra.mxu0 %v11134_v32  ;;  %v11215_v32 = vld [vmem:[#allocation7 + $0xa68] ss:$16 sps:$4 sm:$0xff]  }
 0x347   :  { %3308 = vmatprep.subr.bf16.mxu0 %v11142_v33  ;;  %v11257_v33 = vld [vmem:[#allocation7 + $0xca0] ss:$16 sps:$4 sm:$0xff]  }
 0x34a   :  { %3309 = vmatpush1.bf16.msra.mxu0 %v11140_v34  ;;  %v11220_v34 = vld [vmem:[#allocation7 + $0xa4c] ss:$16 sps:$4 sm:$0xff]  }
 0x34b   :  { %3310 = vmatprep.subr.bf16.mxu0 %v11148_v35  ;;  %v11262_v35 = vld [vmem:[#allocation7 + $0xc84] ss:$16 sps:$4 sm:$0xff]  }
 0x34e   :  { %3311 = vmatpush1.bf16.msra.mxu0 %v11146_v36  ;;  %v11218_v36 = vld [vmem:[#allocation7 + $0xa48] ss:$16 sps:$4 sm:$0xff]  }
 0x34f   :  { %3312 = vmatprep.subr.bf16.mxu0 %v11154_v37  ;;  %v11260_v37 = vld [vmem:[#allocation7 + $0xc80] ss:$16 sps:$4 sm:$0xff]  }
 0x352   :  { %3313 = vmatpush1.bf16.msra.mxu0 %v11152_v38  ;;  %v11223_v38 = vld [vmem:[#allocation7 + $0xa2c] ss:$16 sps:$4 sm:$0xff]  }
 0x353   :  { %3314 = vmatprep.subr.bf16.mxu0 %v11160_v39  ;;  %v11265_v39 = vld [vmem:[#allocation7 + $0xc64] ss:$16 sps:$4 sm:$0xff]  }
 0x356   :  { %3315 = vmatpush2.bf16.msra.mxu0 %v11158_v43  ;;  %v11221_v43 = vld [vmem:[#allocation7 + $0xa28] ss:$16 sps:$4 sm:$0xff]  }
 0x357   :  { %3316 = vmatprep.subr.bf16.mxu0 %v11166_v44  ;;  %v11263_v44 = vld [vmem:[#allocation7 + $0xc60] ss:$16 sps:$4 sm:$0xff]  }
 0x35a   :  { %3317 = vmatpush2.bf16.msra.mxu0 %v11164_v45  ;;  %v11226_v45 = vld [vmem:[#allocation7 + $0xa0c] ss:$16 sps:$4 sm:$0xff]  }
 0x35b   :  { %3318 = vmatprep.subr.bf16.mxu0 %v11172_v46  ;;  %v11268_v46 = vld [vmem:[#allocation7 + $0xc44] ss:$16 sps:$4 sm:$0xff]  }
 0x35e   :  { %3319 = vmatpush2.bf16.msra.mxu0 %v11170_v47  ;;  %v11224_v47 = vld [vmem:[#allocation7 + $0xa08] ss:$16 sps:$4 sm:$0xff]  }
 0x35f   :  { %3320 = vmatprep.subr.bf16.mxu0 %v11178_v48  ;;  %v11266_v48 = vld [vmem:[#allocation7 + $0xc40] ss:$16 sps:$4 sm:$0xff]  }
 0x362   :  { %3321 = vmatpush2.bf16.msra.mxu0 %v11176_v49  ;;  %v11229_v49 = vld [vmem:[#allocation7 + $0xbec] ss:$16 sps:$4 sm:$0xff]  }
 0x363   :  { %3322 = vmatprep.subr.bf16.mxu0 %v11184_v50  ;;  %v11271_v50 = vld [vmem:[#allocation7 + $0xc24] ss:$16 sps:$4 sm:$0xff]  }
 0x366   :  { %3323 = vmatpush2.bf16.msra.mxu0 %v11182_v51  ;;  %v11227_v51 = vld [vmem:[#allocation7 + $0xbe8] ss:$16 sps:$4 sm:$0xff]  }
 0x367   :  { %3324 = vmatprep.subr.bf16.mxu0 %v11190_v53  ;;  %v11232_v53 = vld [vmem:[#allocation7 + $0xbcc] ss:$16 sps:$4 sm:$0xff]  }
 0x368   :  { %v2397_v58 = vpop.f32.mrf.mxu1 }
 0x369   :  { %v2398_v60 = vadd.f32 %v2397_v58, %v2357_v55  ;;  %v11272_v55 = vld [vmem:[#allocation7 + $0xc00] ss:$16 sps:$4 sm:$0xff]   ;;  %v11277_v58 = vld [vmem:[#allocation7 + $0xde4] ss:$16 sps:$4 sm:$0xff]  }
 0x36a   :  { %v2399_v61 = vpop.f32.mrf.mxu1  ;;  %3325 = vmatpush2.bf16.msra.mxu0 %v11188_v40  ;;  %v11230_v40 = vld [vmem:[#allocation7 + $0xbc8] ss:$16 sps:$4 sm:$0xff]  }
 0x36b   :  { %vm2406_vm8 = vcmp.ge.f32.partialorder %v2398_v60, 0.0  ;;  %v2410_v7 = vmul.f32 0.2, %v2398_v60  ;;  %v2400_v9 = vadd.f32 %v2399_v61, %v2359_v59  ;;  %3326 = vmatprep.subr.bf16.mxu0 %v11196_v56  ;;  %v11235_v56 = vld [vmem:[#allocation7 + $0xbac] ss:$16 sps:$4 sm:$0xff]  }
 0x36c   :  { %v2401_v12 = vpop.f32.mrf.mxu1  ;;  %v11233_v59 = vld [vmem:[#allocation7 + $0xba8] ss:$16 sps:$4 sm:$0xff]   ;;  %v11238_v61 = vld [vmem:[#allocation7 + $0xb8c] ss:$16 sps:$4 sm:$0xff]  }
 0x36d   :  { %v2414_v57 = vsel %vm2406_vm8, %v2398_v60, %v2410_v7  ;;  %vm2407_vm9 = vcmp.ge.f32.partialorder %v2400_v9, 0.0  ;;  %v2411_v13 = vmul.f32 0.2, %v2400_v9  ;;  %v11275_v60 = vld [vmem:[#allocation7 + $0xde0] ss:$16 sps:$4 sm:$0xff]  }
 0x36e   :  { %v2402_v14 = vpop.f32.mrf.mxu1  ;;  %3327 = vmatpush2.bf16.msra.mxu0 %v11194_v63  ;;  %v2418_v15 = vmul.f32 1.4142135, %v2414_v57  ;;  %v11280_v63 = vld [vmem:[#allocation7 + $0xdc4] ss:$16 sps:$4 sm:$0xff]   ;;  %v11236_v7 = vld [vmem:[#allocation7 + $0xb88] ss:$16 sps:$4 sm:$0xff]  }
 0x36f   :  { %3328 = vmatprep.subr.bf16.mxu0 %v11202_v11  ;;  %v2415_v16 = vsel %vm2407_vm9, %v2400_v9, %v2411_v13  ;;  %v11278_v9 = vld [vmem:[#allocation7 + $0xdc0] ss:$16 sps:$4 sm:$0xff]   ;;  %v11241_v11 = vld [vmem:[#allocation7 + $0xb6c] ss:$16 sps:$4 sm:$0xff]   ;;  %v11283_v12 = vld [vmem:[#allocation7 + $0xda4] ss:$16 sps:$4 sm:$0xff]  }
 0x370   :  { %v2419_v10 = vmul.f32 1.4142135, %v2415_v16  ;;  %v12733_v8 = vpack.c.bf16 %v2418_v15, %v2418_v15  ;;  %v11239_v57 = vld [vmem:[#allocation7 + $0xb68] ss:$16 sps:$4 sm:$0xff]   ;;  %v11281_v13 = vld [vmem:[#allocation7 + $0xda0] ss:$16 sps:$4 sm:$0xff]  }
 0x371   :  { %v11244_v14 = vld [vmem:[#allocation7 + $0xb4c] ss:$16 sps:$4 sm:$0xff]   ;;  %v11242_v15 = vld [vmem:[#allocation7 + $0xb48] ss:$16 sps:$4 sm:$0xff]   ;;  %v11284_v16 = vld [vmem:[#allocation7 + $0xd80] ss:$16 sps:$4 sm:$0xff]  }
 0x372   :  { %3329 = vmatpush2.bf16.msra.mxu0 %v11200_v62  ;;  %v2423_v17 = vpack.c.bf16 %v2419_v10, %v2419_v10  ;;  %v11286_v62 = vld [vmem:[#allocation7 + $0xd84] ss:$16 sps:$4 sm:$0xff]   ;;  %v11247_v10 = vld [vmem:[#allocation7 + $0xb2c] ss:$16 sps:$4 sm:$0xff]  }
 0x373   :  { %4192 = vmatprep.subr.bf16.mxu0 %v11253_v25  ;;  %v11293_v25 = vld [vmem:[#allocation7 + $0xd20] ss:$16 sps:$4 sm:$0xff]  }
 0x374   :  { %3289 = vmatprep.mubr.bf16.mxu1 %v2423_v17 }
 0x375   :  { %3290 = vmatmul.mubr.bf16.vlgmr.msra.gmra.mxu1 %v12733_v8  ;;  %3331 = vmatmul.mubr.bf16.vlgmr.msra.gmra.mxu0 %v12724_v22  ;;  %v11259_v22 = vld [vmem:[#allocation7 + $0xca4] ss:$16 sps:$4 sm:$0xff]  }
 0x376   :  { %3340 = vmatpush1.bf16.msra.mxu1 %v11203_v18  ;;  %3371 = vmatprep.mubr.bf16.mxu1 %v2423_v17  ;;  %v11289_v17 = vld [vmem:[#allocation7 + $0xd64] ss:$16 sps:$4 sm:$0xff]   ;;  %v11245_v18 = vld [vmem:[#allocation7 + $0xb28] ss:$16 sps:$4 sm:$0xff]  }
 0x377   :  { %3341 = vmatprep.subr.bf16.mxu1 %v11208_v19  ;;  %4193 = vmatpush1.bf16.msra.mxu0 %v11251_v24  ;;  %v11287_v19 = vld [vmem:[#allocation7 + $0xd60] ss:$16 sps:$4 sm:$0xff]   ;;  %v11295_v24 = vld [vmem:[#allocation7 + $0xd24] ss:$16 sps:$4 sm:$0xff]  }
 0x378   :  { %4194 = vmatprep.subr.bf16.mxu0 %v11256_v28  ;;  %v11298_v28 = vld [vmem:[#allocation7 + $0xd04] ss:$16 sps:$4 sm:$0xff]  }
 0x37a   :  { %3342 = vmatpush1.bf16.msra.mxu1 %v11206_v20  ;;  %v11250_v20 = vld [vmem:[#allocation7 + $0xb0c] ss:$16 sps:$4 sm:$0xff]  }
 0x37b   :  { %3343 = vmatprep.subr.bf16.mxu1 %v11211_v0  ;;  %4195 = vmatpush1.bf16.msra.mxu0 %v11254_v30  ;;  %v11248_v0 = vld [vmem:[#allocation7 + $0xb08] ss:$16 sps:$4 sm:$0xff]   ;;  %v11299_v30 = vld [vmem:[#allocation7 + $0xee0] ss:$16 sps:$4 sm:$0xff]  }
 0x37c   :  { %4196 = vmatprep.subr.bf16.mxu0 %v11259_v22  ;;  %v11304_v22 = vld [vmem:[#allocation7 + $0xcec] ss:$16 sps:$4 sm:$0xff]  }
 0x37e   :  { %3344 = vmatpush1.bf16.msra.mxu1 %v11209_v21  ;;  %v11292_v21 = vld [vmem:[#allocation7 + $0xd44] ss:$16 sps:$4 sm:$0xff]  }
 0x37f   :  { %3345 = vmatprep.subr.bf16.mxu1 %v11214_v23  ;;  %4197 = vmatpush1.bf16.msra.mxu0 %v11257_v33  ;;  %v11290_v23 = vld [vmem:[#allocation7 + $0xd40] ss:$16 sps:$4 sm:$0xff]   ;;  %v11307_v33 = vld [vmem:[#allocation7 + $0xec4] ss:$16 sps:$4 sm:$0xff]  }
 0x380   :  { %4198 = vmatprep.subr.bf16.mxu0 %v11262_v35  ;;  %v11317_v35 = vld [vmem:[#allocation7 + $0xe80] ss:$16 sps:$4 sm:$0xff]  }
 0x382   :  { %3346 = vmatpush1.bf16.msra.mxu1 %v11212_v29  ;;  %v11296_v29 = vld [vmem:[#allocation7 + $0xd00] ss:$16 sps:$4 sm:$0xff]  }
 0x383   :  { %3347 = vmatprep.subr.bf16.mxu1 %v11217_v31  ;;  %4199 = vmatpush1.bf16.msra.mxu0 %v11260_v37  ;;  %v11301_v31 = vld [vmem:[#allocation7 + $0xee4] ss:$16 sps:$4 sm:$0xff]   ;;  %v11323_v37 = vld [vmem:[#allocation7 + $0xe60] ss:$16 sps:$4 sm:$0xff]  }
 0x384   :  { %4200 = vmatprep.subr.bf16.mxu0 %v11265_v39  ;;  %v11329_v39 = vld [vmem:[#allocation7 + $0xe40] ss:$16 sps:$4 sm:$0xff]  }
 0x386   :  { %3348 = vmatpush1.bf16.msra.mxu1 %v11215_v32  ;;  %v11305_v32 = vld [vmem:[#allocation7 + $0xec0] ss:$16 sps:$4 sm:$0xff]  }
 0x387   :  { %3349 = vmatprep.subr.bf16.mxu1 %v11220_v34  ;;  %4201 = vmatpush1.bf16.msra.mxu0 %v11263_v44  ;;  %v11313_v34 = vld [vmem:[#allocation7 + $0xea4] ss:$16 sps:$4 sm:$0xff]   ;;  %v11335_v44 = vld [vmem:[#allocation7 + $0xe20] ss:$16 sps:$4 sm:$0xff]  }
 0x388   :  { %4202 = vmatprep.subr.bf16.mxu0 %v11268_v46  ;;  %v11341_v46 = vld [vmem:[#allocation7 + $0xe00] ss:$16 sps:$4 sm:$0xff]  }
 0x38a   :  { %3350 = vmatpush1.bf16.msra.mxu1 %v11218_v36  ;;  %v11319_v36 = vld [vmem:[#allocation7 + $0xe84] ss:$16 sps:$4 sm:$0xff]  }
 0x38b   :  { %3351 = vmatprep.subr.bf16.mxu1 %v11223_v38  ;;  %4203 = vmatpush1.bf16.msra.mxu0 %v11266_v48  ;;  %v11325_v38 = vld [vmem:[#allocation7 + $0xe64] ss:$16 sps:$4 sm:$0xff]   ;;  %v11347_v48 = vld [vmem:[#allocation7 + $0xfe0] ss:$16 sps:$4 sm:$0xff]  }
 0x38c   :  { %4204 = vmatprep.subr.bf16.mxu0 %v11271_v50  ;;  %v11353_v50 = vld [vmem:[#allocation7 + $0xfc0] ss:$16 sps:$4 sm:$0xff]  }
 0x38e   :  { %3352 = vmatpush1.bf16.msra.mxu1 %v11221_v43  ;;  %v11331_v43 = vld [vmem:[#allocation7 + $0xe44] ss:$16 sps:$4 sm:$0xff]  }
 0x38f   :  { %3353 = vmatprep.subr.bf16.mxu1 %v11226_v45  ;;  %4205 = vmatpush1.bf16.msra.mxu0 %v11269_v52  ;;  %v11337_v45 = vld [vmem:[#allocation7 + $0xe24] ss:$16 sps:$4 sm:$0xff]   ;;  %v11359_v52 = vld [vmem:[#allocation7 + $0xfa0] ss:$16 sps:$4 sm:$0xff]  }
 0x390   :  { %4206 = vmatprep.subr.bf16.mxu0 %v11274_v54  ;;  %v11365_v54 = vld [vmem:[#allocation7 + $0xf80] ss:$16 sps:$4 sm:$0xff]  }
 0x392   :  { %3354 = vmatpush1.bf16.msra.mxu1 %v11224_v47  ;;  %v11343_v47 = vld [vmem:[#allocation7 + $0xe04] ss:$16 sps:$4 sm:$0xff]  }
 0x393   :  { %3355 = vmatprep.subr.bf16.mxu1 %v11229_v49  ;;  %4207 = vmatpush1.bf16.msra.mxu0 %v11272_v55  ;;  %v11349_v49 = vld [vmem:[#allocation7 + $0xfe4] ss:$16 sps:$4 sm:$0xff]   ;;  %v11371_v55 = vld [vmem:[#allocation7 + $0xf60] ss:$16 sps:$4 sm:$0xff]  }
 0x394   :  { %4208 = vmatprep.subr.bf16.mxu0 %v11277_v58  ;;  %v11379_v58 = vld [vmem:[#allocation7 + $0xf44] ss:$16 sps:$4 sm:$0xff]  }
 0x396   :  { %3356 = vmatpush2.bf16.msra.mxu1 %v11227_v51  ;;  %v11355_v51 = vld [vmem:[#allocation7 + $0xfc4] ss:$16 sps:$4 sm:$0xff]  }
 0x397   :  { %3357 = vmatprep.subr.bf16.mxu1 %v11232_v53  ;;  %4209 = vmatpush2.bf16.msra.mxu0 %v11275_v60  ;;  %v11361_v53 = vld [vmem:[#allocation7 + $0xfa4] ss:$16 sps:$4 sm:$0xff]  }
 0x398   :  { %4210 = vmatprep.subr.bf16.mxu0 %v11280_v63  ;;  %v11385_v63 = vld [vmem:[#allocation7 + $0xf24] ss:$16 sps:$4 sm:$0xff]  }
 0x39a   :  { %3358 = vmatpush2.bf16.msra.mxu1 %v11230_v40  ;;  %v11367_v40 = vld [vmem:[#allocation7 + $0xf84] ss:$16 sps:$4 sm:$0xff]  }
 0x39b   :  { %3359 = vmatprep.subr.bf16.mxu1 %v11235_v56  ;;  %4211 = vmatpush2.bf16.msra.mxu0 %v11278_v9  ;;  %v11373_v56 = vld [vmem:[#allocation7 + $0xf64] ss:$16 sps:$4 sm:$0xff]  }
 0x39c   :  { %4212 = vmatprep.subr.bf16.mxu0 %v11283_v12  ;;  %v11391_v12 = vld [vmem:[#allocation7 + $0xf04] ss:$16 sps:$4 sm:$0xff]  }
 0x39e   :  { %3360 = vmatpush2.bf16.msra.mxu1 %v11233_v59  ;;  %v11377_v59 = vld [vmem:[#allocation7 + $0xf40] ss:$16 sps:$4 sm:$0xff]  }
 0x39f   :  { %3361 = vmatprep.subr.bf16.mxu1 %v11238_v61  ;;  %4213 = vmatpush2.bf16.msra.mxu0 %v11281_v13  ;;  %v11397_v13 = vld [vmem:[#allocation7 + $0xeec] ss:$16 sps:$4 sm:$0xff]  }
 0x3a0   :  { %4214 = vmatprep.subr.bf16.mxu0 %v11286_v62 }
 0x3a2   :  { %3362 = vmatpush2.bf16.msra.mxu1 %v11236_v7  ;;  %v11383_v7 = vld [vmem:[#allocation7 + $0xf20] ss:$16 sps:$4 sm:$0xff]  }
 0x3a3   :  { %3363 = vmatprep.subr.bf16.mxu1 %v11241_v11  ;;  %4215 = vmatpush2.bf16.msra.mxu0 %v11284_v16 }
 0x3a4   :  { %4216 = vmatprep.subr.bf16.mxu0 %v11289_v17 }
 0x3a6   :  { %3364 = vmatpush2.bf16.msra.mxu1 %v11239_v57  ;;  %v11389_v57 = vld [vmem:[#allocation7 + $0xf00] ss:$16 sps:$4 sm:$0xff]  }
 0x3a7   :  { %3365 = vmatprep.subr.bf16.mxu1 %v11244_v14  ;;  %4217 = vmatpush2.bf16.msra.mxu0 %v11287_v19  ;;  %v12738_v14 = vld [vmem:[#allocation9 + $0x8] sm:$0xf] }
 0x3a8   :  { %4218 = vmatprep.subr.bf16.mxu0 %v11292_v21  ;;  %v3199_v62 = vrot.slane %v12738_v14, %v12656_v3 }
 0x3aa   :  { %3366 = vmatpush2.bf16.msra.mxu1 %v11242_v15  ;;  %v3203_v15 = vrot.slane %v12738_v14, %v12659_v4 }
 0x3ab   :  { %3367 = vmatprep.subr.bf16.mxu1 %v11247_v10  ;;  %4219 = vmatpush2.bf16.msra.mxu0 %v11290_v23 }
 0x3ac   :  { %4220 = vmatprep.subr.bf16.mxu0 %v11295_v24 }
 0x3ae   :  { %3368 = vmatpush2.bf16.msra.mxu1 %v11245_v18 }
 0x3af   :  { %3369 = vmatprep.subr.bf16.mxu1 %v11250_v20  ;;  %4221 = vmatpush2.bf16.msra.mxu0 %v11293_v25 }
 0x3b0   :  { %4222 = vmatprep.subr.bf16.mxu0 %v11298_v28 }
 0x3b2   :  { %3370 = vmatpush2.bf16.msra.mxu1 %v11248_v0 }
 0x3b3   :  { %4223 = vmatpush2.bf16.msra.mxu0 %v11296_v29  ;;  %4233 = vmatprep.subr.bf16.mxu1 %v11301_v31 }
 0x3b4   :  { %4274 = vmatprep.subr.bf16.mxu0 %v11304_v22 }
 0x3b5   :  { %3372 = vmatmul.mubr.bf16.vlgmr.msra.gmra.mxu1 %v12733_v8  ;;  %v11311_v8 = vld [vmem:[#allocation7 + $0xea0] ss:$16 sps:$4 sm:$0xff]  }
 0x3b6   :  { %4234 = vmatpush1.bf16.msra.mxu1 %v11299_v30 }
 0x3b7   :  { %4235 = vmatprep.subr.bf16.mxu1 %v11307_v33 }
 0x3ba   :  { %4236 = vmatpush1.bf16.msra.mxu1 %v11305_v32 }
 0x3bb   :  { %4237 = vmatprep.subr.bf16.mxu1 %v11313_v34  ;;  %v11302_v34 = vld [vmem:[#allocation7 + $0xce8] ss:$16 sps:$4 sm:$0xff]  }
 0x3be   :  { %4238 = vmatpush1.bf16.msra.mxu1 %v11311_v8 }
 0x3bf   :  { %4239 = vmatprep.subr.bf16.mxu1 %v11319_v36  ;;  %v11310_v36 = vld [vmem:[#allocation7 + $0xccc] ss:$16 sps:$4 sm:$0xff]  }
 0x3c2   :  { %4240 = vmatpush1.bf16.msra.mxu1 %v11317_v35 }
 0x3c3   :  { %4241 = vmatprep.subr.bf16.mxu1 %v11325_v38  ;;  %v11316_v38 = vld [vmem:[#allocation7 + $0xcac] ss:$16 sps:$4 sm:$0xff]  }
 0x3c6   :  { %4242 = vmatpush1.bf16.msra.mxu1 %v11323_v37  ;;  %v11308_v37 = vld [vmem:[#allocation7 + $0xcc8] ss:$16 sps:$4 sm:$0xff]  }
 0x3c7   :  { %4243 = vmatprep.subr.bf16.mxu1 %v11331_v43  ;;  %v11322_v43 = vld [vmem:[#allocation7 + $0xc8c] ss:$16 sps:$4 sm:$0xff]  }
 0x3ca   :  { %4244 = vmatpush1.bf16.msra.mxu1 %v11329_v39  ;;  %v11314_v39 = vld [vmem:[#allocation7 + $0xca8] ss:$16 sps:$4 sm:$0xff]  }
 0x3cb   :  { %4245 = vmatprep.subr.bf16.mxu1 %v11337_v45  ;;  %v11328_v45 = vld [vmem:[#allocation7 + $0xc6c] ss:$16 sps:$4 sm:$0xff]  }
 0x3ce   :  { %4246 = vmatpush1.bf16.msra.mxu1 %v11335_v44  ;;  %v11320_v44 = vld [vmem:[#allocation7 + $0xc88] ss:$16 sps:$4 sm:$0xff]  }
 0x3cf   :  { %4247 = vmatprep.subr.bf16.mxu1 %v11343_v47  ;;  %v11334_v47 = vld [vmem:[#allocation7 + $0xc4c] ss:$16 sps:$4 sm:$0xff]  }
 0x3d2   :  { %4248 = vmatpush1.bf16.msra.mxu1 %v11341_v46  ;;  %v11326_v46 = vld [vmem:[#allocation7 + $0xc68] ss:$16 sps:$4 sm:$0xff]  }
 0x3d3   :  { %4249 = vmatprep.subr.bf16.mxu1 %v11349_v49  ;;  %v11340_v49 = vld [vmem:[#allocation7 + $0xc2c] ss:$16 sps:$4 sm:$0xff]  }
 0x3d6   :  { %4250 = vmatpush2.bf16.msra.mxu1 %v11347_v48  ;;  %v11332_v48 = vld [vmem:[#allocation7 + $0xc48] ss:$16 sps:$4 sm:$0xff]  }
 0x3d7   :  { %4251 = vmatprep.subr.bf16.mxu1 %v11355_v51  ;;  %v11346_v51 = vld [vmem:[#allocation7 + $0xc0c] ss:$16 sps:$4 sm:$0xff]  }
 0x3da   :  { %4252 = vmatpush2.bf16.msra.mxu1 %v11353_v50  ;;  %v11338_v50 = vld [vmem:[#allocation7 + $0xc28] ss:$16 sps:$4 sm:$0xff]  }
 0x3db   :  { %4253 = vmatprep.subr.bf16.mxu1 %v11361_v53  ;;  %v11352_v53 = vld [vmem:[#allocation7 + $0xdec] ss:$16 sps:$4 sm:$0xff]  }
 0x3de   :  { %4254 = vmatpush2.bf16.msra.mxu1 %v11359_v52  ;;  %v11344_v52 = vld [vmem:[#allocation7 + $0xc08] ss:$16 sps:$4 sm:$0xff]  }
 0x3df   :  { %4255 = vmatprep.subr.bf16.mxu1 %v11367_v40  ;;  %v11358_v40 = vld [vmem:[#allocation7 + $0xdcc] ss:$16 sps:$4 sm:$0xff]  }
 0x3e2   :  { %4256 = vmatpush2.bf16.msra.mxu1 %v11365_v54  ;;  %v11350_v54 = vld [vmem:[#allocation7 + $0xde8] ss:$16 sps:$4 sm:$0xff]  }
 0x3e3   :  { %4257 = vmatprep.subr.bf16.mxu1 %v11373_v56  ;;  %v11364_v56 = vld [vmem:[#allocation7 + $0xdac] ss:$16 sps:$4 sm:$0xff]  }
 0x3e6   :  { %4258 = vmatpush2.bf16.msra.mxu1 %v11371_v55  ;;  %v11356_v55 = vld [vmem:[#allocation7 + $0xdc8] ss:$16 sps:$4 sm:$0xff]  }
 0x3e7   :  { %4259 = vmatprep.subr.bf16.mxu1 %v11379_v58  ;;  %v11362_v58 = vld [vmem:[#allocation7 + $0xda8] ss:$16 sps:$4 sm:$0xff]  }
 0x3ea   :  { %4260 = vmatpush2.bf16.msra.mxu1 %v11377_v59  ;;  %v11370_v59 = vld [vmem:[#allocation7 + $0xd8c] ss:$16 sps:$4 sm:$0xff]  }
 0x3eb   :  { %4261 = vmatprep.subr.bf16.mxu1 %v11385_v63  ;;  %v11374_v63 = vld [vmem:[#allocation7 + $0xd68] ss:$16 sps:$4 sm:$0xff]  }
 0x3ee   :  { %4262 = vmatpush2.bf16.msra.mxu1 %v11383_v7  ;;  %v3207_v7 = vrot.slane %v12738_v14, %v12662_v5 }
 0x3ef   :  { %4263 = vmatprep.subr.bf16.mxu1 %v11391_v12  ;;  %v11380_v12 = vld [vmem:[#allocation7 + $0xd48] ss:$16 sps:$4 sm:$0xff]  }
 0x3f2   :  { %4264 = vmatpush2.bf16.msra.mxu1 %v11389_v57 }
 0x3f3   :  { %4315 = vmatprep.subr.bf16.mxu1 %v11397_v13  ;;  %v11388_v13 = vld [vmem:[#allocation7 + $0xd2c] ss:$16 sps:$4 sm:$0xff]  }
 0x3f5   :  { %v3250_v60 = vpop.f32.mrf.mxu0 }
 0x3f6   :  { %v3251_v16 = vadd.f32 %v3250_v60, %v3199_v62  ;;  %v11368_v60 = vld [vmem:[#allocation7 + $0xd88] ss:$16 sps:$4 sm:$0xff]  }
 0x3f7   :  { %v3252_v61 = vpop.f32.mrf.mxu0 }
 0x3f8   :  { %v3253_v18 = vadd.f32 %v3252_v61, %v3203_v15  ;;  %v11376_v61 = vld [vmem:[#allocation7 + $0xd6c] ss:$16 sps:$4 sm:$0xff]  }
 0x3f9   :  { %v3254_v9 = vpop.f32.mrf.mxu0 }
 0x3fa   :  { %v11382_v9 = vld [vmem:[#allocation7 + $0xd4c] ss:$16 sps:$4 sm:$0xff]  }
 0x3fb   :  { %v3255_v11 = vpop.f32.mrf.mxu0 }
 0x3fc   :  { %v3211_v11 = vrot.slane %v12738_v14, %v12665_v6 }
 0x435   :  { %v3291_v10 = vpop.f32.mrf.mxu1  ;;  %v12744_v17 = vpop.f32.mrf.mxu0 }
 0x436   :  { %v3292_v19 = vadd.f32 %v3291_v10, %v3251_v16  ;;  %v3333_v57 = vadd.f32 %v12744_v17, %v3207_v7  ;;  %v11392_v17 = vld [vmem:[#allocation7 + $0xd08] ss:$16 sps:$4 sm:$0xff]   ;;  %v11461_v7 = vld [vmem:[#allocation7 + $0x1020] ss:$16 sps:$4 sm:$0xff]  }
 0x437   :  { %v3293_v20 = vpop.f32.mrf.mxu1  ;;  %v12746_v0 = vpop.f32.mrf.mxu0 }
 0x438   :  { %vm3380_vm10 = vcmp.ge.f32.partialorder %v3292_v19, 0.0  ;;  %v3384_v21 = vmul.f32 0.2, %v3292_v19  ;;  %v3294_v23 = vadd.f32 %v3293_v20, %v3253_v18  ;;  %v3335_v15 = vadd.f32 %v12746_v0, %v3211_v11  ;;  %v11386_v18 = vld [vmem:[#allocation7 + $0xd28] ss:$16 sps:$4 sm:$0xff]  }
 0x439   :  { %v3295_v24 = vpop.f32.mrf.mxu1  ;;  %v3336_v25 = vpop.f32.mrf.mxu0  ;;  %v11466_v11 = vld [vmem:[#allocation7 + $0x1004] ss:$16 sps:$4 sm:$0xff]  }
 0x43a   :  { %v3388_v28 = vsel %vm3380_vm10, %v3292_v19, %v3384_v21  ;;  %vm3381_vm11 = vcmp.ge.f32.partialorder %v3294_v23, 0.0  ;;  %v3385_v29 = vmul.f32 0.2, %v3294_v23  ;;  %v11394_v21 = vld [vmem:[#allocation7 + $0xd0c] ss:$16 sps:$4 sm:$0xff]  }
 0x43b   :  { %v3296_v30 = vpop.f32.mrf.mxu1  ;;  %v3337_v31 = vpop.f32.mrf.mxu0  ;;  %v3392_v22 = vmul.f32 1.4142135, %v3388_v28 }
 0x43c   :  { %v3389_v32 = vsel %vm3381_vm11, %v3294_v23, %v3385_v29  ;;  %v11395_v31 = vld [vmem:[#allocation7 + $0xee8] ss:$16 sps:$4 sm:$0xff]  }
 0x43d   :  { %v3393_v33 = vmul.f32 1.4142135, %v3389_v32  ;;  %v12748_v35 = vpack.c.bf16 %v3392_v22, %v3392_v22  ;;  %v11400_v32 = vld [vmem:[#allocation7 + $0xecc] ss:$16 sps:$4 sm:$0xff]  }
 0x43f   :  { %v3397_v8 = vpack.c.bf16 %v3393_v33, %v3393_v33  ;;  %v11398_v33 = vld [vmem:[#allocation7 + $0xec8] ss:$16 sps:$4 sm:$0xff]  }
 0x441   :  { %4224 = vmatprep.mubr.bf16.mxu0 %v3397_v8 }
 0x442   :  { %4225 = vmatmul.mubr.bf16.vlgmr.msra.gmra.mxu0 %v12748_v35 }
 0x443   :  { %4275 = vmatpush1.bf16.msra.mxu0 %v11302_v34  ;;  %4306 = vmatprep.mubr.bf16.mxu0 %v3397_v8  ;;  %v11403_v8 = vld [vmem:[#allocation7 + $0xeac] ss:$16 sps:$4 sm:$0xff]   ;;  %v11401_v34 = vld [vmem:[#allocation7 + $0xea8] ss:$16 sps:$4 sm:$0xff]  }
 0x444   :  { %4276 = vmatprep.subr.bf16.mxu0 %v11310_v36  ;;  %v11406_v36 = vld [vmem:[#allocation7 + $0xe8c] ss:$16 sps:$4 sm:$0xff]  }
 0x447   :  { %4277 = vmatpush1.bf16.msra.mxu0 %v11308_v37  ;;  %v11443_v37 = vld [vmem:[#allocation7 + $0x10e0] ss:$16 sps:$4 sm:$0xff]  }
 0x448   :  { %4278 = vmatprep.subr.bf16.mxu0 %v11316_v38  ;;  %v11445_v38 = vld [vmem:[#allocation7 + $0x10e4] ss:$16 sps:$4 sm:$0xff]  }
 0x44b   :  { %4279 = vmatpush1.bf16.msra.mxu0 %v11314_v39  ;;  %v11448_v39 = vld [vmem:[#allocation7 + $0x10c4] ss:$16 sps:$4 sm:$0xff]  }
 0x44c   :  { %4280 = vmatprep.subr.bf16.mxu0 %v11322_v43  ;;  %v11404_v43 = vld [vmem:[#allocation7 + $0xe88] ss:$16 sps:$4 sm:$0xff]  }
 0x44f   :  { %4281 = vmatpush1.bf16.msra.mxu0 %v11320_v44  ;;  %v11446_v44 = vld [vmem:[#allocation7 + $0x10c0] ss:$16 sps:$4 sm:$0xff]  }
 0x450   :  { %4282 = vmatprep.subr.bf16.mxu0 %v11328_v45  ;;  %v11409_v45 = vld [vmem:[#allocation7 + $0xe6c] ss:$16 sps:$4 sm:$0xff]  }
 0x453   :  { %4283 = vmatpush1.bf16.msra.mxu0 %v11326_v46  ;;  %v11407_v46 = vld [vmem:[#allocation7 + $0xe68] ss:$16 sps:$4 sm:$0xff]  }
 0x454   :  { %4284 = vmatprep.subr.bf16.mxu0 %v11334_v47  ;;  %v11449_v47 = vld [vmem:[#allocation7 + $0x10a0] ss:$16 sps:$4 sm:$0xff]  }
 0x457   :  { %4285 = vmatpush1.bf16.msra.mxu0 %v11332_v48  ;;  %v11412_v48 = vld [vmem:[#allocation7 + $0xe4c] ss:$16 sps:$4 sm:$0xff]  }
 0x458   :  { %4286 = vmatprep.subr.bf16.mxu0 %v11340_v49  ;;  %v11454_v49 = vld [vmem:[#allocation7 + $0x1084] ss:$16 sps:$4 sm:$0xff]  }
 0x45b   :  { %4287 = vmatpush1.bf16.msra.mxu0 %v11338_v50  ;;  %v11410_v50 = vld [vmem:[#allocation7 + $0xe48] ss:$16 sps:$4 sm:$0xff]  }
 0x45c   :  { %4288 = vmatprep.subr.bf16.mxu0 %v11346_v51  ;;  %v11452_v51 = vld [vmem:[#allocation7 + $0x1080] ss:$16 sps:$4 sm:$0xff]  }
 0x45f   :  { %4289 = vmatpush1.bf16.msra.mxu0 %v11344_v52  ;;  %v11415_v52 = vld [vmem:[#allocation7 + $0xe2c] ss:$16 sps:$4 sm:$0xff]  }
 0x460   :  { %4290 = vmatprep.subr.bf16.mxu0 %v11352_v53  ;;  %v11457_v53 = vld [vmem:[#allocation7 + $0x1064] ss:$16 sps:$4 sm:$0xff]  }
 0x463   :  { %4291 = vmatpush2.bf16.msra.mxu0 %v11350_v54  ;;  %v11413_v54 = vld [vmem:[#allocation7 + $0xe28] ss:$16 sps:$4 sm:$0xff]  }
 0x464   :  { %4292 = vmatprep.subr.bf16.mxu0 %v11358_v40  ;;  %v11455_v40 = vld [vmem:[#allocation7 + $0x1060] ss:$16 sps:$4 sm:$0xff]  }
 0x467   :  { %4293 = vmatpush2.bf16.msra.mxu0 %v11356_v55  ;;  %v11418_v55 = vld [vmem:[#allocation7 + $0xe0c] ss:$16 sps:$4 sm:$0xff]  }
 0x468   :  { %4294 = vmatprep.subr.bf16.mxu0 %v11364_v56  ;;  %v11460_v56 = vld [vmem:[#allocation7 + $0x1044] ss:$16 sps:$4 sm:$0xff]  }
 0x46b   :  { %4295 = vmatpush2.bf16.msra.mxu0 %v11362_v58  ;;  %v11416_v58 = vld [vmem:[#allocation7 + $0xe08] ss:$16 sps:$4 sm:$0xff]  }
 0x46c   :  { %4296 = vmatprep.subr.bf16.mxu0 %v11370_v59  ;;  %v11458_v59 = vld [vmem:[#allocation7 + $0x1040] ss:$16 sps:$4 sm:$0xff]  }
 0x46f   :  { %4297 = vmatpush2.bf16.msra.mxu0 %v11368_v60  ;;  %v11421_v60 = vld [vmem:[#allocation7 + $0xfec] ss:$16 sps:$4 sm:$0xff]  }
 0x470   :  { %4298 = vmatprep.subr.bf16.mxu0 %v11376_v61  ;;  %v11463_v61 = vld [vmem:[#allocation7 + $0x1024] ss:$16 sps:$4 sm:$0xff]  }
 0x473   :  { %4299 = vmatpush2.bf16.msra.mxu0 %v11374_v63  ;;  %v11419_v63 = vld [vmem:[#allocation7 + $0xfe8] ss:$16 sps:$4 sm:$0xff]  }
 0x474   :  { %4300 = vmatprep.subr.bf16.mxu0 %v11382_v9  ;;  %v11424_v9 = vld [vmem:[#allocation7 + $0xfcc] ss:$16 sps:$4 sm:$0xff]  }
 0x475   :  { %v3373_v62 = vpop.f32.mrf.mxu1 }
 0x476   :  { %v3374_v16 = vadd.f32 %v3373_v62, %v3333_v57  ;;  %v11464_v57 = vld [vmem:[#allocation7 + $0x1000] ss:$16 sps:$4 sm:$0xff]   ;;  %v11469_v62 = vld [vmem:[#allocation7 + $0x11e4] ss:$16 sps:$4 sm:$0xff]  }
 0x477   :  { %v3375_v10 = vpop.f32.mrf.mxu1  ;;  %4301 = vmatpush2.bf16.msra.mxu0 %v11380_v12  ;;  %v11422_v12 = vld [vmem:[#allocation7 + $0xfc8] ss:$16 sps:$4 sm:$0xff]  }
 0x478   :  { %vm3382_vm12 = vcmp.ge.f32.partialorder %v3374_v16, 0.0  ;;  %v3386_v19 = vmul.f32 0.2, %v3374_v16  ;;  %v3376_v20 = vadd.f32 %v3375_v10, %v3335_v15  ;;  %4302 = vmatprep.subr.bf16.mxu0 %v11388_v13  ;;  %v11427_v13 = vld [vmem:[#allocation7 + $0xfac] ss:$16 sps:$4 sm:$0xff]  }
 0x479   :  { %v3377_v23 = vpop.f32.mrf.mxu1  ;;  %v11425_v15 = vld [vmem:[#allocation7 + $0xfa8] ss:$16 sps:$4 sm:$0xff]   ;;  %v11430_v10 = vld [vmem:[#allocation7 + $0xf8c] ss:$16 sps:$4 sm:$0xff]  }
 0x47a   :  { %v3390_v14 = vsel %vm3382_vm12, %v3374_v16, %v3386_v19  ;;  %vm3383_vm13 = vcmp.ge.f32.partialorder %v3376_v20, 0.0  ;;  %v3387_v24 = vmul.f32 0.2, %v3376_v20  ;;  %v11467_v16 = vld [vmem:[#allocation7 + $0x11e0] ss:$16 sps:$4 sm:$0xff]  }
 0x47b   :  { %v3378_v25 = vpop.f32.mrf.mxu1  ;;  %4303 = vmatpush2.bf16.msra.mxu0 %v11386_v18  ;;  %v3394_v28 = vmul.f32 1.4142135, %v3390_v14  ;;  %v11472_v18 = vld [vmem:[#allocation7 + $0x11c4] ss:$16 sps:$4 sm:$0xff]   ;;  %v11428_v19 = vld [vmem:[#allocation7 + $0xf88] ss:$16 sps:$4 sm:$0xff]  }
 0x47c   :  { %4304 = vmatprep.subr.bf16.mxu0 %v11394_v21  ;;  %v3391_v29 = vsel %vm3383_vm13, %v3376_v20, %v3387_v24  ;;  %v11470_v20 = vld [vmem:[#allocation7 + $0x11c0] ss:$16 sps:$4 sm:$0xff]   ;;  %v11433_v21 = vld [vmem:[#allocation7 + $0xf6c] ss:$16 sps:$4 sm:$0xff]   ;;  %v11475_v23 = vld [vmem:[#allocation7 + $0x11a4] ss:$16 sps:$4 sm:$0xff]  }
 0x47d   :  { %v3395_v0 = vmul.f32 1.4142135, %v3391_v29  ;;  %v12757_v22 = vpack.c.bf16 %v3394_v28, %v3394_v28  ;;  %v11431_v14 = vld [vmem:[#allocation7 + $0xf68] ss:$16 sps:$4 sm:$0xff]   ;;  %v11473_v24 = vld [vmem:[#allocation7 + $0x11a0] ss:$16 sps:$4 sm:$0xff]  }
 0x47e   :  { %v11436_v25 = vld [vmem:[#allocation7 + $0xf4c] ss:$16 sps:$4 sm:$0xff]   ;;  %v11434_v28 = vld [vmem:[#allocation7 + $0xf48] ss:$16 sps:$4 sm:$0xff]   ;;  %v11476_v29 = vld [vmem:[#allocation7 + $0x1180] ss:$16 sps:$4 sm:$0xff]  }
 0x47f   :  { %4305 = vmatpush2.bf16.msra.mxu0 %v11392_v17  ;;  %v3399_v30 = vpack.c.bf16 %v3395_v0, %v3395_v0  ;;  %v11478_v17 = vld [vmem:[#allocation7 + $0x1184] ss:$16 sps:$4 sm:$0xff]   ;;  %v11439_v0 = vld [vmem:[#allocation7 + $0xf2c] ss:$16 sps:$4 sm:$0xff]  }
 0x480   :  { %5168 = vmatprep.subr.bf16.mxu0 %v11445_v38  ;;  %v11485_v38 = vld [vmem:[#allocation7 + $0x1120] ss:$16 sps:$4 sm:$0xff]  }
 0x481   :  { %4265 = vmatprep.mubr.bf16.mxu1 %v3399_v30 }
 0x482   :  { %4266 = vmatmul.mubr.bf16.vlgmr.msra.gmra.mxu1 %v12757_v22  ;;  %4307 = vmatmul.mubr.bf16.vlgmr.msra.gmra.mxu0 %v12748_v35  ;;  %v11451_v35 = vld [vmem:[#allocation7 + $0x10a4] ss:$16 sps:$4 sm:$0xff]  }
 0x483   :  { %4316 = vmatpush1.bf16.msra.mxu1 %v11395_v31  ;;  %4347 = vmatprep.mubr.bf16.mxu1 %v3399_v30  ;;  %v11481_v30 = vld [vmem:[#allocation7 + $0x1164] ss:$16 sps:$4 sm:$0xff]   ;;  %v11437_v31 = vld [vmem:[#allocation7 + $0xf28] ss:$16 sps:$4 sm:$0xff]  }
 0x484   :  { %4317 = vmatprep.subr.bf16.mxu1 %v11400_v32  ;;  %5169 = vmatpush1.bf16.msra.mxu0 %v11443_v37  ;;  %v11479_v32 = vld [vmem:[#allocation7 + $0x1160] ss:$16 sps:$4 sm:$0xff]   ;;  %v11487_v37 = vld [vmem:[#allocation7 + $0x1124] ss:$16 sps:$4 sm:$0xff]  }
 0x485   :  { %5170 = vmatprep.subr.bf16.mxu0 %v11448_v39  ;;  %v11490_v39 = vld [vmem:[#allocation7 + $0x1104] ss:$16 sps:$4 sm:$0xff]  }
 0x487   :  { %4318 = vmatpush1.bf16.msra.mxu1 %v11398_v33  ;;  %v11442_v33 = vld [vmem:[#allocation7 + $0xf0c] ss:$16 sps:$4 sm:$0xff]  }
 0x488   :  { %4319 = vmatprep.subr.bf16.mxu1 %v11403_v8  ;;  %5171 = vmatpush1.bf16.msra.mxu0 %v11446_v44  ;;  %v11440_v8 = vld [vmem:[#allocation7 + $0xf08] ss:$16 sps:$4 sm:$0xff]   ;;  %v11491_v44 = vld [vmem:[#allocation7 + $0x12e0] ss:$16 sps:$4 sm:$0xff]  }
 0x489   :  { %5172 = vmatprep.subr.bf16.mxu0 %v11451_v35  ;;  %v11496_v35 = vld [vmem:[#allocation7 + $0x10ec] ss:$16 sps:$4 sm:$0xff]  }
 0x48b   :  { %4320 = vmatpush1.bf16.msra.mxu1 %v11401_v34  ;;  %v11484_v34 = vld [vmem:[#allocation7 + $0x1144] ss:$16 sps:$4 sm:$0xff]  }
 0x48c   :  { %4321 = vmatprep.subr.bf16.mxu1 %v11406_v36  ;;  %5173 = vmatpush1.bf16.msra.mxu0 %v11449_v47  ;;  %v11482_v36 = vld [vmem:[#allocation7 + $0x1140] ss:$16 sps:$4 sm:$0xff]   ;;  %v11499_v47 = vld [vmem:[#allocation7 + $0x12c4] ss:$16 sps:$4 sm:$0xff]  }
 0x48d   :  { %5174 = vmatprep.subr.bf16.mxu0 %v11454_v49  ;;  %v11509_v49 = vld [vmem:[#allocation7 + $0x1280] ss:$16 sps:$4 sm:$0xff]  }
 0x48f   :  { %4322 = vmatpush1.bf16.msra.mxu1 %v11404_v43  ;;  %v11488_v43 = vld [vmem:[#allocation7 + $0x1100] ss:$16 sps:$4 sm:$0xff]  }
 0x490   :  { %4323 = vmatprep.subr.bf16.mxu1 %v11409_v45  ;;  %5175 = vmatpush1.bf16.msra.mxu0 %v11452_v51  ;;  %v11493_v45 = vld [vmem:[#allocation7 + $0x12e4] ss:$16 sps:$4 sm:$0xff]   ;;  %v11515_v51 = vld [vmem:[#allocation7 + $0x1260] ss:$16 sps:$4 sm:$0xff]  }
 0x491   :  { %5176 = vmatprep.subr.bf16.mxu0 %v11457_v53  ;;  %v11521_v53 = vld [vmem:[#allocation7 + $0x1240] ss:$16 sps:$4 sm:$0xff]  }
 0x493   :  { %4324 = vmatpush1.bf16.msra.mxu1 %v11407_v46  ;;  %v11497_v46 = vld [vmem:[#allocation7 + $0x12c0] ss:$16 sps:$4 sm:$0xff]  }
 0x494   :  { %4325 = vmatprep.subr.bf16.mxu1 %v11412_v48  ;;  %5177 = vmatpush1.bf16.msra.mxu0 %v11455_v40  ;;  %v11505_v48 = vld [vmem:[#allocation7 + $0x12a4] ss:$16 sps:$4 sm:$0xff]   ;;  %v11527_v40 = vld [vmem:[#allocation7 + $0x1220] ss:$16 sps:$4 sm:$0xff]  }
 0x495   :  { %5178 = vmatprep.subr.bf16.mxu0 %v11460_v56  ;;  %v11533_v56 = vld [vmem:[#allocation7 + $0x1200] ss:$16 sps:$4 sm:$0xff]  }
 0x497   :  { %4326 = vmatpush1.bf16.msra.mxu1 %v11410_v50  ;;  %v11511_v50 = vld [vmem:[#allocation7 + $0x1284] ss:$16 sps:$4 sm:$0xff]  }
 0x498   :  { %4327 = vmatprep.subr.bf16.mxu1 %v11415_v52  ;;  %5179 = vmatpush1.bf16.msra.mxu0 %v11458_v59  ;;  %v11517_v52 = vld [vmem:[#allocation7 + $0x1264] ss:$16 sps:$4 sm:$0xff]   ;;  %v11539_v59 = vld [vmem:[#allocation7 + $0x13e0] ss:$16 sps:$4 sm:$0xff]  }
 0x499   :  { %5180 = vmatprep.subr.bf16.mxu0 %v11463_v61  ;;  %v11545_v61 = vld [vmem:[#allocation7 + $0x13c0] ss:$16 sps:$4 sm:$0xff]  }
 0x49b   :  { %4328 = vmatpush1.bf16.msra.mxu1 %v11413_v54  ;;  %v11523_v54 = vld [vmem:[#allocation7 + $0x1244] ss:$16 sps:$4 sm:$0xff]  }
 0x49c   :  { %4329 = vmatprep.subr.bf16.mxu1 %v11418_v55  ;;  %5181 = vmatpush1.bf16.msra.mxu0 %v11461_v7  ;;  %v11529_v55 = vld [vmem:[#allocation7 + $0x1224] ss:$16 sps:$4 sm:$0xff]   ;;  %v11551_v7 = vld [vmem:[#allocation7 + $0x13a0] ss:$16 sps:$4 sm:$0xff]  }
 0x49d   :  { %5182 = vmatprep.subr.bf16.mxu0 %v11466_v11  ;;  %v11557_v11 = vld [vmem:[#allocation7 + $0x1380] ss:$16 sps:$4 sm:$0xff]  }
 0x49f   :  { %4330 = vmatpush1.bf16.msra.mxu1 %v11416_v58  ;;  %v11535_v58 = vld [vmem:[#allocation7 + $0x1204] ss:$16 sps:$4 sm:$0xff]  }
 0x4a0   :  { %4331 = vmatprep.subr.bf16.mxu1 %v11421_v60  ;;  %5183 = vmatpush1.bf16.msra.mxu0 %v11464_v57  ;;  %v11541_v60 = vld [vmem:[#allocation7 + $0x13e4] ss:$16 sps:$4 sm:$0xff]   ;;  %v11563_v57 = vld [vmem:[#allocation7 + $0x1360] ss:$16 sps:$4 sm:$0xff]  }
 0x4a1   :  { %5184 = vmatprep.subr.bf16.mxu0 %v11469_v62  ;;  %v11571_v62 = vld [vmem:[#allocation7 + $0x1344] ss:$16 sps:$4 sm:$0xff]  }
 0x4a3   :  { %4332 = vmatpush2.bf16.msra.mxu1 %v11419_v63  ;;  %v11547_v63 = vld [vmem:[#allocation7 + $0x13c4] ss:$16 sps:$4 sm:$0xff]  }
 0x4a4   :  { %4333 = vmatprep.subr.bf16.mxu1 %v11424_v9  ;;  %5185 = vmatpush2.bf16.msra.mxu0 %v11467_v16  ;;  %v11553_v9 = vld [vmem:[#allocation7 + $0x13a4] ss:$16 sps:$4 sm:$0xff]  }
 0x4a5   :  { %5186 = vmatprep.subr.bf16.mxu0 %v11472_v18  ;;  %v11577_v18 = vld [vmem:[#allocation7 + $0x1324] ss:$16 sps:$4 sm:$0xff]  }
 0x4a7   :  { %4334 = vmatpush2.bf16.msra.mxu1 %v11422_v12  ;;  %v11559_v12 = vld [vmem:[#allocation7 + $0x1384] ss:$16 sps:$4 sm:$0xff]  }
 0x4a8   :  { %4335 = vmatprep.subr.bf16.mxu1 %v11427_v13  ;;  %5187 = vmatpush2.bf16.msra.mxu0 %v11470_v20  ;;  %v11565_v13 = vld [vmem:[#allocation7 + $0x1364] ss:$16 sps:$4 sm:$0xff]  }
 0x4a9   :  { %5188 = vmatprep.subr.bf16.mxu0 %v11475_v23  ;;  %v11583_v23 = vld [vmem:[#allocation7 + $0x1304] ss:$16 sps:$4 sm:$0xff]  }
 0x4ab   :  { %4336 = vmatpush2.bf16.msra.mxu1 %v11425_v15  ;;  %v11569_v15 = vld [vmem:[#allocation7 + $0x1340] ss:$16 sps:$4 sm:$0xff]  }
 0x4ac   :  { %4337 = vmatprep.subr.bf16.mxu1 %v11430_v10  ;;  %5189 = vmatpush2.bf16.msra.mxu0 %v11473_v24  ;;  %v11589_v24 = vld [vmem:[#allocation7 + $0x12ec] ss:$16 sps:$4 sm:$0xff]  }
 0x4ad   :  { %5190 = vmatprep.subr.bf16.mxu0 %v11478_v17 }
 0x4af   :  { %4338 = vmatpush2.bf16.msra.mxu1 %v11428_v19  ;;  %v11575_v19 = vld [vmem:[#allocation7 + $0x1320] ss:$16 sps:$4 sm:$0xff]  }
 0x4b0   :  { %4339 = vmatprep.subr.bf16.mxu1 %v11433_v21  ;;  %5191 = vmatpush2.bf16.msra.mxu0 %v11476_v29 }
 0x4b1   :  { %5192 = vmatprep.subr.bf16.mxu0 %v11481_v30 }
 0x4b3   :  { %4340 = vmatpush2.bf16.msra.mxu1 %v11431_v14  ;;  %v11581_v14 = vld [vmem:[#allocation7 + $0x1300] ss:$16 sps:$4 sm:$0xff]  }
 0x4b4   :  { %4341 = vmatprep.subr.bf16.mxu1 %v11436_v25  ;;  %5193 = vmatpush2.bf16.msra.mxu0 %v11479_v32  ;;  %v12762_v25 = vld [vmem:[#allocation9 + $0xc] sm:$0xf] }
 0x4b5   :  { %5194 = vmatprep.subr.bf16.mxu0 %v11484_v34  ;;  %v4175_v17 = vrot.slane %v12762_v25, %v12656_v3 }
 0x4b7   :  { %4342 = vmatpush2.bf16.msra.mxu1 %v11434_v28  ;;  %v4179_v28 = vrot.slane %v12762_v25, %v12659_v4 }
 0x4b8   :  { %4343 = vmatprep.subr.bf16.mxu1 %v11439_v0  ;;  %5195 = vmatpush2.bf16.msra.mxu0 %v11482_v36 }
 0x4b9   :  { %5196 = vmatprep.subr.bf16.mxu0 %v11487_v37 }
 0x4bb   :  { %4344 = vmatpush2.bf16.msra.mxu1 %v11437_v31 }
 0x4bc   :  { %4345 = vmatprep.subr.bf16.mxu1 %v11442_v33  ;;  %5197 = vmatpush2.bf16.msra.mxu0 %v11485_v38 }
 0x4bd   :  { %5198 = vmatprep.subr.bf16.mxu0 %v11490_v39 }
 0x4bf   :  { %4346 = vmatpush2.bf16.msra.mxu1 %v11440_v8 }
 0x4c0   :  { %5199 = vmatpush2.bf16.msra.mxu0 %v11488_v43  ;;  %5209 = vmatprep.subr.bf16.mxu1 %v11493_v45 }
 0x4c1   :  { %5250 = vmatprep.subr.bf16.mxu0 %v11496_v35 }
 0x4c2   :  { %4348 = vmatmul.mubr.bf16.vlgmr.msra.gmra.mxu1 %v12757_v22  ;;  %v11503_v22 = vld [vmem:[#allocation7 + $0x12a0] ss:$16 sps:$4 sm:$0xff]  }
 0x4c3   :  { %5210 = vmatpush1.bf16.msra.mxu1 %v11491_v44 }
 0x4c4   :  { %5211 = vmatprep.subr.bf16.mxu1 %v11499_v47 }
 0x4c7   :  { %5212 = vmatpush1.bf16.msra.mxu1 %v11497_v46 }
 0x4c8   :  { %5213 = vmatprep.subr.bf16.mxu1 %v11505_v48  ;;  %v11494_v48 = vld [vmem:[#allocation7 + $0x10e8] ss:$16 sps:$4 sm:$0xff]  }
 0x4cb   :  { %5214 = vmatpush1.bf16.msra.mxu1 %v11503_v22 }
 0x4cc   :  { %5215 = vmatprep.subr.bf16.mxu1 %v11511_v50  ;;  %v11502_v50 = vld [vmem:[#allocation7 + $0x10cc] ss:$16 sps:$4 sm:$0xff]  }
 0x4cf   :  { %5216 = vmatpush1.bf16.msra.mxu1 %v11509_v49 }
 0x4d0   :  { %5217 = vmatprep.subr.bf16.mxu1 %v11517_v52  ;;  %v11508_v52 = vld [vmem:[#allocation7 + $0x10ac] ss:$16 sps:$4 sm:$0xff]  }
 0x4d3   :  { %5218 = vmatpush1.bf16.msra.mxu1 %v11515_v51  ;;  %v11500_v51 = vld [vmem:[#allocation7 + $0x10c8] ss:$16 sps:$4 sm:$0xff]  }
 0x4d4   :  { %5219 = vmatprep.subr.bf16.mxu1 %v11523_v54  ;;  %v11514_v54 = vld [vmem:[#allocation7 + $0x108c] ss:$16 sps:$4 sm:$0xff]  }
 0x4d7   :  { %5220 = vmatpush1.bf16.msra.mxu1 %v11521_v53  ;;  %v11506_v53 = vld [vmem:[#allocation7 + $0x10a8] ss:$16 sps:$4 sm:$0xff]  }
 0x4d8   :  { %5221 = vmatprep.subr.bf16.mxu1 %v11529_v55  ;;  %v11520_v55 = vld [vmem:[#allocation7 + $0x106c] ss:$16 sps:$4 sm:$0xff]  }
 0x4db   :  { %5222 = vmatpush1.bf16.msra.mxu1 %v11527_v40  ;;  %v11512_v40 = vld [vmem:[#allocation7 + $0x1088] ss:$16 sps:$4 sm:$0xff]  }
 0x4dc   :  { %5223 = vmatprep.subr.bf16.mxu1 %v11535_v58  ;;  %v11526_v58 = vld [vmem:[#allocation7 + $0x104c] ss:$16 sps:$4 sm:$0xff]  }
 0x4df   :  { %5224 = vmatpush1.bf16.msra.mxu1 %v11533_v56  ;;  %v11518_v56 = vld [vmem:[#allocation7 + $0x1068] ss:$16 sps:$4 sm:$0xff]  }
 0x4e0   :  { %5225 = vmatprep.subr.bf16.mxu1 %v11541_v60  ;;  %v11532_v60 = vld [vmem:[#allocation7 + $0x102c] ss:$16 sps:$4 sm:$0xff]  }
 0x4e3   :  { %5226 = vmatpush2.bf16.msra.mxu1 %v11539_v59  ;;  %v11524_v59 = vld [vmem:[#allocation7 + $0x1048] ss:$16 sps:$4 sm:$0xff]  }
 0x4e4   :  { %5227 = vmatprep.subr.bf16.mxu1 %v11547_v63  ;;  %v11538_v63 = vld [vmem:[#allocation7 + $0x100c] ss:$16 sps:$4 sm:$0xff]  }
 0x4e7   :  { %5228 = vmatpush2.bf16.msra.mxu1 %v11545_v61  ;;  %v11530_v61 = vld [vmem:[#allocation7 + $0x1028] ss:$16 sps:$4 sm:$0xff]  }
 0x4e8   :  { %5229 = vmatprep.subr.bf16.mxu1 %v11553_v9  ;;  %v11544_v9 = vld [vmem:[#allocation7 + $0x11ec] ss:$16 sps:$4 sm:$0xff]  }
 0x4eb   :  { %5230 = vmatpush2.bf16.msra.mxu1 %v11551_v7  ;;  %v11536_v7 = vld [vmem:[#allocation7 + $0x1008] ss:$16 sps:$4 sm:$0xff]  }
 0x4ec   :  { %5231 = vmatprep.subr.bf16.mxu1 %v11559_v12  ;;  %v11550_v12 = vld [vmem:[#allocation7 + $0x11cc] ss:$16 sps:$4 sm:$0xff]  }
 0x4ef   :  { %5232 = vmatpush2.bf16.msra.mxu1 %v11557_v11  ;;  %v11542_v11 = vld [vmem:[#allocation7 + $0x11e8] ss:$16 sps:$4 sm:$0xff]  }
 0x4f0   :  { %5233 = vmatprep.subr.bf16.mxu1 %v11565_v13  ;;  %v11556_v13 = vld [vmem:[#allocation7 + $0x11ac] ss:$16 sps:$4 sm:$0xff]  }
 0x4f3   :  { %5234 = vmatpush2.bf16.msra.mxu1 %v11563_v57  ;;  %v11548_v57 = vld [vmem:[#allocation7 + $0x11c8] ss:$16 sps:$4 sm:$0xff]  }
 0x4f4   :  { %5235 = vmatprep.subr.bf16.mxu1 %v11571_v62  ;;  %v11554_v62 = vld [vmem:[#allocation7 + $0x11a8] ss:$16 sps:$4 sm:$0xff]  }
 0x4f7   :  { %5236 = vmatpush2.bf16.msra.mxu1 %v11569_v15  ;;  %v11562_v15 = vld [vmem:[#allocation7 + $0x118c] ss:$16 sps:$4 sm:$0xff]  }
 0x4f8   :  { %5237 = vmatprep.subr.bf16.mxu1 %v11577_v18  ;;  %v11566_v18 = vld [vmem:[#allocation7 + $0x1168] ss:$16 sps:$4 sm:$0xff]  }
 0x4fb   :  { %5238 = vmatpush2.bf16.msra.mxu1 %v11575_v19  ;;  %v4183_v19 = vrot.slane %v12762_v25, %v12662_v5 }
 0x4fc   :  { %5239 = vmatprep.subr.bf16.mxu1 %v11583_v23  ;;  %v11572_v23 = vld [vmem:[#allocation7 + $0x1148] ss:$16 sps:$4 sm:$0xff]  }
 0x4ff   :  { %5240 = vmatpush2.bf16.msra.mxu1 %v11581_v14 }
 0x500   :  { %5291 = vmatprep.subr.bf16.mxu1 %v11589_v24  ;;  %v11580_v24 = vld [vmem:[#allocation7 + $0x112c] ss:$16 sps:$4 sm:$0xff]  }
 0x502   :  { %v4226_v16 = vpop.f32.mrf.mxu0 }
 0x503   :  { %v4227_v29 = vadd.f32 %v4226_v16, %v4175_v17  ;;  %v11560_v16 = vld [vmem:[#allocation7 + $0x1188] ss:$16 sps:$4 sm:$0xff]  }
 0x504   :  { %v4228_v10 = vpop.f32.mrf.mxu0 }
 0x505   :  { %v4229_v31 = vadd.f32 %v4228_v10, %v4179_v28  ;;  %v11568_v10 = vld [vmem:[#allocation7 + $0x116c] ss:$16 sps:$4 sm:$0xff]  }
 0x506   :  { %v4230_v20 = vpop.f32.mrf.mxu0 }
 0x507   :  { %v11574_v20 = vld [vmem:[#allocation7 + $0x114c] ss:$16 sps:$4 sm:$0xff]  }
 0x508   :  { %v4231_v21 = vpop.f32.mrf.mxu0 }
 0x509   :  { %v4187_v21 = vrot.slane %v12762_v25, %v12665_v6 }
 0x542   :  { %v4267_v0 = vpop.f32.mrf.mxu1  ;;  %v12768_v30 = vpop.f32.mrf.mxu0 }
 0x543   :  { %v4268_v32 = vadd.f32 %v4267_v0, %v4227_v29  ;;  %v4309_v14 = vadd.f32 %v12768_v30, %v4183_v19  ;;  %v11584_v30 = vld [vmem:[#allocation7 + $0x1108] ss:$16 sps:$4 sm:$0xff]   ;;  %v11653_v19 = vld [vmem:[#allocation7 + $0x1420] ss:$16 sps:$4 sm:$0xff]  }
 0x544   :  { %v4269_v33 = vpop.f32.mrf.mxu1  ;;  %v12770_v8 = vpop.f32.mrf.mxu0 }
 0x545   :  { %vm4356_vm14 = vcmp.ge.f32.partialorder %v4268_v32, 0.0  ;;  %v4360_v34 = vmul.f32 0.2, %v4268_v32  ;;  %v4270_v36 = vadd.f32 %v4269_v33, %v4229_v31  ;;  %v4311_v28 = vadd.f32 %v12770_v8, %v4187_v21  ;;  %v11578_v31 = vld [vmem:[#allocation7 + $0x1128] ss:$16 sps:$4 sm:$0xff]  }
 0x546   :  { %v4271_v37 = vpop.f32.mrf.mxu1  ;;  %v4312_v38 = vpop.f32.mrf.mxu0  ;;  %v11658_v21 = vld [vmem:[#allocation7 + $0x1404] ss:$16 sps:$4 sm:$0xff]  }
 0x547   :  { %v4364_v39 = vsel %vm4356_vm14, %v4268_v32, %v4360_v34  ;;  %vm4357_vm15 = vcmp.ge.f32.partialorder %v4270_v36, 0.0  ;;  %v4361_v43 = vmul.f32 0.2, %v4270_v36  ;;  %v11586_v34 = vld [vmem:[#allocation7 + $0x110c] ss:$16 sps:$4 sm:$0xff]  }
 0x548   :  { %v4272_v44 = vpop.f32.mrf.mxu1  ;;  %v4313_v45 = vpop.f32.mrf.mxu0  ;;  %v4368_v35 = vmul.f32 1.4142135, %v4364_v39 }
 0x549   :  { %v4365_v46 = vsel %vm4357_vm15, %v4270_v36, %v4361_v43  ;;  %v11587_v45 = vld [vmem:[#allocation7 + $0x12e8] ss:$16 sps:$4 sm:$0xff]  }
 0x54a   :  { %v4369_v47 = vmul.f32 1.4142135, %v4365_v46  ;;  %v12772_v49 = vpack.c.bf16 %v4368_v35, %v4368_v35  ;;  %v11592_v46 = vld [vmem:[#allocation7 + $0x12cc] ss:$16 sps:$4 sm:$0xff]  }
 0x54c   :  { %v4373_v22 = vpack.c.bf16 %v4369_v47, %v4369_v47  ;;  %v11590_v47 = vld [vmem:[#allocation7 + $0x12c8] ss:$16 sps:$4 sm:$0xff]  }
 0x54e   :  { %5200 = vmatprep.mubr.bf16.mxu0 %v4373_v22 }
 0x54f   :  { %5201 = vmatmul.mubr.bf16.vlgmr.msra.gmra.mxu0 %v12772_v49 }
 0x550   :  { %5251 = vmatpush1.bf16.msra.mxu0 %v11494_v48  ;;  %5282 = vmatprep.mubr.bf16.mxu0 %v4373_v22  ;;  %v11595_v22 = vld [vmem:[#allocation7 + $0x12ac] ss:$16 sps:$4 sm:$0xff]   ;;  %v11593_v48 = vld [vmem:[#allocation7 + $0x12a8] ss:$16 sps:$4 sm:$0xff]  }
 0x551   :  { %5252 = vmatprep.subr.bf16.mxu0 %v11502_v50  ;;  %v11598_v50 = vld [vmem:[#allocation7 + $0x128c] ss:$16 sps:$4 sm:$0xff]  }
 0x554   :  { %5253 = vmatpush1.bf16.msra.mxu0 %v11500_v51  ;;  %v11635_v51 = vld [vmem:[#allocation7 + $0x14e0] ss:$16 sps:$4 sm:$0xff]  }
 0x555   :  { %5254 = vmatprep.subr.bf16.mxu0 %v11508_v52  ;;  %v11637_v52 = vld [vmem:[#allocation7 + $0x14e4] ss:$16 sps:$4 sm:$0xff]  }
 0x558   :  { %5255 = vmatpush1.bf16.msra.mxu0 %v11506_v53  ;;  %v11640_v53 = vld [vmem:[#allocation7 + $0x14c4] ss:$16 sps:$4 sm:$0xff]  }
 0x559   :  { %5256 = vmatprep.subr.bf16.mxu0 %v11514_v54  ;;  %v11596_v54 = vld [vmem:[#allocation7 + $0x1288] ss:$16 sps:$4 sm:$0xff]  }
 0x55c   :  { %5257 = vmatpush1.bf16.msra.mxu0 %v11512_v40  ;;  %v11638_v40 = vld [vmem:[#allocation7 + $0x14c0] ss:$16 sps:$4 sm:$0xff]  }
 0x55d   :  { %5258 = vmatprep.subr.bf16.mxu0 %v11520_v55  ;;  %v11601_v55 = vld [vmem:[#allocation7 + $0x126c] ss:$16 sps:$4 sm:$0xff]  }
 0x560   :  { %5259 = vmatpush1.bf16.msra.mxu0 %v11518_v56  ;;  %v11599_v56 = vld [vmem:[#allocation7 + $0x1268] ss:$16 sps:$4 sm:$0xff]  }
 0x561   :  { %5260 = vmatprep.subr.bf16.mxu0 %v11526_v58  ;;  %v11641_v58 = vld [vmem:[#allocation7 + $0x14a0] ss:$16 sps:$4 sm:$0xff]  }
 0x564   :  { %5261 = vmatpush1.bf16.msra.mxu0 %v11524_v59  ;;  %v11604_v59 = vld [vmem:[#allocation7 + $0x124c] ss:$16 sps:$4 sm:$0xff]  }
 0x565   :  { %5262 = vmatprep.subr.bf16.mxu0 %v11532_v60  ;;  %v11646_v60 = vld [vmem:[#allocation7 + $0x1484] ss:$16 sps:$4 sm:$0xff]  }
 0x568   :  { %5263 = vmatpush1.bf16.msra.mxu0 %v11530_v61  ;;  %v11602_v61 = vld [vmem:[#allocation7 + $0x1248] ss:$16 sps:$4 sm:$0xff]  }
 0x569   :  { %5264 = vmatprep.subr.bf16.mxu0 %v11538_v63  ;;  %v11644_v63 = vld [vmem:[#allocation7 + $0x1480] ss:$16 sps:$4 sm:$0xff]  }
 0x56c   :  { %5265 = vmatpush1.bf16.msra.mxu0 %v11536_v7  ;;  %v11607_v7 = vld [vmem:[#allocation7 + $0x122c] ss:$16 sps:$4 sm:$0xff]  }
 0x56d   :  { %5266 = vmatprep.subr.bf16.mxu0 %v11544_v9  ;;  %v11649_v9 = vld [vmem:[#allocation7 + $0x1464] ss:$16 sps:$4 sm:$0xff]  }
 0x570   :  { %5267 = vmatpush2.bf16.msra.mxu0 %v11542_v11  ;;  %v11605_v11 = vld [vmem:[#allocation7 + $0x1228] ss:$16 sps:$4 sm:$0xff]  }
 0x571   :  { %5268 = vmatprep.subr.bf16.mxu0 %v11550_v12  ;;  %v11647_v12 = vld [vmem:[#allocation7 + $0x1460] ss:$16 sps:$4 sm:$0xff]  }
 0x574   :  { %5269 = vmatpush2.bf16.msra.mxu0 %v11548_v57  ;;  %v11610_v57 = vld [vmem:[#allocation7 + $0x120c] ss:$16 sps:$4 sm:$0xff]  }
 0x575   :  { %5270 = vmatprep.subr.bf16.mxu0 %v11556_v13  ;;  %v11652_v13 = vld [vmem:[#allocation7 + $0x1444] ss:$16 sps:$4 sm:$0xff]  }
 0x578   :  { %5271 = vmatpush2.bf16.msra.mxu0 %v11554_v62  ;;  %v11608_v62 = vld [vmem:[#allocation7 + $0x1208] ss:$16 sps:$4 sm:$0xff]  }
 0x579   :  { %5272 = vmatprep.subr.bf16.mxu0 %v11562_v15  ;;  %v11650_v15 = vld [vmem:[#allocation7 + $0x1440] ss:$16 sps:$4 sm:$0xff]  }
 0x57c   :  { %5273 = vmatpush2.bf16.msra.mxu0 %v11560_v16  ;;  %v11613_v16 = vld [vmem:[#allocation7 + $0x13ec] ss:$16 sps:$4 sm:$0xff]  }
 0x57d   :  { %5274 = vmatprep.subr.bf16.mxu0 %v11568_v10  ;;  %v11655_v10 = vld [vmem:[#allocation7 + $0x1424] ss:$16 sps:$4 sm:$0xff]  }
 0x580   :  { %5275 = vmatpush2.bf16.msra.mxu0 %v11566_v18  ;;  %v11611_v18 = vld [vmem:[#allocation7 + $0x13e8] ss:$16 sps:$4 sm:$0xff]  }
 0x581   :  { %5276 = vmatprep.subr.bf16.mxu0 %v11574_v20  ;;  %v11616_v20 = vld [vmem:[#allocation7 + $0x13cc] ss:$16 sps:$4 sm:$0xff]  }
 0x582   :  { %v4349_v17 = vpop.f32.mrf.mxu1 }
 0x583   :  { %v4350_v29 = vadd.f32 %v4349_v17, %v4309_v14  ;;  %v11656_v14 = vld [vmem:[#allocation7 + $0x1400] ss:$16 sps:$4 sm:$0xff]   ;;  %v11661_v17 = vld [vmem:[#allocation7 + $0x15e4] ss:$16 sps:$4 sm:$0xff]  }
 0x584   :  { %v4351_v0 = vpop.f32.mrf.mxu1  ;;  %5277 = vmatpush2.bf16.msra.mxu0 %v11572_v23  ;;  %v11614_v23 = vld [vmem:[#allocation7 + $0x13c8] ss:$16 sps:$4 sm:$0xff]  }
 0x585   :  { %vm4358_vm0 = vcmp.ge.f32.partialorder %v4350_v29, 0.0  ;;  %v4362_v32 = vmul.f32 0.2, %v4350_v29  ;;  %v4352_v33 = vadd.f32 %v4351_v0, %v4311_v28  ;;  %5278 = vmatprep.subr.bf16.mxu0 %v11580_v24  ;;  %v11619_v24 = vld [vmem:[#allocation7 + $0x13ac] ss:$16 sps:$4 sm:$0xff]  }
 0x586   :  { %v4353_v36 = vpop.f32.mrf.mxu1  ;;  %v11617_v28 = vld [vmem:[#allocation7 + $0x13a8] ss:$16 sps:$4 sm:$0xff]   ;;  %v11622_v0 = vld [vmem:[#allocation7 + $0x138c] ss:$16 sps:$4 sm:$0xff]  }
 0x587   :  { %v4366_v25 = vsel %vm4358_vm0, %v4350_v29, %v4362_v32  ;;  %vm4359_vm1 = vcmp.ge.f32.partialorder %v4352_v33, 0.0  ;;  %v4363_v37 = vmul.f32 0.2, %v4352_v33  ;;  %v11659_v29 = vld [vmem:[#allocation7 + $0x15e0] ss:$16 sps:$4 sm:$0xff]  }
 0x588   :  { %v4354_v38 = vpop.f32.mrf.mxu1  ;;  %5279 = vmatpush2.bf16.msra.mxu0 %v11578_v31  ;;  %v4370_v39 = vmul.f32 1.4142135, %v4366_v25  ;;  %v11664_v31 = vld [vmem:[#allocation7 + $0x15c4] ss:$16 sps:$4 sm:$0xff]   ;;  %v11620_v32 = vld [vmem:[#allocation7 + $0x1388] ss:$16 sps:$4 sm:$0xff]  }
 0x589   :  { %5280 = vmatprep.subr.bf16.mxu0 %v11586_v34  ;;  %v4367_v43 = vsel %vm4359_vm1, %v4352_v33, %v4363_v37  ;;  %v11662_v33 = vld [vmem:[#allocation7 + $0x15c0] ss:$16 sps:$4 sm:$0xff]   ;;  %v11625_v34 = vld [vmem:[#allocation7 + $0x136c] ss:$16 sps:$4 sm:$0xff]   ;;  %v11667_v36 = vld [vmem:[#allocation7 + $0x15a4] ss:$16 sps:$4 sm:$0xff]  }
 0x58a   :  { %v4371_v8 = vmul.f32 1.4142135, %v4367_v43  ;;  %v12781_v35 = vpack.c.bf16 %v4370_v39, %v4370_v39  ;;  %v11623_v25 = vld [vmem:[#allocation7 + $0x1368] ss:$16 sps:$4 sm:$0xff]   ;;  %v11665_v37 = vld [vmem:[#allocation7 + $0x15a0] ss:$16 sps:$4 sm:$0xff]  }
 0x58b   :  { %v11628_v38 = vld [vmem:[#allocation7 + $0x134c] ss:$16 sps:$4 sm:$0xff]   ;;  %v11626_v39 = vld [vmem:[#allocation7 + $0x1348] ss:$16 sps:$4 sm:$0xff]   ;;  %v11668_v43 = vld [vmem:[#allocation7 + $0x1580] ss:$16 sps:$4 sm:$0xff]  }
 0x58c   :  { %5281 = vmatpush2.bf16.msra.mxu0 %v11584_v30  ;;  %v4375_v44 = vpack.c.bf16 %v4371_v8, %v4371_v8  ;;  %v11670_v30 = vld [vmem:[#allocation7 + $0x1584] ss:$16 sps:$4 sm:$0xff]   ;;  %v11631_v8 = vld [vmem:[#allocation7 + $0x132c] ss:$16 sps:$4 sm:$0xff]  }
 0x58d   :  { %6144 = vmatprep.subr.bf16.mxu0 %v11637_v52  ;;  %v11677_v52 = vld [vmem:[#allocation7 + $0x1520] ss:$16 sps:$4 sm:$0xff]  }
 0x58e   :  { %5241 = vmatprep.mubr.bf16.mxu1 %v4375_v44 }
 0x58f   :  { %5242 = vmatmul.mubr.bf16.vlgmr.msra.gmra.mxu1 %v12781_v35  ;;  %5283 = vmatmul.mubr.bf16.vlgmr.msra.gmra.mxu0 %v12772_v49  ;;  %v11643_v49 = vld [vmem:[#allocation7 + $0x14a4] ss:$16 sps:$4 sm:$0xff]  }
 0x590   :  { %5292 = vmatpush1.bf16.msra.mxu1 %v11587_v45  ;;  %5323 = vmatprep.mubr.bf16.mxu1 %v4375_v44  ;;  %v11673_v44 = vld [vmem:[#allocation7 + $0x1564] ss:$16 sps:$4 sm:$0xff]   ;;  %v11629_v45 = vld [vmem:[#allocation7 + $0x1328] ss:$16 sps:$4 sm:$0xff]  }
 0x591   :  { %5293 = vmatprep.subr.bf16.mxu1 %v11592_v46  ;;  %6145 = vmatpush1.bf16.msra.mxu0 %v11635_v51  ;;  %v11671_v46 = vld [vmem:[#allocation7 + $0x1560] ss:$16 sps:$4 sm:$0xff]   ;;  %v11679_v51 = vld [vmem:[#allocation7 + $0x1524] ss:$16 sps:$4 sm:$0xff]  }
 0x592   :  { %6146 = vmatprep.subr.bf16.mxu0 %v11640_v53  ;;  %v11682_v53 = vld [vmem:[#allocation7 + $0x1504] ss:$16 sps:$4 sm:$0xff]  }
 0x594   :  { %5294 = vmatpush1.bf16.msra.mxu1 %v11590_v47  ;;  %v11634_v47 = vld [vmem:[#allocation7 + $0x130c] ss:$16 sps:$4 sm:$0xff]  }
 0x595   :  { %5295 = vmatprep.subr.bf16.mxu1 %v11595_v22  ;;  %6147 = vmatpush1.bf16.msra.mxu0 %v11638_v40  ;;  %v11632_v22 = vld [vmem:[#allocation7 + $0x1308] ss:$16 sps:$4 sm:$0xff]   ;;  %v11683_v40 = vld [vmem:[#allocation7 + $0x16e0] ss:$16 sps:$4 sm:$0xff]  }
 0x596   :  { %6148 = vmatprep.subr.bf16.mxu0 %v11643_v49  ;;  %v11688_v49 = vld [vmem:[#allocation7 + $0x14ec] ss:$16 sps:$4 sm:$0xff]  }
 0x598   :  { %5296 = vmatpush1.bf16.msra.mxu1 %v11593_v48  ;;  %v11676_v48 = vld [vmem:[#allocation7 + $0x1544] ss:$16 sps:$4 sm:$0xff]  }
 0x599   :  { %5297 = vmatprep.subr.bf16.mxu1 %v11598_v50  ;;  %6149 = vmatpush1.bf16.msra.mxu0 %v11641_v58  ;;  %v11674_v50 = vld [vmem:[#allocation7 + $0x1540] ss:$16 sps:$4 sm:$0xff]   ;;  %v11691_v58 = vld [vmem:[#allocation7 + $0x16c4] ss:$16 sps:$4 sm:$0xff]  }
 0x59a   :  { %6150 = vmatprep.subr.bf16.mxu0 %v11646_v60  ;;  %v11701_v60 = vld [vmem:[#allocation7 + $0x1680] ss:$16 sps:$4 sm:$0xff]  }
 0x59c   :  { %5298 = vmatpush1.bf16.msra.mxu1 %v11596_v54  ;;  %v11680_v54 = vld [vmem:[#allocation7 + $0x1500] ss:$16 sps:$4 sm:$0xff]  }
 0x59d   :  { %5299 = vmatprep.subr.bf16.mxu1 %v11601_v55  ;;  %6151 = vmatpush1.bf16.msra.mxu0 %v11644_v63  ;;  %v11685_v55 = vld [vmem:[#allocation7 + $0x16e4] ss:$16 sps:$4 sm:$0xff]   ;;  %v11707_v63 = vld [vmem:[#allocation7 + $0x1660] ss:$16 sps:$4 sm:$0xff]  }
 0x59e   :  { %6152 = vmatprep.subr.bf16.mxu0 %v11649_v9  ;;  %v11713_v9 = vld [vmem:[#allocation7 + $0x1640] ss:$16 sps:$4 sm:$0xff]  }
 0x5a0   :  { %5300 = vmatpush1.bf16.msra.mxu1 %v11599_v56  ;;  %v11689_v56 = vld [vmem:[#allocation7 + $0x16c0] ss:$16 sps:$4 sm:$0xff]  }
 0x5a1   :  { %5301 = vmatprep.subr.bf16.mxu1 %v11604_v59  ;;  %6153 = vmatpush1.bf16.msra.mxu0 %v11647_v12  ;;  %v11697_v59 = vld [vmem:[#allocation7 + $0x16a4] ss:$16 sps:$4 sm:$0xff]   ;;  %v11719_v12 = vld [vmem:[#allocation7 + $0x1620] ss:$16 sps:$4 sm:$0xff]  }
 0x5a2   :  { %6154 = vmatprep.subr.bf16.mxu0 %v11652_v13  ;;  %v11725_v13 = vld [vmem:[#allocation7 + $0x1600] ss:$16 sps:$4 sm:$0xff]  }
 0x5a4   :  { %5302 = vmatpush1.bf16.msra.mxu1 %v11602_v61  ;;  %v11703_v61 = vld [vmem:[#allocation7 + $0x1684] ss:$16 sps:$4 sm:$0xff]  }
 0x5a5   :  { %5303 = vmatprep.subr.bf16.mxu1 %v11607_v7  ;;  %6155 = vmatpush1.bf16.msra.mxu0 %v11650_v15  ;;  %v11709_v7 = vld [vmem:[#allocation7 + $0x1664] ss:$16 sps:$4 sm:$0xff]   ;;  %v11731_v15 = vld [vmem:[#allocation7 + $0x17e0] ss:$16 sps:$4 sm:$0xff]  }
 0x5a6   :  { %6156 = vmatprep.subr.bf16.mxu0 %v11655_v10  ;;  %v11737_v10 = vld [vmem:[#allocation7 + $0x17c0] ss:$16 sps:$4 sm:$0xff]  }
 0x5a8   :  { %5304 = vmatpush1.bf16.msra.mxu1 %v11605_v11  ;;  %v11715_v11 = vld [vmem:[#allocation7 + $0x1644] ss:$16 sps:$4 sm:$0xff]  }
 0x5a9   :  { %5305 = vmatprep.subr.bf16.mxu1 %v11610_v57  ;;  %6157 = vmatpush1.bf16.msra.mxu0 %v11653_v19  ;;  %v11721_v57 = vld [vmem:[#allocation7 + $0x1624] ss:$16 sps:$4 sm:$0xff]   ;;  %v11743_v19 = vld [vmem:[#allocation7 + $0x17a0] ss:$16 sps:$4 sm:$0xff]  }
 0x5aa   :  { %6158 = vmatprep.subr.bf16.mxu0 %v11658_v21  ;;  %v11749_v21 = vld [vmem:[#allocation7 + $0x1780] ss:$16 sps:$4 sm:$0xff]  }
 0x5ac   :  { %5306 = vmatpush1.bf16.msra.mxu1 %v11608_v62  ;;  %v11727_v62 = vld [vmem:[#allocation7 + $0x1604] ss:$16 sps:$4 sm:$0xff]  }
 0x5ad   :  { %5307 = vmatprep.subr.bf16.mxu1 %v11613_v16  ;;  %6159 = vmatpush1.bf16.msra.mxu0 %v11656_v14  ;;  %v11733_v16 = vld [vmem:[#allocation7 + $0x17e4] ss:$16 sps:$4 sm:$0xff]   ;;  %v11755_v14 = vld [vmem:[#allocation7 + $0x1760] ss:$16 sps:$4 sm:$0xff]  }
 0x5ae   :  { %6160 = vmatprep.subr.bf16.mxu0 %v11661_v17  ;;  %v11763_v17 = vld [vmem:[#allocation7 + $0x1744] ss:$16 sps:$4 sm:$0xff]  }
 0x5b0   :  { %5308 = vmatpush2.bf16.msra.mxu1 %v11611_v18  ;;  %v11739_v18 = vld [vmem:[#allocation7 + $0x17c4] ss:$16 sps:$4 sm:$0xff]  }
 0x5b1   :  { %5309 = vmatprep.subr.bf16.mxu1 %v11616_v20  ;;  %6161 = vmatpush2.bf16.msra.mxu0 %v11659_v29  ;;  %v11745_v20 = vld [vmem:[#allocation7 + $0x17a4] ss:$16 sps:$4 sm:$0xff]  }
 0x5b2   :  { %6162 = vmatprep.subr.bf16.mxu0 %v11664_v31  ;;  %v11769_v31 = vld [vmem:[#allocation7 + $0x1724] ss:$16 sps:$4 sm:$0xff]  }
 0x5b4   :  { %5310 = vmatpush2.bf16.msra.mxu1 %v11614_v23  ;;  %v11751_v23 = vld [vmem:[#allocation7 + $0x1784] ss:$16 sps:$4 sm:$0xff]  }
 0x5b5   :  { %5311 = vmatprep.subr.bf16.mxu1 %v11619_v24  ;;  %6163 = vmatpush2.bf16.msra.mxu0 %v11662_v33  ;;  %v11757_v24 = vld [vmem:[#allocation7 + $0x1764] ss:$16 sps:$4 sm:$0xff]  }
 0x5b6   :  { %6164 = vmatprep.subr.bf16.mxu0 %v11667_v36  ;;  %v11775_v36 = vld [vmem:[#allocation7 + $0x1704] ss:$16 sps:$4 sm:$0xff]  }
 0x5b8   :  { %5312 = vmatpush2.bf16.msra.mxu1 %v11617_v28  ;;  %v11761_v28 = vld [vmem:[#allocation7 + $0x1740] ss:$16 sps:$4 sm:$0xff]  }
 0x5b9   :  { %5313 = vmatprep.subr.bf16.mxu1 %v11622_v0  ;;  %6165 = vmatpush2.bf16.msra.mxu0 %v11665_v37  ;;  %v11781_v37 = vld [vmem:[#allocation7 + $0x16ec] ss:$16 sps:$4 sm:$0xff]  }
 0x5ba   :  { %6166 = vmatprep.subr.bf16.mxu0 %v11670_v30 }
 0x5bc   :  { %5314 = vmatpush2.bf16.msra.mxu1 %v11620_v32  ;;  %v11767_v32 = vld [vmem:[#allocation7 + $0x1720] ss:$16 sps:$4 sm:$0xff]  }
 0x5bd   :  { %5315 = vmatprep.subr.bf16.mxu1 %v11625_v34  ;;  %6167 = vmatpush2.bf16.msra.mxu0 %v11668_v43 }
 0x5be   :  { %6168 = vmatprep.subr.bf16.mxu0 %v11673_v44 }
 0x5c0   :  { %5316 = vmatpush2.bf16.msra.mxu1 %v11623_v25  ;;  %v11773_v25 = vld [vmem:[#allocation7 + $0x1700] ss:$16 sps:$4 sm:$0xff]  }
 0x5c1   :  { %5317 = vmatprep.subr.bf16.mxu1 %v11628_v38  ;;  %6169 = vmatpush2.bf16.msra.mxu0 %v11671_v46  ;;  %v12786_v38 = vld [vmem:[#allocation9 + $0x10] sm:$0xf] }
 0x5c2   :  { %6170 = vmatprep.subr.bf16.mxu0 %v11676_v48  ;;  %v5151_v30 = vrot.slane %v12786_v38, %v12656_v3 }
 0x5c4   :  { %5318 = vmatpush2.bf16.msra.mxu1 %v11626_v39  ;;  %v5155_v39 = vrot.slane %v12786_v38, %v12659_v4 }
 0x5c5   :  { %5319 = vmatprep.subr.bf16.mxu1 %v11631_v8  ;;  %6171 = vmatpush2.bf16.msra.mxu0 %v11674_v50 }
 0x5c6   :  { %6172 = vmatprep.subr.bf16.mxu0 %v11679_v51 }
 0x5c8   :  { %5320 = vmatpush2.bf16.msra.mxu1 %v11629_v45 }
 0x5c9   :  { %5321 = vmatprep.subr.bf16.mxu1 %v11634_v47  ;;  %6173 = vmatpush2.bf16.msra.mxu0 %v11677_v52 }
 0x5ca   :  { %6174 = vmatprep.subr.bf16.mxu0 %v11682_v53 }
 0x5cc   :  { %5322 = vmatpush2.bf16.msra.mxu1 %v11632_v22 }
 0x5cd   :  { %6175 = vmatpush2.bf16.msra.mxu0 %v11680_v54  ;;  %6185 = vmatprep.subr.bf16.mxu1 %v11685_v55 }
 0x5ce   :  { %6226 = vmatprep.subr.bf16.mxu0 %v11688_v49 }
 0x5cf   :  { %5324 = vmatmul.mubr.bf16.vlgmr.msra.gmra.mxu1 %v12781_v35  ;;  %v11695_v35 = vld [vmem:[#allocation7 + $0x16a0] ss:$16 sps:$4 sm:$0xff]  }
 0x5d0   :  { %6186 = vmatpush1.bf16.msra.mxu1 %v11683_v40 }
 0x5d1   :  { %6187 = vmatprep.subr.bf16.mxu1 %v11691_v58 }
 0x5d4   :  { %6188 = vmatpush1.bf16.msra.mxu1 %v11689_v56 }
 0x5d5   :  { %6189 = vmatprep.subr.bf16.mxu1 %v11697_v59  ;;  %v11686_v59 = vld [vmem:[#allocation7 + $0x14e8] ss:$16 sps:$4 sm:$0xff]  }
 0x5d8   :  { %6190 = vmatpush1.bf16.msra.mxu1 %v11695_v35 }
 0x5d9   :  { %6191 = vmatprep.subr.bf16.mxu1 %v11703_v61  ;;  %v11694_v61 = vld [vmem:[#allocation7 + $0x14cc] ss:$16 sps:$4 sm:$0xff]  }
 0x5dc   :  { %6192 = vmatpush1.bf16.msra.mxu1 %v11701_v60 }
 0x5dd   :  { %6193 = vmatprep.subr.bf16.mxu1 %v11709_v7  ;;  %v11700_v7 = vld [vmem:[#allocation7 + $0x14ac] ss:$16 sps:$4 sm:$0xff]  }
 0x5e0   :  { %6194 = vmatpush1.bf16.msra.mxu1 %v11707_v63  ;;  %v11692_v63 = vld [vmem:[#allocation7 + $0x14c8] ss:$16 sps:$4 sm:$0xff]  }
 0x5e1   :  { %6195 = vmatprep.subr.bf16.mxu1 %v11715_v11  ;;  %v11706_v11 = vld [vmem:[#allocation7 + $0x148c] ss:$16 sps:$4 sm:$0xff]  }
 0x5e4   :  { %6196 = vmatpush1.bf16.msra.mxu1 %v11713_v9  ;;  %v11698_v9 = vld [vmem:[#allocation7 + $0x14a8] ss:$16 sps:$4 sm:$0xff]  }
 0x5e5   :  { %6197 = vmatprep.subr.bf16.mxu1 %v11721_v57  ;;  %v11712_v57 = vld [vmem:[#allocation7 + $0x146c] ss:$16 sps:$4 sm:$0xff]  }
 0x5e8   :  { %6198 = vmatpush1.bf16.msra.mxu1 %v11719_v12  ;;  %v11704_v12 = vld [vmem:[#allocation7 + $0x1488] ss:$16 sps:$4 sm:$0xff]  }
 0x5e9   :  { %6199 = vmatprep.subr.bf16.mxu1 %v11727_v62  ;;  %v11718_v62 = vld [vmem:[#allocation7 + $0x144c] ss:$16 sps:$4 sm:$0xff]  }
 0x5ec   :  { %6200 = vmatpush1.bf16.msra.mxu1 %v11725_v13  ;;  %v11710_v13 = vld [vmem:[#allocation7 + $0x1468] ss:$16 sps:$4 sm:$0xff]  }
 0x5ed   :  { %6201 = vmatprep.subr.bf16.mxu1 %v11733_v16  ;;  %v11724_v16 = vld [vmem:[#allocation7 + $0x142c] ss:$16 sps:$4 sm:$0xff]  }
 0x5f0   :  { %6202 = vmatpush2.bf16.msra.mxu1 %v11731_v15  ;;  %v11716_v15 = vld [vmem:[#allocation7 + $0x1448] ss:$16 sps:$4 sm:$0xff]  }
 0x5f1   :  { %6203 = vmatprep.subr.bf16.mxu1 %v11739_v18  ;;  %v11730_v18 = vld [vmem:[#allocation7 + $0x140c] ss:$16 sps:$4 sm:$0xff]  }
 0x5f4   :  { %6204 = vmatpush2.bf16.msra.mxu1 %v11737_v10  ;;  %v11722_v10 = vld [vmem:[#allocation7 + $0x1428] ss:$16 sps:$4 sm:$0xff]  }
 0x5f5   :  { %6205 = vmatprep.subr.bf16.mxu1 %v11745_v20  ;;  %v11736_v20 = vld [vmem:[#allocation7 + $0x15ec] ss:$16 sps:$4 sm:$0xff]  }
 0x5f8   :  { %6206 = vmatpush2.bf16.msra.mxu1 %v11743_v19  ;;  %v11728_v19 = vld [vmem:[#allocation7 + $0x1408] ss:$16 sps:$4 sm:$0xff]  }
 0x5f9   :  { %6207 = vmatprep.subr.bf16.mxu1 %v11751_v23  ;;  %v11742_v23 = vld [vmem:[#allocation7 + $0x15cc] ss:$16 sps:$4 sm:$0xff]  }
 0x5fc   :  { %6208 = vmatpush2.bf16.msra.mxu1 %v11749_v21  ;;  %v11734_v21 = vld [vmem:[#allocation7 + $0x15e8] ss:$16 sps:$4 sm:$0xff]  }
 0x5fd   :  { %6209 = vmatprep.subr.bf16.mxu1 %v11757_v24  ;;  %v11748_v24 = vld [vmem:[#allocation7 + $0x15ac] ss:$16 sps:$4 sm:$0xff]  }
 0x600   :  { %6210 = vmatpush2.bf16.msra.mxu1 %v11755_v14  ;;  %v11740_v14 = vld [vmem:[#allocation7 + $0x15c8] ss:$16 sps:$4 sm:$0xff]  }
 0x601   :  { %6211 = vmatprep.subr.bf16.mxu1 %v11763_v17  ;;  %v11746_v17 = vld [vmem:[#allocation7 + $0x15a8] ss:$16 sps:$4 sm:$0xff]  }
 0x604   :  { %6212 = vmatpush2.bf16.msra.mxu1 %v11761_v28  ;;  %v11754_v28 = vld [vmem:[#allocation7 + $0x158c] ss:$16 sps:$4 sm:$0xff]  }
 0x605   :  { %6213 = vmatprep.subr.bf16.mxu1 %v11769_v31  ;;  %v11758_v31 = vld [vmem:[#allocation7 + $0x1568] ss:$16 sps:$4 sm:$0xff]  }
 0x608   :  { %6214 = vmatpush2.bf16.msra.mxu1 %v11767_v32  ;;  %v5159_v32 = vrot.slane %v12786_v38, %v12662_v5 }
 0x609   :  { %6215 = vmatprep.subr.bf16.mxu1 %v11775_v36  ;;  %v11764_v36 = vld [vmem:[#allocation7 + $0x1548] ss:$16 sps:$4 sm:$0xff]  }
 0x60c   :  { %6216 = vmatpush2.bf16.msra.mxu1 %v11773_v25 }
 0x60d   :  { %6267 = vmatprep.subr.bf16.mxu1 %v11781_v37  ;;  %v11772_v37 = vld [vmem:[#allocation7 + $0x152c] ss:$16 sps:$4 sm:$0xff]  }
 0x60f   :  { %v5202_v29 = vpop.f32.mrf.mxu0 }
 0x610   :  { %v5203_v43 = vadd.f32 %v5202_v29, %v5151_v30  ;;  %v11752_v29 = vld [vmem:[#allocation7 + $0x1588] ss:$16 sps:$4 sm:$0xff]  }
 0x611   :  { %v5204_v0 = vpop.f32.mrf.mxu0 }
 0x612   :  { %v5205_v45 = vadd.f32 %v5204_v0, %v5155_v39  ;;  %v11760_v0 = vld [vmem:[#allocation7 + $0x156c] ss:$16 sps:$4 sm:$0xff]  }
 0x613   :  { %v5206_v33 = vpop.f32.mrf.mxu0 }
 0x614   :  { %v11766_v33 = vld [vmem:[#allocation7 + $0x154c] ss:$16 sps:$4 sm:$0xff]  }
 0x615   :  { %v5207_v34 = vpop.f32.mrf.mxu0 }
 0x616   :  { %v5163_v34 = vrot.slane %v12786_v38, %v12665_v6 }
 0x64f   :  { %v5243_v8 = vpop.f32.mrf.mxu1  ;;  %v12792_v44 = vpop.f32.mrf.mxu0 }
 0x650   :  { %v5244_v46 = vadd.f32 %v5243_v8, %v5203_v43  ;;  %v5285_v25 = vadd.f32 %v12792_v44, %v5159_v32  ;;  %v11776_v44 = vld [vmem:[#allocation7 + $0x1508] ss:$16 sps:$4 sm:$0xff]   ;;  %v11845_v32 = vld [vmem:[#allocation7 + $0x1820] ss:$16 sps:$4 sm:$0xff]  }
 0x651   :  { %v5245_v47 = vpop.f32.mrf.mxu1  ;;  %v12794_v22 = vpop.f32.mrf.mxu0 }
 0x652   :  { %vm5332_vm2 = vcmp.ge.f32.partialorder %v5244_v46, 0.0  ;;  %v5336_v48 = vmul.f32 0.2, %v5244_v46  ;;  %v5246_v50 = vadd.f32 %v5245_v47, %v5205_v45  ;;  %v5287_v39 = vadd.f32 %v12794_v22, %v5163_v34  ;;  %v11770_v45 = vld [vmem:[#allocation7 + $0x1528] ss:$16 sps:$4 sm:$0xff]  }
 0x653   :  { %v5247_v51 = vpop.f32.mrf.mxu1  ;;  %v5288_v52 = vpop.f32.mrf.mxu0  ;;  %v11850_v34 = vld [vmem:[#allocation7 + $0x1804] ss:$16 sps:$4 sm:$0xff]  }
 0x654   :  { %v5340_v53 = vsel %vm5332_vm2, %v5244_v46, %v5336_v48  ;;  %vm5333_vm3 = vcmp.ge.f32.partialorder %v5246_v50, 0.0  ;;  %v5337_v54 = vmul.f32 0.2, %v5246_v50  ;;  %v11778_v48 = vld [vmem:[#allocation7 + $0x150c] ss:$16 sps:$4 sm:$0xff]   ;;  %vm12515_vm2 = vmmov 0  }
 0x655   :  { %v5248_v40 = vpop.f32.mrf.mxu1  ;;  %v5289_v55 = vpop.f32.mrf.mxu0  ;;  %v5344_v49 = vmul.f32 1.4142135, %v5340_v53 }
 0x656   :  { %v5341_v56 = vsel %vm5333_vm3, %v5246_v50, %v5337_v54  ;;  %v11779_v55 = vld [vmem:[#allocation7 + $0x16e8] ss:$16 sps:$4 sm:$0xff]   ;;  %vm8580_vm3 = vcmask 261120  }
 0x657   :  { %v5345_v58 = vmul.f32 1.4142135, %v5341_v56  ;;  %v12796_v60 = vpack.c.bf16 %v5344_v49, %v5344_v49  ;;  %v11784_v56 = vld [vmem:[#allocation7 + $0x16cc] ss:$16 sps:$4 sm:$0xff]  }
 0x659   :  { %v5349_v35 = vpack.c.bf16 %v5345_v58, %v5345_v58  ;;  %v11782_v58 = vld [vmem:[#allocation7 + $0x16c8] ss:$16 sps:$4 sm:$0xff]  }
 0x65b   :  { %6176 = vmatprep.mubr.bf16.mxu0 %v5349_v35 }
 0x65c   :  { %6177 = vmatmul.mubr.bf16.vlgmr.msra.gmra.mxu0 %v12796_v60 }
 0x65d   :  { %6227 = vmatpush1.bf16.msra.mxu0 %v11686_v59  ;;  %6258 = vmatprep.mubr.bf16.mxu0 %v5349_v35  ;;  %v11787_v35 = vld [vmem:[#allocation7 + $0x16ac] ss:$16 sps:$4 sm:$0xff]   ;;  %v11785_v59 = vld [vmem:[#allocation7 + $0x16a8] ss:$16 sps:$4 sm:$0xff]  }
 0x65e   :  { %6228 = vmatprep.subr.bf16.mxu0 %v11694_v61  ;;  %v11790_v61 = vld [vmem:[#allocation7 + $0x168c] ss:$16 sps:$4 sm:$0xff]  }
 0x661   :  { %6229 = vmatpush1.bf16.msra.mxu0 %v11692_v63  ;;  %v11827_v63 = vld [vmem:[#allocation7 + $0x18e0] ss:$16 sps:$4 sm:$0xff]  }
 0x662   :  { %6230 = vmatprep.subr.bf16.mxu0 %v11700_v7  ;;  %v11829_v7 = vld [vmem:[#allocation7 + $0x18e4] ss:$16 sps:$4 sm:$0xff]  }
 0x665   :  { %6231 = vmatpush1.bf16.msra.mxu0 %v11698_v9  ;;  %v11832_v9 = vld [vmem:[#allocation7 + $0x18c4] ss:$16 sps:$4 sm:$0xff]  }
 0x666   :  { %6232 = vmatprep.subr.bf16.mxu0 %v11706_v11  ;;  %v11788_v11 = vld [vmem:[#allocation7 + $0x1688] ss:$16 sps:$4 sm:$0xff]  }
 0x669   :  { %6233 = vmatpush1.bf16.msra.mxu0 %v11704_v12  ;;  %v11830_v12 = vld [vmem:[#allocation7 + $0x18c0] ss:$16 sps:$4 sm:$0xff]  }
 0x66a   :  { %6234 = vmatprep.subr.bf16.mxu0 %v11712_v57  ;;  %v11793_v57 = vld [vmem:[#allocation7 + $0x166c] ss:$16 sps:$4 sm:$0xff]  }
 0x66d   :  { %6235 = vmatpush1.bf16.msra.mxu0 %v11710_v13  ;;  %v11791_v13 = vld [vmem:[#allocation7 + $0x1668] ss:$16 sps:$4 sm:$0xff]  }
 0x66e   :  { %6236 = vmatprep.subr.bf16.mxu0 %v11718_v62  ;;  %v11833_v62 = vld [vmem:[#allocation7 + $0x18a0] ss:$16 sps:$4 sm:$0xff]  }
 0x671   :  { %6237 = vmatpush1.bf16.msra.mxu0 %v11716_v15  ;;  %v11796_v15 = vld [vmem:[#allocation7 + $0x164c] ss:$16 sps:$4 sm:$0xff]  }
 0x672   :  { %6238 = vmatprep.subr.bf16.mxu0 %v11724_v16  ;;  %v11838_v16 = vld [vmem:[#allocation7 + $0x1884] ss:$16 sps:$4 sm:$0xff]  }
 0x675   :  { %6239 = vmatpush1.bf16.msra.mxu0 %v11722_v10  ;;  %v11794_v10 = vld [vmem:[#allocation7 + $0x1648] ss:$16 sps:$4 sm:$0xff]  }
 0x676   :  { %6240 = vmatprep.subr.bf16.mxu0 %v11730_v18  ;;  %v11836_v18 = vld [vmem:[#allocation7 + $0x1880] ss:$16 sps:$4 sm:$0xff]  }
 0x679   :  { %6241 = vmatpush1.bf16.msra.mxu0 %v11728_v19  ;;  %v11799_v19 = vld [vmem:[#allocation7 + $0x162c] ss:$16 sps:$4 sm:$0xff]  }
 0x67a   :  { %6242 = vmatprep.subr.bf16.mxu0 %v11736_v20  ;;  %v11841_v20 = vld [vmem:[#allocation7 + $0x1864] ss:$16 sps:$4 sm:$0xff]  }
 0x67d   :  { %6243 = vmatpush2.bf16.msra.mxu0 %v11734_v21  ;;  %v11797_v21 = vld [vmem:[#allocation7 + $0x1628] ss:$16 sps:$4 sm:$0xff]  }
 0x67e   :  { %6244 = vmatprep.subr.bf16.mxu0 %v11742_v23  ;;  %v11839_v23 = vld [vmem:[#allocation7 + $0x1860] ss:$16 sps:$4 sm:$0xff]  }
 0x681   :  { %6245 = vmatpush2.bf16.msra.mxu0 %v11740_v14  ;;  %v11802_v14 = vld [vmem:[#allocation7 + $0x160c] ss:$16 sps:$4 sm:$0xff]  }
 0x682   :  { %6246 = vmatprep.subr.bf16.mxu0 %v11748_v24  ;;  %v11844_v24 = vld [vmem:[#allocation7 + $0x1844] ss:$16 sps:$4 sm:$0xff]  }
 0x685   :  { %6247 = vmatpush2.bf16.msra.mxu0 %v11746_v17  ;;  %v11800_v17 = vld [vmem:[#allocation7 + $0x1608] ss:$16 sps:$4 sm:$0xff]  }
 0x686   :  { %6248 = vmatprep.subr.bf16.mxu0 %v11754_v28  ;;  %v11842_v28 = vld [vmem:[#allocation7 + $0x1840] ss:$16 sps:$4 sm:$0xff]  }
 0x689   :  { %6249 = vmatpush2.bf16.msra.mxu0 %v11752_v29  ;;  %v11805_v29 = vld [vmem:[#allocation7 + $0x17ec] ss:$16 sps:$4 sm:$0xff]  }
 0x68a   :  { %6250 = vmatprep.subr.bf16.mxu0 %v11760_v0  ;;  %v11847_v0 = vld [vmem:[#allocation7 + $0x1824] ss:$16 sps:$4 sm:$0xff]  }
 0x68d   :  { %6251 = vmatpush2.bf16.msra.mxu0 %v11758_v31  ;;  %v11803_v31 = vld [vmem:[#allocation7 + $0x17e8] ss:$16 sps:$4 sm:$0xff]  }
 0x68e   :  { %6252 = vmatprep.subr.bf16.mxu0 %v11766_v33  ;;  %v11808_v33 = vld [vmem:[#allocation7 + $0x17cc] ss:$16 sps:$4 sm:$0xff]  }
 0x68f   :  { %v5325_v30 = vpop.f32.mrf.mxu1 }
 0x690   :  { %v5326_v43 = vadd.f32 %v5325_v30, %v5285_v25  ;;  %v11848_v25 = vld [vmem:[#allocation7 + $0x1800] ss:$16 sps:$4 sm:$0xff]   ;;  %v11853_v30 = vld [vmem:[#allocation7 + $0x19e4] ss:$16 sps:$4 sm:$0xff]  }
 0x691   :  { %v5327_v8 = vpop.f32.mrf.mxu1  ;;  %6253 = vmatpush2.bf16.msra.mxu0 %v11764_v36  ;;  %v11806_v36 = vld [vmem:[#allocation7 + $0x17c8] ss:$16 sps:$4 sm:$0xff]  }
 0x692   :  { %vm5334_vm4 = vcmp.ge.f32.partialorder %v5326_v43, 0.0  ;;  %v5338_v46 = vmul.f32 0.2, %v5326_v43  ;;  %v5328_v47 = vadd.f32 %v5327_v8, %v5287_v39  ;;  %6254 = vmatprep.subr.bf16.mxu0 %v11772_v37  ;;  %v11811_v37 = vld [vmem:[#allocation7 + $0x17ac] ss:$16 sps:$4 sm:$0xff]  }
 0x693   :  { %v5329_v50 = vpop.f32.mrf.mxu1  ;;  %v11809_v39 = vld [vmem:[#allocation7 + $0x17a8] ss:$16 sps:$4 sm:$0xff]   ;;  %v11814_v8 = vld [vmem:[#allocation7 + $0x178c] ss:$16 sps:$4 sm:$0xff]  }
 0x694   :  { %v5342_v38 = vsel %vm5334_vm4, %v5326_v43, %v5338_v46  ;;  %vm5335_vm5 = vcmp.ge.f32.partialorder %v5328_v47, 0.0  ;;  %v5339_v51 = vmul.f32 0.2, %v5328_v47  ;;  %v11851_v43 = vld [vmem:[#allocation7 + $0x19e0] ss:$16 sps:$4 sm:$0xff]  }
 0x695   :  { %v5330_v52 = vpop.f32.mrf.mxu1  ;;  %6255 = vmatpush2.bf16.msra.mxu0 %v11770_v45  ;;  %v5346_v53 = vmul.f32 1.4142135, %v5342_v38  ;;  %v11856_v45 = vld [vmem:[#allocation7 + $0x19c4] ss:$16 sps:$4 sm:$0xff]   ;;  %v11812_v46 = vld [vmem:[#allocation7 + $0x1788] ss:$16 sps:$4 sm:$0xff]  }
 0x696   :  { %6256 = vmatprep.subr.bf16.mxu0 %v11778_v48  ;;  %v5343_v54 = vsel %vm5335_vm5, %v5328_v47, %v5339_v51  ;;  %v11854_v47 = vld [vmem:[#allocation7 + $0x19c0] ss:$16 sps:$4 sm:$0xff]   ;;  %v11817_v48 = vld [vmem:[#allocation7 + $0x176c] ss:$16 sps:$4 sm:$0xff]   ;;  %v11859_v50 = vld [vmem:[#allocation7 + $0x19a4] ss:$16 sps:$4 sm:$0xff]  }
 0x697   :  { %v5347_v22 = vmul.f32 1.4142135, %v5343_v54  ;;  %v12805_v49 = vpack.c.bf16 %v5346_v53, %v5346_v53  ;;  %v11815_v38 = vld [vmem:[#allocation7 + $0x1768] ss:$16 sps:$4 sm:$0xff]   ;;  %v11857_v51 = vld [vmem:[#allocation7 + $0x19a0] ss:$16 sps:$4 sm:$0xff]  }
 0x698   :  { %v11820_v52 = vld [vmem:[#allocation7 + $0x174c] ss:$16 sps:$4 sm:$0xff]   ;;  %v11818_v53 = vld [vmem:[#allocation7 + $0x1748] ss:$16 sps:$4 sm:$0xff]   ;;  %v11860_v54 = vld [vmem:[#allocation7 + $0x1980] ss:$16 sps:$4 sm:$0xff]  }
 0x699   :  { %6257 = vmatpush2.bf16.msra.mxu0 %v11776_v44  ;;  %v5351_v40 = vpack.c.bf16 %v5347_v22, %v5347_v22  ;;  %v11862_v44 = vld [vmem:[#allocation7 + $0x1984] ss:$16 sps:$4 sm:$0xff]   ;;  %v11823_v22 = vld [vmem:[#allocation7 + $0x172c] ss:$16 sps:$4 sm:$0xff]  }
 0x69a   :  { %7120 = vmatprep.subr.bf16.mxu0 %v11829_v7  ;;  %v11869_v7 = vld [vmem:[#allocation7 + $0x1920] ss:$16 sps:$4 sm:$0xff]  }
 0x69b   :  { %6217 = vmatprep.mubr.bf16.mxu1 %v5351_v40 }
 0x69c   :  { %6218 = vmatmul.mubr.bf16.vlgmr.msra.gmra.mxu1 %v12805_v49  ;;  %6259 = vmatmul.mubr.bf16.vlgmr.msra.gmra.mxu0 %v12796_v60  ;;  %v11835_v60 = vld [vmem:[#allocation7 + $0x18a4] ss:$16 sps:$4 sm:$0xff]  }
 0x69d   :  { %6268 = vmatpush1.bf16.msra.mxu1 %v11779_v55  ;;  %6299 = vmatprep.mubr.bf16.mxu1 %v5351_v40  ;;  %v11865_v40 = vld [vmem:[#allocation7 + $0x1964] ss:$16 sps:$4 sm:$0xff]   ;;  %v11821_v55 = vld [vmem:[#allocation7 + $0x1728] ss:$16 sps:$4 sm:$0xff]  }
 0x69e   :  { %6269 = vmatprep.subr.bf16.mxu1 %v11784_v56  ;;  %7121 = vmatpush1.bf16.msra.mxu0 %v11827_v63  ;;  %v11863_v56 = vld [vmem:[#allocation7 + $0x1960] ss:$16 sps:$4 sm:$0xff]   ;;  %v11871_v63 = vld [vmem:[#allocation7 + $0x1924] ss:$16 sps:$4 sm:$0xff]  }
 0x69f   :  { %7122 = vmatprep.subr.bf16.mxu0 %v11832_v9  ;;  %v11874_v9 = vld [vmem:[#allocation7 + $0x1904] ss:$16 sps:$4 sm:$0xff]  }
 0x6a1   :  { %6270 = vmatpush1.bf16.msra.mxu1 %v11782_v58  ;;  %v11826_v58 = vld [vmem:[#allocation7 + $0x170c] ss:$16 sps:$4 sm:$0xff]  }
 0x6a2   :  { %6271 = vmatprep.subr.bf16.mxu1 %v11787_v35  ;;  %7123 = vmatpush1.bf16.msra.mxu0 %v11830_v12  ;;  %v11824_v35 = vld [vmem:[#allocation7 + $0x1708] ss:$16 sps:$4 sm:$0xff]   ;;  %v11875_v12 = vld [vmem:[#allocation7 + $0x1ae0] ss:$16 sps:$4 sm:$0xff]  }
 0x6a3   :  { %7124 = vmatprep.subr.bf16.mxu0 %v11835_v60  ;;  %v11880_v60 = vld [vmem:[#allocation7 + $0x18ec] ss:$16 sps:$4 sm:$0xff]  }
 0x6a5   :  { %6272 = vmatpush1.bf16.msra.mxu1 %v11785_v59  ;;  %v11868_v59 = vld [vmem:[#allocation7 + $0x1944] ss:$16 sps:$4 sm:$0xff]  }
 0x6a6   :  { %6273 = vmatprep.subr.bf16.mxu1 %v11790_v61  ;;  %7125 = vmatpush1.bf16.msra.mxu0 %v11833_v62  ;;  %v11866_v61 = vld [vmem:[#allocation7 + $0x1940] ss:$16 sps:$4 sm:$0xff]   ;;  %v11883_v62 = vld [vmem:[#allocation7 + $0x1ac4] ss:$16 sps:$4 sm:$0xff]  }
 0x6a7   :  { %7126 = vmatprep.subr.bf16.mxu0 %v11838_v16  ;;  %v11893_v16 = vld [vmem:[#allocation7 + $0x1a80] ss:$16 sps:$4 sm:$0xff]  }
 0x6a9   :  { %6274 = vmatpush1.bf16.msra.mxu1 %v11788_v11  ;;  %v11872_v11 = vld [vmem:[#allocation7 + $0x1900] ss:$16 sps:$4 sm:$0xff]  }
 0x6aa   :  { %6275 = vmatprep.subr.bf16.mxu1 %v11793_v57  ;;  %7127 = vmatpush1.bf16.msra.mxu0 %v11836_v18  ;;  %v11877_v57 = vld [vmem:[#allocation7 + $0x1ae4] ss:$16 sps:$4 sm:$0xff]   ;;  %v11899_v18 = vld [vmem:[#allocation7 + $0x1a60] ss:$16 sps:$4 sm:$0xff]  }
 0x6ab   :  { %7128 = vmatprep.subr.bf16.mxu0 %v11841_v20  ;;  %v11905_v20 = vld [vmem:[#allocation7 + $0x1a40] ss:$16 sps:$4 sm:$0xff]  }
 0x6ad   :  { %6276 = vmatpush1.bf16.msra.mxu1 %v11791_v13  ;;  %v11881_v13 = vld [vmem:[#allocation7 + $0x1ac0] ss:$16 sps:$4 sm:$0xff]  }
 0x6ae   :  { %6277 = vmatprep.subr.bf16.mxu1 %v11796_v15  ;;  %7129 = vmatpush1.bf16.msra.mxu0 %v11839_v23  ;;  %v11889_v15 = vld [vmem:[#allocation7 + $0x1aa4] ss:$16 sps:$4 sm:$0xff]   ;;  %v11911_v23 = vld [vmem:[#allocation7 + $0x1a20] ss:$16 sps:$4 sm:$0xff]  }
 0x6af   :  { %7130 = vmatprep.subr.bf16.mxu0 %v11844_v24  ;;  %v11917_v24 = vld [vmem:[#allocation7 + $0x1a00] ss:$16 sps:$4 sm:$0xff]  }
 0x6b1   :  { %6278 = vmatpush1.bf16.msra.mxu1 %v11794_v10  ;;  %v11895_v10 = vld [vmem:[#allocation7 + $0x1a84] ss:$16 sps:$4 sm:$0xff]  }
 0x6b2   :  { %6279 = vmatprep.subr.bf16.mxu1 %v11799_v19  ;;  %7131 = vmatpush1.bf16.msra.mxu0 %v11842_v28  ;;  %v11901_v19 = vld [vmem:[#allocation7 + $0x1a64] ss:$16 sps:$4 sm:$0xff]   ;;  %v11923_v28 = vld [vmem:[#allocation7 + $0x1be0] ss:$16 sps:$4 sm:$0xff]  }
 0x6b3   :  { %7132 = vmatprep.subr.bf16.mxu0 %v11847_v0  ;;  %v11929_v0 = vld [vmem:[#allocation7 + $0x1bc0] ss:$16 sps:$4 sm:$0xff]  }
 0x6b5   :  { %6280 = vmatpush1.bf16.msra.mxu1 %v11797_v21  ;;  %v11907_v21 = vld [vmem:[#allocation7 + $0x1a44] ss:$16 sps:$4 sm:$0xff]  }
 0x6b6   :  { %6281 = vmatprep.subr.bf16.mxu1 %v11802_v14  ;;  %7133 = vmatpush1.bf16.msra.mxu0 %v11845_v32  ;;  %v11913_v14 = vld [vmem:[#allocation7 + $0x1a24] ss:$16 sps:$4 sm:$0xff]   ;;  %v11935_v32 = vld [vmem:[#allocation7 + $0x1ba0] ss:$16 sps:$4 sm:$0xff]  }
 0x6b7   :  { %7134 = vmatprep.subr.bf16.mxu0 %v11850_v34  ;;  %v11941_v34 = vld [vmem:[#allocation7 + $0x1b80] ss:$16 sps:$4 sm:$0xff]  }
 0x6b9   :  { %6282 = vmatpush1.bf16.msra.mxu1 %v11800_v17  ;;  %v11919_v17 = vld [vmem:[#allocation7 + $0x1a04] ss:$16 sps:$4 sm:$0xff]  }
 0x6ba   :  { %6283 = vmatprep.subr.bf16.mxu1 %v11805_v29  ;;  %7135 = vmatpush1.bf16.msra.mxu0 %v11848_v25  ;;  %v11925_v29 = vld [vmem:[#allocation7 + $0x1be4] ss:$16 sps:$4 sm:$0xff]   ;;  %v11947_v25 = vld [vmem:[#allocation7 + $0x1b60] ss:$16 sps:$4 sm:$0xff]  }
 0x6bb   :  { %7136 = vmatprep.subr.bf16.mxu0 %v11853_v30  ;;  %v11955_v30 = vld [vmem:[#allocation7 + $0x1b44] ss:$16 sps:$4 sm:$0xff]  }
 0x6bd   :  { %6284 = vmatpush2.bf16.msra.mxu1 %v11803_v31  ;;  %v11931_v31 = vld [vmem:[#allocation7 + $0x1bc4] ss:$16 sps:$4 sm:$0xff]  }
 0x6be   :  { %6285 = vmatprep.subr.bf16.mxu1 %v11808_v33  ;;  %7137 = vmatpush2.bf16.msra.mxu0 %v11851_v43  ;;  %v11937_v33 = vld [vmem:[#allocation7 + $0x1ba4] ss:$16 sps:$4 sm:$0xff]  }
 0x6bf   :  { %7138 = vmatprep.subr.bf16.mxu0 %v11856_v45  ;;  %v11961_v45 = vld [vmem:[#allocation7 + $0x1b24] ss:$16 sps:$4 sm:$0xff]  }
 0x6c1   :  { %6286 = vmatpush2.bf16.msra.mxu1 %v11806_v36  ;;  %v11943_v36 = vld [vmem:[#allocation7 + $0x1b84] ss:$16 sps:$4 sm:$0xff]  }
 0x6c2   :  { %6287 = vmatprep.subr.bf16.mxu1 %v11811_v37  ;;  %7139 = vmatpush2.bf16.msra.mxu0 %v11854_v47  ;;  %v11949_v37 = vld [vmem:[#allocation7 + $0x1b64] ss:$16 sps:$4 sm:$0xff]  }
 0x6c3   :  { %7140 = vmatprep.subr.bf16.mxu0 %v11859_v50  ;;  %v11967_v50 = vld [vmem:[#allocation7 + $0x1b04] ss:$16 sps:$4 sm:$0xff]  }
 0x6c5   :  { %6288 = vmatpush2.bf16.msra.mxu1 %v11809_v39  ;;  %v11953_v39 = vld [vmem:[#allocation7 + $0x1b40] ss:$16 sps:$4 sm:$0xff]  }
 0x6c6   :  { %6289 = vmatprep.subr.bf16.mxu1 %v11814_v8  ;;  %7141 = vmatpush2.bf16.msra.mxu0 %v11857_v51  ;;  %v11973_v51 = vld [vmem:[#allocation7 + $0x1aec] ss:$16 sps:$4 sm:$0xff]  }
 0x6c7   :  { %7142 = vmatprep.subr.bf16.mxu0 %v11862_v44 }
 0x6c9   :  { %6290 = vmatpush2.bf16.msra.mxu1 %v11812_v46  ;;  %v11959_v46 = vld [vmem:[#allocation7 + $0x1b20] ss:$16 sps:$4 sm:$0xff]  }
 0x6ca   :  { %6291 = vmatprep.subr.bf16.mxu1 %v11817_v48  ;;  %7143 = vmatpush2.bf16.msra.mxu0 %v11860_v54 }
 0x6cb   :  { %7144 = vmatprep.subr.bf16.mxu0 %v11865_v40 }
 0x6cd   :  { %6292 = vmatpush2.bf16.msra.mxu1 %v11815_v38  ;;  %v11965_v38 = vld [vmem:[#allocation7 + $0x1b00] ss:$16 sps:$4 sm:$0xff]  }
 0x6ce   :  { %6293 = vmatprep.subr.bf16.mxu1 %v11820_v52  ;;  %7145 = vmatpush2.bf16.msra.mxu0 %v11863_v56  ;;  %v12810_v52 = vld [vmem:[#allocation9 + $0x14] sm:$0xf] }
 0x6cf   :  { %7146 = vmatprep.subr.bf16.mxu0 %v11868_v59  ;;  %v6127_v44 = vrot.slane %v12810_v52, %v12656_v3 }
 0x6d1   :  { %6294 = vmatpush2.bf16.msra.mxu1 %v11818_v53  ;;  %v6131_v53 = vrot.slane %v12810_v52, %v12659_v4 }
 0x6d2   :  { %6295 = vmatprep.subr.bf16.mxu1 %v11823_v22  ;;  %7147 = vmatpush2.bf16.msra.mxu0 %v11866_v61 }
 0x6d3   :  { %7148 = vmatprep.subr.bf16.mxu0 %v11871_v63 }
 0x6d5   :  { %6296 = vmatpush2.bf16.msra.mxu1 %v11821_v55 }
 0x6d6   :  { %6297 = vmatprep.subr.bf16.mxu1 %v11826_v58  ;;  %7149 = vmatpush2.bf16.msra.mxu0 %v11869_v7 }
 0x6d7   :  { %7150 = vmatprep.subr.bf16.mxu0 %v11874_v9 }
 0x6d9   :  { %6298 = vmatpush2.bf16.msra.mxu1 %v11824_v35 }
 0x6da   :  { %7151 = vmatpush2.bf16.msra.mxu0 %v11872_v11  ;;  %7161 = vmatprep.subr.bf16.mxu1 %v11877_v57 }
 0x6db   :  { %7202 = vmatprep.subr.bf16.mxu0 %v11880_v60 }
 0x6dc   :  { %6300 = vmatmul.mubr.bf16.vlgmr.msra.gmra.mxu1 %v12805_v49  ;;  %v11887_v49 = vld [vmem:[#allocation7 + $0x1aa0] ss:$16 sps:$4 sm:$0xff]  }
 0x6dd   :  { %7162 = vmatpush1.bf16.msra.mxu1 %v11875_v12 }
 0x6de   :  { %7163 = vmatprep.subr.bf16.mxu1 %v11883_v62 }
 0x6e1   :  { %7164 = vmatpush1.bf16.msra.mxu1 %v11881_v13 }
 0x6e2   :  { %7165 = vmatprep.subr.bf16.mxu1 %v11889_v15  ;;  %v11878_v15 = vld [vmem:[#allocation7 + $0x18e8] ss:$16 sps:$4 sm:$0xff]  }
 0x6e5   :  { %7166 = vmatpush1.bf16.msra.mxu1 %v11887_v49 }
 0x6e6   :  { %7167 = vmatprep.subr.bf16.mxu1 %v11895_v10  ;;  %v11886_v10 = vld [vmem:[#allocation7 + $0x18cc] ss:$16 sps:$4 sm:$0xff]  }
 0x6e9   :  { %7168 = vmatpush1.bf16.msra.mxu1 %v11893_v16 }
 0x6ea   :  { %7169 = vmatprep.subr.bf16.mxu1 %v11901_v19  ;;  %v11892_v19 = vld [vmem:[#allocation7 + $0x18ac] ss:$16 sps:$4 sm:$0xff]  }
 0x6ed   :  { %7170 = vmatpush1.bf16.msra.mxu1 %v11899_v18  ;;  %v11884_v18 = vld [vmem:[#allocation7 + $0x18c8] ss:$16 sps:$4 sm:$0xff]  }
 0x6ee   :  { %7171 = vmatprep.subr.bf16.mxu1 %v11907_v21  ;;  %v11898_v21 = vld [vmem:[#allocation7 + $0x188c] ss:$16 sps:$4 sm:$0xff]  }
 0x6f1   :  { %7172 = vmatpush1.bf16.msra.mxu1 %v11905_v20  ;;  %v11890_v20 = vld [vmem:[#allocation7 + $0x18a8] ss:$16 sps:$4 sm:$0xff]  }
 0x6f2   :  { %7173 = vmatprep.subr.bf16.mxu1 %v11913_v14  ;;  %v11904_v14 = vld [vmem:[#allocation7 + $0x186c] ss:$16 sps:$4 sm:$0xff]  }
 0x6f5   :  { %7174 = vmatpush1.bf16.msra.mxu1 %v11911_v23  ;;  %v11896_v23 = vld [vmem:[#allocation7 + $0x1888] ss:$16 sps:$4 sm:$0xff]  }
 0x6f6   :  { %7175 = vmatprep.subr.bf16.mxu1 %v11919_v17  ;;  %v11910_v17 = vld [vmem:[#allocation7 + $0x184c] ss:$16 sps:$4 sm:$0xff]  }
 0x6f9   :  { %7176 = vmatpush1.bf16.msra.mxu1 %v11917_v24  ;;  %v11902_v24 = vld [vmem:[#allocation7 + $0x1868] ss:$16 sps:$4 sm:$0xff]  }
 0x6fa   :  { %7177 = vmatprep.subr.bf16.mxu1 %v11925_v29  ;;  %v11916_v29 = vld [vmem:[#allocation7 + $0x182c] ss:$16 sps:$4 sm:$0xff]  }
 0x6fd   :  { %7178 = vmatpush2.bf16.msra.mxu1 %v11923_v28  ;;  %v11908_v28 = vld [vmem:[#allocation7 + $0x1848] ss:$16 sps:$4 sm:$0xff]  }
 0x6fe   :  { %7179 = vmatprep.subr.bf16.mxu1 %v11931_v31  ;;  %v11922_v31 = vld [vmem:[#allocation7 + $0x180c] ss:$16 sps:$4 sm:$0xff]  }
 0x701   :  { %7180 = vmatpush2.bf16.msra.mxu1 %v11929_v0  ;;  %v11914_v0 = vld [vmem:[#allocation7 + $0x1828] ss:$16 sps:$4 sm:$0xff]  }
 0x702   :  { %7181 = vmatprep.subr.bf16.mxu1 %v11937_v33  ;;  %v11928_v33 = vld [vmem:[#allocation7 + $0x19ec] ss:$16 sps:$4 sm:$0xff]  }
 0x705   :  { %7182 = vmatpush2.bf16.msra.mxu1 %v11935_v32  ;;  %v11920_v32 = vld [vmem:[#allocation7 + $0x1808] ss:$16 sps:$4 sm:$0xff]  }
 0x706   :  { %7183 = vmatprep.subr.bf16.mxu1 %v11943_v36  ;;  %v11934_v36 = vld [vmem:[#allocation7 + $0x19cc] ss:$16 sps:$4 sm:$0xff]  }
 0x709   :  { %7184 = vmatpush2.bf16.msra.mxu1 %v11941_v34  ;;  %v11926_v34 = vld [vmem:[#allocation7 + $0x19e8] ss:$16 sps:$4 sm:$0xff]  }
 0x70a   :  { %7185 = vmatprep.subr.bf16.mxu1 %v11949_v37  ;;  %v11940_v37 = vld [vmem:[#allocation7 + $0x19ac] ss:$16 sps:$4 sm:$0xff]  }
 0x70d   :  { %7186 = vmatpush2.bf16.msra.mxu1 %v11947_v25  ;;  %v11932_v25 = vld [vmem:[#allocation7 + $0x19c8] ss:$16 sps:$4 sm:$0xff]  }
 0x70e   :  { %7187 = vmatprep.subr.bf16.mxu1 %v11955_v30  ;;  %v11938_v30 = vld [vmem:[#allocation7 + $0x19a8] ss:$16 sps:$4 sm:$0xff]  }
 0x711   :  { %7188 = vmatpush2.bf16.msra.mxu1 %v11953_v39  ;;  %v11946_v39 = vld [vmem:[#allocation7 + $0x198c] ss:$16 sps:$4 sm:$0xff]  }
 0x712   :  { %7189 = vmatprep.subr.bf16.mxu1 %v11961_v45  ;;  %v11950_v45 = vld [vmem:[#allocation7 + $0x1968] ss:$16 sps:$4 sm:$0xff]  }
 0x715   :  { %7190 = vmatpush2.bf16.msra.mxu1 %v11959_v46  ;;  %v6135_v46 = vrot.slane %v12810_v52, %v12662_v5 }
 0x716   :  { %7191 = vmatprep.subr.bf16.mxu1 %v11967_v50  ;;  %v11956_v50 = vld [vmem:[#allocation7 + $0x1948] ss:$16 sps:$4 sm:$0xff]  }
 0x719   :  { %7192 = vmatpush2.bf16.msra.mxu1 %v11965_v38 }
 0x71a   :  { %7243 = vmatprep.subr.bf16.mxu1 %v11973_v51  ;;  %v11964_v51 = vld [vmem:[#allocation7 + $0x192c] ss:$16 sps:$4 sm:$0xff]  }
 0x71c   :  { %v6178_v43 = vpop.f32.mrf.mxu0 }
 0x71d   :  { %v6179_v54 = vadd.f32 %v6178_v43, %v6127_v44  ;;  %v11944_v43 = vld [vmem:[#allocation7 + $0x1988] ss:$16 sps:$4 sm:$0xff]  }
 0x71e   :  { %v6180_v8 = vpop.f32.mrf.mxu0 }
 0x71f   :  { %v6181_v55 = vadd.f32 %v6180_v8, %v6131_v53  ;;  %v11952_v8 = vld [vmem:[#allocation7 + $0x196c] ss:$16 sps:$4 sm:$0xff]  }
 0x720   :  { %v6182_v47 = vpop.f32.mrf.mxu0 }
 0x721   :  { %v11958_v47 = vld [vmem:[#allocation7 + $0x194c] ss:$16 sps:$4 sm:$0xff]  }
 0x722   :  { %v6183_v48 = vpop.f32.mrf.mxu0 }
 0x723   :  { %v6139_v48 = vrot.slane %v12810_v52, %v12665_v6 }
 0x75c   :  { %v6219_v22 = vpop.f32.mrf.mxu1  ;;  %v12816_v40 = vpop.f32.mrf.mxu0 }
 0x75d   :  { %v6220_v56 = vadd.f32 %v6219_v22, %v6179_v54  ;;  %v6261_v38 = vadd.f32 %v12816_v40, %v6135_v46  ;;  %v11968_v40 = vld [vmem:[#allocation7 + $0x1908] ss:$16 sps:$4 sm:$0xff]   ;;  %v12037_v46 = vld [vmem:[#allocation7 + $0x1c20] ss:$16 sps:$4 sm:$0xff]  }
 0x75e   :  { %v6221_v58 = vpop.f32.mrf.mxu1  ;;  %v12818_v35 = vpop.f32.mrf.mxu0 }
 0x75f   :  { %vm6308_vm6 = vcmp.ge.f32.partialorder %v6220_v56, 0.0  ;;  %v6312_v59 = vmul.f32 0.2, %v6220_v56  ;;  %v6222_v61 = vadd.f32 %v6221_v58, %v6181_v55  ;;  %v6263_v53 = vadd.f32 %v12818_v35, %v6139_v48  ;;  %v11962_v55 = vld [vmem:[#allocation7 + $0x1928] ss:$16 sps:$4 sm:$0xff]  }
 0x760   :  { %v6223_v63 = vpop.f32.mrf.mxu1  ;;  %v6264_v7 = vpop.f32.mrf.mxu0  ;;  %v12042_v48 = vld [vmem:[#allocation7 + $0x1c04] ss:$16 sps:$4 sm:$0xff]  }
 0x761   :  { %v6316_v9 = vsel %vm6308_vm6, %v6220_v56, %v6312_v59  ;;  %vm6309_vm7 = vcmp.ge.f32.partialorder %v6222_v61, 0.0  ;;  %v6313_v11 = vmul.f32 0.2, %v6222_v61  ;;  %v11970_v59 = vld [vmem:[#allocation7 + $0x190c] ss:$16 sps:$4 sm:$0xff]   ;;  %vm9356_vm6 = vcmask 64512  }
 0x762   :  { %v6224_v12 = vpop.f32.mrf.mxu1  ;;  %v6265_v57 = vpop.f32.mrf.mxu0  ;;  %v6320_v60 = vmul.f32 1.4142135, %v6316_v9 }
 0x763   :  { %v6317_v13 = vsel %vm6309_vm7, %v6222_v61, %v6313_v11  ;;  %v11971_v57 = vld [vmem:[#allocation7 + $0x1ae8] ss:$16 sps:$4 sm:$0xff]  }
 0x764   :  { %v6321_v62 = vmul.f32 1.4142135, %v6317_v13  ;;  %v12820_v16 = vpack.c.bf16 %v6320_v60, %v6320_v60  ;;  %v11976_v13 = vld [vmem:[#allocation7 + $0x1acc] ss:$16 sps:$4 sm:$0xff]  }
 0x766   :  { %v6325_v49 = vpack.c.bf16 %v6321_v62, %v6321_v62  ;;  %v11974_v62 = vld [vmem:[#allocation7 + $0x1ac8] ss:$16 sps:$4 sm:$0xff]  }
 0x768   :  { %7152 = vmatprep.mubr.bf16.mxu0 %v6325_v49 }
 0x769   :  { %7153 = vmatmul.mubr.bf16.vlgmr.msra.gmra.mxu0 %v12820_v16 }
 0x76a   :  { %7203 = vmatpush1.bf16.msra.mxu0 %v11878_v15  ;;  %7234 = vmatprep.mubr.bf16.mxu0 %v6325_v49  ;;  %v11979_v49 = vld [vmem:[#allocation7 + $0x1aac] ss:$16 sps:$4 sm:$0xff]   ;;  %v11977_v15 = vld [vmem:[#allocation7 + $0x1aa8] ss:$16 sps:$4 sm:$0xff]  }
 0x76b   :  { %7204 = vmatprep.subr.bf16.mxu0 %v11886_v10  ;;  %v11982_v10 = vld [vmem:[#allocation7 + $0x1a8c] ss:$16 sps:$4 sm:$0xff]  }
 0x76e   :  { %7205 = vmatpush1.bf16.msra.mxu0 %v11884_v18  ;;  %v12019_v18 = vld [vmem:[#allocation7 + $0x1ce0] ss:$16 sps:$4 sm:$0xff]  }
 0x76f   :  { %7206 = vmatprep.subr.bf16.mxu0 %v11892_v19  ;;  %v12021_v19 = vld [vmem:[#allocation7 + $0x1ce4] ss:$16 sps:$4 sm:$0xff]  }
 0x772   :  { %7207 = vmatpush1.bf16.msra.mxu0 %v11890_v20  ;;  %v12024_v20 = vld [vmem:[#allocation7 + $0x1cc4] ss:$16 sps:$4 sm:$0xff]  }
 0x773   :  { %7208 = vmatprep.subr.bf16.mxu0 %v11898_v21  ;;  %v11980_v21 = vld [vmem:[#allocation7 + $0x1a88] ss:$16 sps:$4 sm:$0xff]  }
 0x776   :  { %7209 = vmatpush1.bf16.msra.mxu0 %v11896_v23  ;;  %v12022_v23 = vld [vmem:[#allocation7 + $0x1cc0] ss:$16 sps:$4 sm:$0xff]  }
 0x777   :  { %7210 = vmatprep.subr.bf16.mxu0 %v11904_v14  ;;  %v11985_v14 = vld [vmem:[#allocation7 + $0x1a6c] ss:$16 sps:$4 sm:$0xff]  }
 0x77a   :  { %7211 = vmatpush1.bf16.msra.mxu0 %v11902_v24  ;;  %v11983_v24 = vld [vmem:[#allocation7 + $0x1a68] ss:$16 sps:$4 sm:$0xff]  }
 0x77b   :  { %7212 = vmatprep.subr.bf16.mxu0 %v11910_v17  ;;  %v12025_v17 = vld [vmem:[#allocation7 + $0x1ca0] ss:$16 sps:$4 sm:$0xff]  }
 0x77e   :  { %7213 = vmatpush1.bf16.msra.mxu0 %v11908_v28  ;;  %v11988_v28 = vld [vmem:[#allocation7 + $0x1a4c] ss:$16 sps:$4 sm:$0xff]  }
 0x77f   :  { %7214 = vmatprep.subr.bf16.mxu0 %v11916_v29  ;;  %v12030_v29 = vld [vmem:[#allocation7 + $0x1c84] ss:$16 sps:$4 sm:$0xff]  }
 0x782   :  { %7215 = vmatpush1.bf16.msra.mxu0 %v11914_v0  ;;  %v11986_v0 = vld [vmem:[#allocation7 + $0x1a48] ss:$16 sps:$4 sm:$0xff]  }
 0x783   :  { %7216 = vmatprep.subr.bf16.mxu0 %v11922_v31  ;;  %v12028_v31 = vld [vmem:[#allocation7 + $0x1c80] ss:$16 sps:$4 sm:$0xff]  }
 0x786   :  { %7217 = vmatpush1.bf16.msra.mxu0 %v11920_v32  ;;  %v11991_v32 = vld [vmem:[#allocation7 + $0x1a2c] ss:$16 sps:$4 sm:$0xff]  }
 0x787   :  { %7218 = vmatprep.subr.bf16.mxu0 %v11928_v33  ;;  %v12033_v33 = vld [vmem:[#allocation7 + $0x1c64] ss:$16 sps:$4 sm:$0xff]  }
 0x78a   :  { %7219 = vmatpush2.bf16.msra.mxu0 %v11926_v34  ;;  %v11989_v34 = vld [vmem:[#allocation7 + $0x1a28] ss:$16 sps:$4 sm:$0xff]  }
 0x78b   :  { %7220 = vmatprep.subr.bf16.mxu0 %v11934_v36  ;;  %v12031_v36 = vld [vmem:[#allocation7 + $0x1c60] ss:$16 sps:$4 sm:$0xff]  }
 0x78e   :  { %7221 = vmatpush2.bf16.msra.mxu0 %v11932_v25  ;;  %v11994_v25 = vld [vmem:[#allocation7 + $0x1a0c] ss:$16 sps:$4 sm:$0xff]  }
 0x78f   :  { %7222 = vmatprep.subr.bf16.mxu0 %v11940_v37  ;;  %v12036_v37 = vld [vmem:[#allocation7 + $0x1c44] ss:$16 sps:$4 sm:$0xff]  }
 0x792   :  { %7223 = vmatpush2.bf16.msra.mxu0 %v11938_v30  ;;  %v11992_v30 = vld [vmem:[#allocation7 + $0x1a08] ss:$16 sps:$4 sm:$0xff]  }
 0x793   :  { %7224 = vmatprep.subr.bf16.mxu0 %v11946_v39  ;;  %v12034_v39 = vld [vmem:[#allocation7 + $0x1c40] ss:$16 sps:$4 sm:$0xff]  }
 0x796   :  { %7225 = vmatpush2.bf16.msra.mxu0 %v11944_v43  ;;  %v11997_v43 = vld [vmem:[#allocation7 + $0x1bec] ss:$16 sps:$4 sm:$0xff]  }
 0x797   :  { %7226 = vmatprep.subr.bf16.mxu0 %v11952_v8  ;;  %v12039_v8 = vld [vmem:[#allocation7 + $0x1c24] ss:$16 sps:$4 sm:$0xff]  }
 0x79a   :  { %7227 = vmatpush2.bf16.msra.mxu0 %v11950_v45  ;;  %v11995_v45 = vld [vmem:[#allocation7 + $0x1be8] ss:$16 sps:$4 sm:$0xff]  }
 0x79b   :  { %7228 = vmatprep.subr.bf16.mxu0 %v11958_v47  ;;  %v12000_v47 = vld [vmem:[#allocation7 + $0x1bcc] ss:$16 sps:$4 sm:$0xff]  }
 0x79c   :  { %v6301_v44 = vpop.f32.mrf.mxu1 }
 0x79d   :  { %v6302_v54 = vadd.f32 %v6301_v44, %v6261_v38  ;;  %v12040_v38 = vld [vmem:[#allocation7 + $0x1c00] ss:$16 sps:$4 sm:$0xff]   ;;  %v12045_v44 = vld [vmem:[#allocation7 + $0x1de4] ss:$16 sps:$4 sm:$0xff]  }
 0x79e   :  { %v6303_v22 = vpop.f32.mrf.mxu1  ;;  %7229 = vmatpush2.bf16.msra.mxu0 %v11956_v50  ;;  %v11998_v50 = vld [vmem:[#allocation7 + $0x1bc8] ss:$16 sps:$4 sm:$0xff]  }
 0x79f   :  { %vm6310_vm8 = vcmp.ge.f32.partialorder %v6302_v54, 0.0  ;;  %v6314_v56 = vmul.f32 0.2, %v6302_v54  ;;  %v6304_v58 = vadd.f32 %v6303_v22, %v6263_v53  ;;  %7230 = vmatprep.subr.bf16.mxu0 %v11964_v51  ;;  %v12003_v51 = vld [vmem:[#allocation7 + $0x1bac] ss:$16 sps:$4 sm:$0xff]  }
 0x7a0   :  { %v6305_v61 = vpop.f32.mrf.mxu1  ;;  %v12001_v53 = vld [vmem:[#allocation7 + $0x1ba8] ss:$16 sps:$4 sm:$0xff]   ;;  %v12006_v22 = vld [vmem:[#allocation7 + $0x1b8c] ss:$16 sps:$4 sm:$0xff]  }
 0x7a1   :  { %v6318_v52 = vsel %vm6310_vm8, %v6302_v54, %v6314_v56  ;;  %vm6311_vm9 = vcmp.ge.f32.partialorder %v6304_v58, 0.0  ;;  %v6315_v63 = vmul.f32 0.2, %v6304_v58  ;;  %v12043_v54 = vld [vmem:[#allocation7 + $0x1de0] ss:$16 sps:$4 sm:$0xff]  }
 0x7a2   :  { %v6306_v7 = vpop.f32.mrf.mxu1  ;;  %7231 = vmatpush2.bf16.msra.mxu0 %v11962_v55  ;;  %v6322_v9 = vmul.f32 1.4142135, %v6318_v52  ;;  %v12048_v55 = vld [vmem:[#allocation7 + $0x1dc4] ss:$16 sps:$4 sm:$0xff]   ;;  %v12004_v56 = vld [vmem:[#allocation7 + $0x1b88] ss:$16 sps:$4 sm:$0xff]  }
 0x7a3   :  { %7232 = vmatprep.subr.bf16.mxu0 %v11970_v59  ;;  %v6319_v11 = vsel %vm6311_vm9, %v6304_v58, %v6315_v63  ;;  %v12046_v58 = vld [vmem:[#allocation7 + $0x1dc0] ss:$16 sps:$4 sm:$0xff]   ;;  %v12009_v59 = vld [vmem:[#allocation7 + $0x1b6c] ss:$16 sps:$4 sm:$0xff]   ;;  %v12051_v61 = vld [vmem:[#allocation7 + $0x1da4] ss:$16 sps:$4 sm:$0xff]  }
 0x7a4   :  { %v6323_v35 = vmul.f32 1.4142135, %v6319_v11  ;;  %v12829_v60 = vpack.c.bf16 %v6322_v9, %v6322_v9  ;;  %v12007_v52 = vld [vmem:[#allocation7 + $0x1b68] ss:$16 sps:$4 sm:$0xff]   ;;  %v12049_v63 = vld [vmem:[#allocation7 + $0x1da0] ss:$16 sps:$4 sm:$0xff]  }
 0x7a5   :  { %v12012_v7 = vld [vmem:[#allocation7 + $0x1b4c] ss:$16 sps:$4 sm:$0xff]   ;;  %v12010_v9 = vld [vmem:[#allocation7 + $0x1b48] ss:$16 sps:$4 sm:$0xff]   ;;  %v12052_v11 = vld [vmem:[#allocation7 + $0x1d80] ss:$16 sps:$4 sm:$0xff]  }
 0x7a6   :  { %7233 = vmatpush2.bf16.msra.mxu0 %v11968_v40  ;;  %v6327_v12 = vpack.c.bf16 %v6323_v35, %v6323_v35  ;;  %v12054_v40 = vld [vmem:[#allocation7 + $0x1d84] ss:$16 sps:$4 sm:$0xff]   ;;  %v12015_v35 = vld [vmem:[#allocation7 + $0x1b2c] ss:$16 sps:$4 sm:$0xff]  }
 0x7a7   :  { %8096 = vmatprep.subr.bf16.mxu0 %v12021_v19  ;;  %v12061_v19 = vld [vmem:[#allocation7 + $0x1d20] ss:$16 sps:$4 sm:$0xff]  }
 0x7a8   :  { %7193 = vmatprep.mubr.bf16.mxu1 %v6327_v12 }
 0x7a9   :  { %7194 = vmatmul.mubr.bf16.vlgmr.msra.gmra.mxu1 %v12829_v60  ;;  %7235 = vmatmul.mubr.bf16.vlgmr.msra.gmra.mxu0 %v12820_v16  ;;  %v12027_v16 = vld [vmem:[#allocation7 + $0x1ca4] ss:$16 sps:$4 sm:$0xff]  }
 0x7aa   :  { %7244 = vmatpush1.bf16.msra.mxu1 %v11971_v57  ;;  %7275 = vmatprep.mubr.bf16.mxu1 %v6327_v12  ;;  %v12057_v12 = vld [vmem:[#allocation7 + $0x1d64] ss:$16 sps:$4 sm:$0xff]   ;;  %v12013_v57 = vld [vmem:[#allocation7 + $0x1b28] ss:$16 sps:$4 sm:$0xff]  }
 0x7ab   :  { %7245 = vmatprep.subr.bf16.mxu1 %v11976_v13  ;;  %8097 = vmatpush1.bf16.msra.mxu0 %v12019_v18  ;;  %v12055_v13 = vld [vmem:[#allocation7 + $0x1d60] ss:$16 sps:$4 sm:$0xff]   ;;  %v12063_v18 = vld [vmem:[#allocation7 + $0x1d24] ss:$16 sps:$4 sm:$0xff]  }
 0x7ac   :  { %8098 = vmatprep.subr.bf16.mxu0 %v12024_v20  ;;  %v12066_v20 = vld [vmem:[#allocation7 + $0x1d04] ss:$16 sps:$4 sm:$0xff]  }
 0x7ae   :  { %7246 = vmatpush1.bf16.msra.mxu1 %v11974_v62  ;;  %v12018_v62 = vld [vmem:[#allocation7 + $0x1b0c] ss:$16 sps:$4 sm:$0xff]  }
 0x7af   :  { %7247 = vmatprep.subr.bf16.mxu1 %v11979_v49  ;;  %8099 = vmatpush1.bf16.msra.mxu0 %v12022_v23  ;;  %v12016_v49 = vld [vmem:[#allocation7 + $0x1b08] ss:$16 sps:$4 sm:$0xff]   ;;  %v12067_v23 = vld [vmem:[#allocation7 + $0x1ee0] ss:$16 sps:$4 sm:$0xff]  }
 0x7b0   :  { %8100 = vmatprep.subr.bf16.mxu0 %v12027_v16  ;;  %v12072_v16 = vld [vmem:[#allocation7 + $0x1cec] ss:$16 sps:$4 sm:$0xff]  }
 0x7b2   :  { %7248 = vmatpush1.bf16.msra.mxu1 %v11977_v15  ;;  %v12060_v15 = vld [vmem:[#allocation7 + $0x1d44] ss:$16 sps:$4 sm:$0xff]  }
 0x7b3   :  { %7249 = vmatprep.subr.bf16.mxu1 %v11982_v10  ;;  %8101 = vmatpush1.bf16.msra.mxu0 %v12025_v17  ;;  %v12058_v10 = vld [vmem:[#allocation7 + $0x1d40] ss:$16 sps:$4 sm:$0xff]   ;;  %v12075_v17 = vld [vmem:[#allocation7 + $0x1ec4] ss:$16 sps:$4 sm:$0xff]  }
 0x7b4   :  { %8102 = vmatprep.subr.bf16.mxu0 %v12030_v29  ;;  %v12085_v29 = vld [vmem:[#allocation7 + $0x1e80] ss:$16 sps:$4 sm:$0xff]  }
 0x7b6   :  { %7250 = vmatpush1.bf16.msra.mxu1 %v11980_v21  ;;  %v12064_v21 = vld [vmem:[#allocation7 + $0x1d00] ss:$16 sps:$4 sm:$0xff]  }
 0x7b7   :  { %7251 = vmatprep.subr.bf16.mxu1 %v11985_v14  ;;  %8103 = vmatpush1.bf16.msra.mxu0 %v12028_v31  ;;  %v12069_v14 = vld [vmem:[#allocation7 + $0x1ee4] ss:$16 sps:$4 sm:$0xff]   ;;  %v12091_v31 = vld [vmem:[#allocation7 + $0x1e60] ss:$16 sps:$4 sm:$0xff]  }
 0x7b8   :  { %8104 = vmatprep.subr.bf16.mxu0 %v12033_v33  ;;  %v12097_v33 = vld [vmem:[#allocation7 + $0x1e40] ss:$16 sps:$4 sm:$0xff]  }
 0x7ba   :  { %7252 = vmatpush1.bf16.msra.mxu1 %v11983_v24  ;;  %v12073_v24 = vld [vmem:[#allocation7 + $0x1ec0] ss:$16 sps:$4 sm:$0xff]  }
 0x7bb   :  { %7253 = vmatprep.subr.bf16.mxu1 %v11988_v28  ;;  %8105 = vmatpush1.bf16.msra.mxu0 %v12031_v36  ;;  %v12081_v28 = vld [vmem:[#allocation7 + $0x1ea4] ss:$16 sps:$4 sm:$0xff]   ;;  %v12103_v36 = vld [vmem:[#allocation7 + $0x1e20] ss:$16 sps:$4 sm:$0xff]  }
 0x7bc   :  { %8106 = vmatprep.subr.bf16.mxu0 %v12036_v37  ;;  %v12109_v37 = vld [vmem:[#allocation7 + $0x1e00] ss:$16 sps:$4 sm:$0xff]  }
 0x7be   :  { %7254 = vmatpush1.bf16.msra.mxu1 %v11986_v0  ;;  %v12087_v0 = vld [vmem:[#allocation7 + $0x1e84] ss:$16 sps:$4 sm:$0xff]  }
 0x7bf   :  { %7255 = vmatprep.subr.bf16.mxu1 %v11991_v32  ;;  %8107 = vmatpush1.bf16.msra.mxu0 %v12034_v39  ;;  %v12093_v32 = vld [vmem:[#allocation7 + $0x1e64] ss:$16 sps:$4 sm:$0xff]   ;;  %v12115_v39 = vld [vmem:[#allocation7 + $0x1fe0] ss:$16 sps:$4 sm:$0xff]  }
 0x7c0   :  { %8108 = vmatprep.subr.bf16.mxu0 %v12039_v8  ;;  %v12121_v8 = vld [vmem:[#allocation7 + $0x1fc0] ss:$16 sps:$4 sm:$0xff]  }
 0x7c2   :  { %7256 = vmatpush1.bf16.msra.mxu1 %v11989_v34  ;;  %v12099_v34 = vld [vmem:[#allocation7 + $0x1e44] ss:$16 sps:$4 sm:$0xff]  }
 0x7c3   :  { %7257 = vmatprep.subr.bf16.mxu1 %v11994_v25  ;;  %8109 = vmatpush1.bf16.msra.mxu0 %v12037_v46  ;;  %v12105_v25 = vld [vmem:[#allocation7 + $0x1e24] ss:$16 sps:$4 sm:$0xff]   ;;  %v12127_v46 = vld [vmem:[#allocation7 + $0x1fa0] ss:$16 sps:$4 sm:$0xff]  }
 0x7c4   :  { %8110 = vmatprep.subr.bf16.mxu0 %v12042_v48  ;;  %v12133_v48 = vld [vmem:[#allocation7 + $0x1f80] ss:$16 sps:$4 sm:$0xff]  }
 0x7c6   :  { %7258 = vmatpush1.bf16.msra.mxu1 %v11992_v30  ;;  %v12111_v30 = vld [vmem:[#allocation7 + $0x1e04] ss:$16 sps:$4 sm:$0xff]  }
 0x7c7   :  { %7259 = vmatprep.subr.bf16.mxu1 %v11997_v43  ;;  %8111 = vmatpush1.bf16.msra.mxu0 %v12040_v38  ;;  %v12117_v43 = vld [vmem:[#allocation7 + $0x1fe4] ss:$16 sps:$4 sm:$0xff]   ;;  %v12139_v38 = vld [vmem:[#allocation7 + $0x1f60] ss:$16 sps:$4 sm:$0xff]  }
 0x7c8   :  { %8112 = vmatprep.subr.bf16.mxu0 %v12045_v44  ;;  %v12147_v44 = vld [vmem:[#allocation7 + $0x1f44] ss:$16 sps:$4 sm:$0xff]  }
 0x7ca   :  { %7260 = vmatpush2.bf16.msra.mxu1 %v11995_v45  ;;  %v12123_v45 = vld [vmem:[#allocation7 + $0x1fc4] ss:$16 sps:$4 sm:$0xff]  }
 0x7cb   :  { %7261 = vmatprep.subr.bf16.mxu1 %v12000_v47  ;;  %8113 = vmatpush2.bf16.msra.mxu0 %v12043_v54  ;;  %v12129_v47 = vld [vmem:[#allocation7 + $0x1fa4] ss:$16 sps:$4 sm:$0xff]  }
 0x7cc   :  { %8114 = vmatprep.subr.bf16.mxu0 %v12048_v55  ;;  %v12153_v55 = vld [vmem:[#allocation7 + $0x1f24] ss:$16 sps:$4 sm:$0xff]  }
 0x7ce   :  { %7262 = vmatpush2.bf16.msra.mxu1 %v11998_v50  ;;  %v12135_v50 = vld [vmem:[#allocation7 + $0x1f84] ss:$16 sps:$4 sm:$0xff]  }
 0x7cf   :  { %7263 = vmatprep.subr.bf16.mxu1 %v12003_v51  ;;  %8115 = vmatpush2.bf16.msra.mxu0 %v12046_v58  ;;  %v12141_v51 = vld [vmem:[#allocation7 + $0x1f64] ss:$16 sps:$4 sm:$0xff]  }
 0x7d0   :  { %8116 = vmatprep.subr.bf16.mxu0 %v12051_v61  ;;  %v12159_v61 = vld [vmem:[#allocation7 + $0x1f04] ss:$16 sps:$4 sm:$0xff]  }
 0x7d2   :  { %7264 = vmatpush2.bf16.msra.mxu1 %v12001_v53  ;;  %v12145_v53 = vld [vmem:[#allocation7 + $0x1f40] ss:$16 sps:$4 sm:$0xff]  }
 0x7d3   :  { %7265 = vmatprep.subr.bf16.mxu1 %v12006_v22  ;;  %8117 = vmatpush2.bf16.msra.mxu0 %v12049_v63  ;;  %v12165_v63 = vld [vmem:[#allocation7 + $0x1eec] ss:$16 sps:$4 sm:$0xff]  }
 0x7d4   :  { %8118 = vmatprep.subr.bf16.mxu0 %v12054_v40 }
 0x7d6   :  { %7266 = vmatpush2.bf16.msra.mxu1 %v12004_v56  ;;  %v12151_v56 = vld [vmem:[#allocation7 + $0x1f20] ss:$16 sps:$4 sm:$0xff]  }
 0x7d7   :  { %7267 = vmatprep.subr.bf16.mxu1 %v12009_v59  ;;  %8119 = vmatpush2.bf16.msra.mxu0 %v12052_v11 }
 0x7d8   :  { %8120 = vmatprep.subr.bf16.mxu0 %v12057_v12 }
 0x7da   :  { %7268 = vmatpush2.bf16.msra.mxu1 %v12007_v52  ;;  %v12157_v52 = vld [vmem:[#allocation7 + $0x1f00] ss:$16 sps:$4 sm:$0xff]  }
 0x7db   :  { %7269 = vmatprep.subr.bf16.mxu1 %v12012_v7  ;;  %8121 = vmatpush2.bf16.msra.mxu0 %v12055_v13  ;;  %v12834_v7 = vld [vmem:[#allocation9 + $0x18] sm:$0xf] }
 0x7dc   :  { %8122 = vmatprep.subr.bf16.mxu0 %v12060_v15  ;;  %v7103_v40 = vrot.slane %v12834_v7, %v12656_v3 }
 0x7de   :  { %7270 = vmatpush2.bf16.msra.mxu1 %v12010_v9  ;;  %v7107_v9 = vrot.slane %v12834_v7, %v12659_v4 }
 0x7df   :  { %7271 = vmatprep.subr.bf16.mxu1 %v12015_v35  ;;  %8123 = vmatpush2.bf16.msra.mxu0 %v12058_v10 }
 0x7e0   :  { %8124 = vmatprep.subr.bf16.mxu0 %v12063_v18 }
 0x7e2   :  { %7272 = vmatpush2.bf16.msra.mxu1 %v12013_v57 }
 0x7e3   :  { %7273 = vmatprep.subr.bf16.mxu1 %v12018_v62  ;;  %8125 = vmatpush2.bf16.msra.mxu0 %v12061_v19 }
 0x7e4   :  { %8126 = vmatprep.subr.bf16.mxu0 %v12066_v20 }
 0x7e6   :  { %7274 = vmatpush2.bf16.msra.mxu1 %v12016_v49 }
 0x7e7   :  { %8127 = vmatpush2.bf16.msra.mxu0 %v12064_v21  ;;  %8137 = vmatprep.subr.bf16.mxu1 %v12069_v14 }
 0x7e8   :  { %8178 = vmatprep.subr.bf16.mxu0 %v12072_v16 }
 0x7e9   :  { %7276 = vmatmul.mubr.bf16.vlgmr.msra.gmra.mxu1 %v12829_v60  ;;  %v12079_v60 = vld [vmem:[#allocation7 + $0x1ea0] ss:$16 sps:$4 sm:$0xff]  }
 0x7ea   :  { %8138 = vmatpush1.bf16.msra.mxu1 %v12067_v23 }
 0x7eb   :  { %8139 = vmatprep.subr.bf16.mxu1 %v12075_v17 }
 0x7ee   :  { %8140 = vmatpush1.bf16.msra.mxu1 %v12073_v24 }
 0x7ef   :  { %8141 = vmatprep.subr.bf16.mxu1 %v12081_v28  ;;  %v12070_v28 = vld [vmem:[#allocation7 + $0x1ce8] ss:$16 sps:$4 sm:$0xff]  }
 0x7f2   :  { %8142 = vmatpush1.bf16.msra.mxu1 %v12079_v60 }
 0x7f3   :  { %8143 = vmatprep.subr.bf16.mxu1 %v12087_v0  ;;  %v12078_v0 = vld [vmem:[#allocation7 + $0x1ccc] ss:$16 sps:$4 sm:$0xff]  }
 0x7f6   :  { %8144 = vmatpush1.bf16.msra.mxu1 %v12085_v29 }
 0x7f7   :  { %8145 = vmatprep.subr.bf16.mxu1 %v12093_v32  ;;  %v12084_v32 = vld [vmem:[#allocation7 + $0x1cac] ss:$16 sps:$4 sm:$0xff]  }
 0x7fa   :  { %8146 = vmatpush1.bf16.msra.mxu1 %v12091_v31  ;;  %v12076_v31 = vld [vmem:[#allocation7 + $0x1cc8] ss:$16 sps:$4 sm:$0xff]  }
 0x7fb   :  { %8147 = vmatprep.subr.bf16.mxu1 %v12099_v34  ;;  %v12090_v34 = vld [vmem:[#allocation7 + $0x1c8c] ss:$16 sps:$4 sm:$0xff]  }
 0x7fe   :  { %8148 = vmatpush1.bf16.msra.mxu1 %v12097_v33  ;;  %v12082_v33 = vld [vmem:[#allocation7 + $0x1ca8] ss:$16 sps:$4 sm:$0xff]  }
 0x7ff   :  { %8149 = vmatprep.subr.bf16.mxu1 %v12105_v25  ;;  %v12096_v25 = vld [vmem:[#allocation7 + $0x1c6c] ss:$16 sps:$4 sm:$0xff]  }
 0x802   :  { %8150 = vmatpush1.bf16.msra.mxu1 %v12103_v36  ;;  %v12088_v36 = vld [vmem:[#allocation7 + $0x1c88] ss:$16 sps:$4 sm:$0xff]  }
 0x803   :  { %8151 = vmatprep.subr.bf16.mxu1 %v12111_v30  ;;  %v12102_v30 = vld [vmem:[#allocation7 + $0x1c4c] ss:$16 sps:$4 sm:$0xff]  }
 0x806   :  { %8152 = vmatpush1.bf16.msra.mxu1 %v12109_v37  ;;  %v12094_v37 = vld [vmem:[#allocation7 + $0x1c68] ss:$16 sps:$4 sm:$0xff]  }
 0x807   :  { %8153 = vmatprep.subr.bf16.mxu1 %v12117_v43  ;;  %v12108_v43 = vld [vmem:[#allocation7 + $0x1c2c] ss:$16 sps:$4 sm:$0xff]  }
 0x80a   :  { %8154 = vmatpush2.bf16.msra.mxu1 %v12115_v39  ;;  %v12100_v39 = vld [vmem:[#allocation7 + $0x1c48] ss:$16 sps:$4 sm:$0xff]  }
 0x80b   :  { %8155 = vmatprep.subr.bf16.mxu1 %v12123_v45  ;;  %v12114_v45 = vld [vmem:[#allocation7 + $0x1c0c] ss:$16 sps:$4 sm:$0xff]  }
 0x80e   :  { %8156 = vmatpush2.bf16.msra.mxu1 %v12121_v8  ;;  %v12106_v8 = vld [vmem:[#allocation7 + $0x1c28] ss:$16 sps:$4 sm:$0xff]  }
 0x80f   :  { %8157 = vmatprep.subr.bf16.mxu1 %v12129_v47  ;;  %v12120_v47 = vld [vmem:[#allocation7 + $0x1dec] ss:$16 sps:$4 sm:$0xff]  }
 0x812   :  { %8158 = vmatpush2.bf16.msra.mxu1 %v12127_v46  ;;  %v12112_v46 = vld [vmem:[#allocation7 + $0x1c08] ss:$16 sps:$4 sm:$0xff]  }
 0x813   :  { %8159 = vmatprep.subr.bf16.mxu1 %v12135_v50  ;;  %v12126_v50 = vld [vmem:[#allocation7 + $0x1dcc] ss:$16 sps:$4 sm:$0xff]  }
 0x816   :  { %8160 = vmatpush2.bf16.msra.mxu1 %v12133_v48  ;;  %v12118_v48 = vld [vmem:[#allocation7 + $0x1de8] ss:$16 sps:$4 sm:$0xff]  }
 0x817   :  { %8161 = vmatprep.subr.bf16.mxu1 %v12141_v51  ;;  %v12132_v51 = vld [vmem:[#allocation7 + $0x1dac] ss:$16 sps:$4 sm:$0xff]  }
 0x81a   :  { %8162 = vmatpush2.bf16.msra.mxu1 %v12139_v38  ;;  %v12124_v38 = vld [vmem:[#allocation7 + $0x1dc8] ss:$16 sps:$4 sm:$0xff]  }
 0x81b   :  { %8163 = vmatprep.subr.bf16.mxu1 %v12147_v44  ;;  %v12130_v44 = vld [vmem:[#allocation7 + $0x1da8] ss:$16 sps:$4 sm:$0xff]  }
 0x81e   :  { %8164 = vmatpush2.bf16.msra.mxu1 %v12145_v53  ;;  %v12138_v53 = vld [vmem:[#allocation7 + $0x1d8c] ss:$16 sps:$4 sm:$0xff]  }
 0x81f   :  { %8165 = vmatprep.subr.bf16.mxu1 %v12153_v55  ;;  %v12142_v55 = vld [vmem:[#allocation7 + $0x1d68] ss:$16 sps:$4 sm:$0xff]  }
 0x822   :  { %8166 = vmatpush2.bf16.msra.mxu1 %v12151_v56  ;;  %v7111_v56 = vrot.slane %v12834_v7, %v12662_v5 }
 0x823   :  { %8167 = vmatprep.subr.bf16.mxu1 %v12159_v61  ;;  %v12148_v61 = vld [vmem:[#allocation7 + $0x1d48] ss:$16 sps:$4 sm:$0xff]  }
 0x826   :  { %8168 = vmatpush2.bf16.msra.mxu1 %v12157_v52 }
 0x827   :  { %8219 = vmatprep.subr.bf16.mxu1 %v12165_v63  ;;  %v12156_v63 = vld [vmem:[#allocation7 + $0x1d2c] ss:$16 sps:$4 sm:$0xff]  }
 0x829   :  { %v7154_v54 = vpop.f32.mrf.mxu0 }
 0x82a   :  { %v7155_v11 = vadd.f32 %v7154_v54, %v7103_v40  ;;  %v12136_v54 = vld [vmem:[#allocation7 + $0x1d88] ss:$16 sps:$4 sm:$0xff]  }
 0x82b   :  { %v7156_v22 = vpop.f32.mrf.mxu0 }
 0x82c   :  { %v7157_v57 = vadd.f32 %v7156_v22, %v7107_v9  ;;  %v12144_v22 = vld [vmem:[#allocation7 + $0x1d6c] ss:$16 sps:$4 sm:$0xff]  }
 0x82d   :  { %v7158_v58 = vpop.f32.mrf.mxu0 }
 0x82e   :  { %v12150_v58 = vld [vmem:[#allocation7 + $0x1d4c] ss:$16 sps:$4 sm:$0xff]  }
 0x82f   :  { %v7159_v59 = vpop.f32.mrf.mxu0 }
 0x830   :  { %v7115_v59 = vrot.slane %v12834_v7, %v12665_v6 }
 0x869   :  { %v7195_v35 = vpop.f32.mrf.mxu1  ;;  %v12840_v12 = vpop.f32.mrf.mxu0 }
 0x86a   :  { %v7196_v13 = vadd.f32 %v7195_v35, %v7155_v11  ;;  %v7237_v52 = vadd.f32 %v12840_v12, %v7111_v56  ;;  %v12160_v12 = vld [vmem:[#allocation7 + $0x1d08] ss:$16 sps:$4 sm:$0xff]  }
 0x86b   :  { %v7197_v62 = vpop.f32.mrf.mxu1  ;;  %v12842_v49 = vpop.f32.mrf.mxu0  ;;  %v12208_v56 = vld [vmem:[#allocation7 + $0x1f08] ss:$16 sps:$4 sm:$0xff]  }
 0x86c   :  { %vm7284_vm10 = vcmp.ge.f32.partialorder %v7196_v13, 0.0  ;;  %v7288_v15 = vmul.f32 0.2, %v7196_v13  ;;  %v7198_v10 = vadd.f32 %v7197_v62, %v7157_v57  ;;  %v7239_v9 = vadd.f32 %v12842_v49, %v7115_v59  ;;  %v12154_v57 = vld [vmem:[#allocation7 + $0x1d28] ss:$16 sps:$4 sm:$0xff]  }
 0x86d   :  { %v7199_v18 = vpop.f32.mrf.mxu1  ;;  %v7240_v19 = vpop.f32.mrf.mxu0  ;;  %v8403_v59 = vld [vmem:[%s13444_s6 + $0x1f8] sm:$0xff] }
 0x86e   :  { %v7292_v20 = vsel %vm7284_vm10, %v7196_v13, %v7288_v15  ;;  %vm7285_vm11 = vcmp.ge.f32.partialorder %v7198_v10, 0.0  ;;  %v7289_v21 = vmul.f32 0.2, %v7198_v10  ;;  %v12162_v15 = vld [vmem:[#allocation7 + $0x1d0c] ss:$16 sps:$4 sm:$0xff]  }
 0x86f   :  { %v7200_v23 = vpop.f32.mrf.mxu1  ;;  %v7241_v14 = vpop.f32.mrf.mxu0  ;;  %v7296_v16 = vmul.f32 1.4142135, %v7292_v20 }
 0x870   :  { %v7293_v24 = vsel %vm7285_vm11, %v7198_v10, %v7289_v21  ;;  %v12163_v14 = vld [vmem:[#allocation7 + $0x1ee8] ss:$16 sps:$4 sm:$0xff]  }
 0x871   :  { %v7297_v17 = vmul.f32 1.4142135, %v7293_v24  ;;  %v12844_v29 = vpack.c.bf16 %v7296_v16, %v7296_v16  ;;  %v12168_v24 = vld [vmem:[#allocation7 + $0x1ecc] ss:$16 sps:$4 sm:$0xff]  }
 0x873   :  { %v7301_v60 = vpack.c.bf16 %v7297_v17, %v7297_v17  ;;  %v12166_v17 = vld [vmem:[#allocation7 + $0x1ec8] ss:$16 sps:$4 sm:$0xff]  }
 0x875   :  { %8128 = vmatprep.mubr.bf16.mxu0 %v7301_v60 }
 0x876   :  { %8129 = vmatmul.mubr.bf16.vlgmr.msra.gmra.mxu0 %v12844_v29 }
 0x877   :  { %8179 = vmatpush1.bf16.msra.mxu0 %v12070_v28  ;;  %8210 = vmatprep.mubr.bf16.mxu0 %v7301_v60  ;;  %v12171_v60 = vld [vmem:[#allocation7 + $0x1eac] ss:$16 sps:$4 sm:$0xff]   ;;  %v12169_v28 = vld [vmem:[#allocation7 + $0x1ea8] ss:$16 sps:$4 sm:$0xff]  }
 0x878   :  { %8180 = vmatprep.subr.bf16.mxu0 %v12078_v0  ;;  %v12174_v0 = vld [vmem:[#allocation7 + $0x1e8c] ss:$16 sps:$4 sm:$0xff]  }
 0x87b   :  { %8181 = vmatpush1.bf16.msra.mxu0 %v12076_v31  ;;  %v12172_v31 = vld [vmem:[#allocation7 + $0x1e88] ss:$16 sps:$4 sm:$0xff]  }
 0x87c   :  { %8182 = vmatprep.subr.bf16.mxu0 %v12084_v32  ;;  %v12177_v32 = vld [vmem:[#allocation7 + $0x1e6c] ss:$16 sps:$4 sm:$0xff]  }
 0x87f   :  { %8183 = vmatpush1.bf16.msra.mxu0 %v12082_v33  ;;  %v12175_v33 = vld [vmem:[#allocation7 + $0x1e68] ss:$16 sps:$4 sm:$0xff]  }
 0x880   :  { %8184 = vmatprep.subr.bf16.mxu0 %v12090_v34  ;;  %v12180_v34 = vld [vmem:[#allocation7 + $0x1e4c] ss:$16 sps:$4 sm:$0xff]  }
 0x883   :  { %8185 = vmatpush1.bf16.msra.mxu0 %v12088_v36  ;;  %v12178_v36 = vld [vmem:[#allocation7 + $0x1e48] ss:$16 sps:$4 sm:$0xff]  }
 0x884   :  { %8186 = vmatprep.subr.bf16.mxu0 %v12096_v25  ;;  %v12181_v25 = vld [vmem:[#allocation7 + $0x1e28] ss:$16 sps:$4 sm:$0xff]  }
 0x887   :  { %8187 = vmatpush1.bf16.msra.mxu0 %v12094_v37  ;;  %v12186_v37 = vld [vmem:[#allocation7 + $0x1e0c] ss:$16 sps:$4 sm:$0xff]  }
 0x888   :  { %8188 = vmatprep.subr.bf16.mxu0 %v12102_v30  ;;  %v12184_v30 = vld [vmem:[#allocation7 + $0x1e08] ss:$16 sps:$4 sm:$0xff]  }
 0x88b   :  { %8189 = vmatpush1.bf16.msra.mxu0 %v12100_v39  ;;  %v12189_v39 = vld [vmem:[#allocation7 + $0x1fec] ss:$16 sps:$4 sm:$0xff]  }
 0x88c   :  { %8190 = vmatprep.subr.bf16.mxu0 %v12108_v43  ;;  %v12187_v43 = vld [vmem:[#allocation7 + $0x1fe8] ss:$16 sps:$4 sm:$0xff]  }
 0x88f   :  { %8191 = vmatpush1.bf16.msra.mxu0 %v12106_v8  ;;  %v12192_v8 = vld [vmem:[#allocation7 + $0x1fcc] ss:$16 sps:$4 sm:$0xff]  }
 0x890   :  { %8192 = vmatprep.subr.bf16.mxu0 %v12114_v45  ;;  %v12190_v45 = vld [vmem:[#allocation7 + $0x1fc8] ss:$16 sps:$4 sm:$0xff]  }
 0x893   :  { %8193 = vmatpush1.bf16.msra.mxu0 %v12112_v46  ;;  %v12195_v46 = vld [vmem:[#allocation7 + $0x1fac] ss:$16 sps:$4 sm:$0xff]  }
 0x894   :  { %8194 = vmatprep.subr.bf16.mxu0 %v12120_v47  ;;  %v12193_v47 = vld [vmem:[#allocation7 + $0x1fa8] ss:$16 sps:$4 sm:$0xff]  }
 0x897   :  { %8195 = vmatpush2.bf16.msra.mxu0 %v12118_v48  ;;  %v12198_v48 = vld [vmem:[#allocation7 + $0x1f8c] ss:$16 sps:$4 sm:$0xff]  }
 0x898   :  { %8196 = vmatprep.subr.bf16.mxu0 %v12126_v50  ;;  %v12196_v50 = vld [vmem:[#allocation7 + $0x1f88] ss:$16 sps:$4 sm:$0xff]  }
 0x89b   :  { %8197 = vmatpush2.bf16.msra.mxu0 %v12124_v38  ;;  %v12201_v38 = vld [vmem:[#allocation7 + $0x1f6c] ss:$16 sps:$4 sm:$0xff]  }
 0x89c   :  { %8198 = vmatprep.subr.bf16.mxu0 %v12132_v51  ;;  %v12199_v51 = vld [vmem:[#allocation7 + $0x1f68] ss:$16 sps:$4 sm:$0xff]  }
 0x89f   :  { %8199 = vmatpush2.bf16.msra.mxu0 %v12130_v44  ;;  %v12204_v44 = vld [vmem:[#allocation7 + $0x1f4c] ss:$16 sps:$4 sm:$0xff]  }
 0x8a0   :  { %8200 = vmatprep.subr.bf16.mxu0 %v12138_v53  ;;  %v12202_v53 = vld [vmem:[#allocation7 + $0x1f48] ss:$16 sps:$4 sm:$0xff]  }
 0x8a3   :  { %8201 = vmatpush2.bf16.msra.mxu0 %v12136_v54  ;;  %v12207_v54 = vld [vmem:[#allocation7 + $0x1f2c] ss:$16 sps:$4 sm:$0xff]  }
 0x8a4   :  { %8202 = vmatprep.subr.bf16.mxu0 %v12144_v22  ;;  %v12205_v22 = vld [vmem:[#allocation7 + $0x1f28] ss:$16 sps:$4 sm:$0xff]  }
 0x8a7   :  { %8203 = vmatpush2.bf16.msra.mxu0 %v12142_v55  ;;  %v12210_v55 = vld [vmem:[#allocation7 + $0x1f0c] ss:$16 sps:$4 sm:$0xff]  }
 0x8a8   :  { %8204 = vmatprep.subr.bf16.mxu0 %v12150_v58  ;;  %v8371_v58 = vld [vmem:[%s13444_s6 + $0xf8] sm:$0xff] }
 0x8a9   :  { %v7277_v40 = vpop.f32.mrf.mxu1 }
 0x8aa   :  { %v7278_v11 = vadd.f32 %v7277_v40, %v7237_v52  ;;  %v8387_v52 = vld [vmem:[%s13444_s6 + $0x178] sm:$0xff]  ;;  %v8402_v40 = vld [vmem:[%s13444_s6 + $0x1f0] sm:$0xff] }
 0x8ab   :  { %v7279_v35 = vpop.f32.mrf.mxu1  ;;  %8205 = vmatpush2.bf16.msra.mxu0 %v12148_v61  ;;  %v8355_v61 = vld [vmem:[%s13444_s6 + $0x78] sm:$0xff] }
 0x8ac   :  { %vm7286_vm12 = vcmp.ge.f32.partialorder %v7278_v11, 0.0  ;;  %v7290_v13 = vmul.f32 0.2, %v7278_v11  ;;  %v7280_v62 = vadd.f32 %v7279_v35, %v7239_v9  ;;  %8206 = vmatprep.subr.bf16.mxu0 %v12156_v63  ;;  %v8370_v63 = vld [vmem:[%s13444_s6 + $0xf0] sm:$0xff] }
 0x8ad   :  { %v7281_v10 = vpop.f32.mrf.mxu1  ;;  %v8354_v9 = vld [vmem:[%s13444_s6 + $0x70] sm:$0xff] }
 0x8ae   :  { %v7294_v7 = vsel %vm7286_vm12, %v7278_v11, %v7290_v13  ;;  %vm7287_vm13 = vcmp.ge.f32.partialorder %v7280_v62, 0.0  ;;  %v7291_v18 = vmul.f32 0.2, %v7280_v62  ;;  %v8386_v11 = vld [vmem:[%s13444_s6 + $0x170] sm:$0xff]  ;;  %v8401_v13 = vld [vmem:[%s13444_s6 + $0x1e8] sm:$0xff] }
 0x8af   :  { %v7282_v19 = vpop.f32.mrf.mxu1  ;;  %8207 = vmatpush2.bf16.msra.mxu0 %v12154_v57  ;;  %v7298_v20 = vmul.f32 1.4142135, %v7294_v7  ;;  %v8369_v57 = vld [vmem:[%s13444_s6 + $0xe8] sm:$0xff]  ;;  %v8368_v7 = vld [vmem:[%s13444_s6 + $0xe0] sm:$0xff] }
 0x8b0   :  { %8208 = vmatprep.subr.bf16.mxu0 %v12162_v15  ;;  %v7295_v21 = vsel %vm7287_vm13, %v7280_v62, %v7291_v18  ;;  %v8353_v62 = vld [vmem:[%s13444_s6 + $0x68] sm:$0xff]  ;;  %v8400_v18 = vld [vmem:[%s13444_s6 + $0x1e0] sm:$0xff] }
 0x8b1   :  { %v7299_v49 = vmul.f32 1.4142135, %v7295_v21  ;;  %v12853_v16 = vpack.c.bf16 %v7298_v20, %v7298_v20  ;;  %v8385_v15 = vld [vmem:[%s13444_s6 + $0x168] sm:$0xff]  ;;  %v8352_v19 = vld [vmem:[%s13444_s6 + $0x60] sm:$0xff]  ;;  %v8367_v21 = vld [vmem:[%s13444_s6 + $0xd8] sm:$0xff] }
 0x8b3   :  { %8209 = vmatpush2.bf16.msra.mxu0 %v12160_v12  ;;  %v7303_v23 = vpack.c.bf16 %v7299_v49, %v7299_v49  ;;  %v8384_v12 = vld [vmem:[%s13444_s6 + $0x160] sm:$0xff]  ;;  %v8399_v49 = vld [vmem:[%s13444_s6 + $0x1d8] sm:$0xff] }
 0x8b4   :  { %10405 = vmatprep.subr.mxu0 %v8371_v58  ;;  %v8343_v58 = vld [vmem:[%s13444_s6 + $0x18] sm:$0xff] }
 0x8b5   :  { %8169 = vmatprep.mubr.bf16.mxu1 %v7303_v23 }
 0x8b6   :  { %8170 = vmatmul.mubr.bf16.vlgmr.msra.gmra.mxu1 %v12853_v16  ;;  %8211 = vmatmul.mubr.bf16.vlgmr.msra.gmra.mxu0 %v12844_v29  ;;  %v12183_v29 = vld [vmem:[#allocation7 + $0x1e2c] ss:$16 sps:$4 sm:$0xff]  }
 0x8b7   :  { %8220 = vmatpush1.bf16.msra.mxu1 %v12163_v14  ;;  %8251 = vmatprep.mubr.bf16.mxu1 %v7303_v23  ;;  %v8351_v23 = vld [vmem:[%s13444_s6 + $0x58] sm:$0xff] }
 0x8b8   :  { %8221 = vmatprep.subr.bf16.mxu1 %v12168_v24  ;;  %10406 = vmatpush3.msra.mxu0 %v8355_v61  ;;  %v8383_v14 = vld [vmem:[%s13444_s6 + $0x158] sm:$0xff]  ;;  %v8366_v24 = vld [vmem:[%s13444_s6 + $0xd0] sm:$0xff] }
 0x8b9   :  { %10407 = vmatprep.subr.mxu0 %v8370_v63  ;;  %v8358_v61 = vld [vmem:[%s13444_s6 + $0x90] sm:$0xff] }
 0x8ba   :  { %10408 = vmatpush3.msra.mxu0 %v8354_v9  ;;  %v8342_v63 = vld [vmem:[%s13444_s6 + $0x10] sm:$0xff]  ;;  %v8357_v9 = vld [vmem:[%s13444_s6 + $0x88] sm:$0xff] }
 0x8bb   :  { %8222 = vmatpush1.bf16.msra.mxu1 %v12166_v17  ;;  %10409 = vmatprep.subr.mxu0 %v8369_v57  ;;  %v8398_v17 = vld [vmem:[%s13444_s6 + $0x1d0] sm:$0xff]  ;;  %v8341_v57 = vld [vmem:[%s13444_s6 + $0x8] sm:$0xff] }
 0x8bc   :  { %8223 = vmatprep.subr.bf16.mxu1 %v12171_v60  ;;  %10410 = vmatpush3.msra.mxu0 %v8353_v62  ;;  %v8350_v60 = vld [vmem:[%s13444_s6 + $0x50] sm:$0xff]  ;;  %v8356_v62 = vld [vmem:[%s13444_s6 + $0x80] sm:$0xff] }
 0x8bd   :  { %10411 = vmatprep.subr.mxu0 %v8368_v7  ;;  %v8340_v7 = vld [vmem:[%s13444_s6] sm:$0xff] }
 0x8be   :  { %10412 = vmatpush3.msra.mxu0 %v8352_v19  ;;  %v7434_v19 = vld [vmem:[#allocation9 + $0x1c] sm:$0xf] }
 0x8bf   :  { %8224 = vmatpush1.bf16.msra.mxu1 %v12169_v28  ;;  %10413 = vmatprep.subr.mxu0 %v8367_v21  ;;  %v8382_v28 = vld [vmem:[%s13444_s6 + $0x150] sm:$0xff] }
 0x8c0   :  { %8225 = vmatprep.subr.bf16.mxu1 %v12174_v0  ;;  %10414 = vmatpush3.msra.mxu0 %v8351_v23  ;;  %v8365_v0 = vld [vmem:[%s13444_s6 + $0xc8] sm:$0xff] }
 0x8c1   :  { %10415 = vmatprep.subr.mxu0 %v8366_v24 }
 0x8c2   :  { %10416 = vmatpush3.msra.mxu0 %v8350_v60 }
 0x8c3   :  { %8226 = vmatpush1.bf16.msra.mxu1 %v12172_v31  ;;  %v8397_v31 = vld [vmem:[%s13444_s6 + $0x1c8] sm:$0xff]  ;;  %10417 = vmatprep.subr.mxu0 %v8365_v0 }
 0x8c4   :  { %8227 = vmatprep.subr.bf16.mxu1 %v12177_v32  ;;  %v8349_v32 = vld [vmem:[%s13444_s6 + $0x48] sm:$0xff] }
 0x8c5   :  { %10418 = vmatpush3.msra.mxu0 %v8349_v32 }
 0x8c7   :  { %8228 = vmatpush1.bf16.msra.mxu1 %v12175_v33  ;;  %v8381_v33 = vld [vmem:[%s13444_s6 + $0x148] sm:$0xff] }
 0x8c8   :  { %8229 = vmatprep.subr.bf16.mxu1 %v12180_v34  ;;  %v8364_v34 = vld [vmem:[%s13444_s6 + $0xc0] sm:$0xff] }
 0x8c9   :  { %10419 = vmatprep.subr.mxu0 %v8364_v34 }
 0x8cb   :  { %8230 = vmatpush1.bf16.msra.mxu1 %v12178_v36  ;;  %v8396_v36 = vld [vmem:[%s13444_s6 + $0x1c0] sm:$0xff] }
 0x8cc   :  { %8231 = vmatprep.subr.bf16.mxu1 %v12183_v29  ;;  %v8348_v29 = vld [vmem:[%s13444_s6 + $0x40] sm:$0xff] }
 0x8cd   :  { %10420 = vmatpush3.msra.mxu0 %v8348_v29 }
 0x8cf   :  { %8232 = vmatpush1.bf16.msra.mxu1 %v12181_v25  ;;  %v8380_v25 = vld [vmem:[%s13444_s6 + $0x140] sm:$0xff] }
 0x8d0   :  { %8233 = vmatprep.subr.bf16.mxu1 %v12186_v37  ;;  %v8363_v37 = vld [vmem:[%s13444_s6 + $0xb8] sm:$0xff] }
 0x8d1   :  { %10421 = vmatprep.subr.mxu0 %v8363_v37 }
 0x8d3   :  { %8234 = vmatpush1.bf16.msra.mxu1 %v12184_v30  ;;  %v8395_v30 = vld [vmem:[%s13444_s6 + $0x1b8] sm:$0xff] }
 0x8d4   :  { %8235 = vmatprep.subr.bf16.mxu1 %v12189_v39  ;;  %v8347_v39 = vld [vmem:[%s13444_s6 + $0x38] sm:$0xff] }
 0x8d5   :  { %10422 = vmatpush3.msra.mxu0 %v8347_v39 }
 0x8d7   :  { %8236 = vmatpush2.bf16.msra.mxu1 %v12187_v43  ;;  %v8379_v43 = vld [vmem:[%s13444_s6 + $0x138] sm:$0xff] }
 0x8d8   :  { %8237 = vmatprep.subr.bf16.mxu1 %v12192_v8  ;;  %v8362_v8 = vld [vmem:[%s13444_s6 + $0xb0] sm:$0xff] }
 0x8d9   :  { %10423 = vmatprep.subr.mxu0 %v8362_v8 }
 0x8db   :  { %8238 = vmatpush2.bf16.msra.mxu1 %v12190_v45  ;;  %v8394_v45 = vld [vmem:[%s13444_s6 + $0x1b0] sm:$0xff] }
 0x8dc   :  { %8239 = vmatprep.subr.bf16.mxu1 %v12195_v46  ;;  %v8346_v46 = vld [vmem:[%s13444_s6 + $0x30] sm:$0xff] }
 0x8dd   :  { %10424 = vmatpush3.msra.mxu0 %v8346_v46 }
 0x8df   :  { %8240 = vmatpush2.bf16.msra.mxu1 %v12193_v47  ;;  %v8378_v47 = vld [vmem:[%s13444_s6 + $0x130] sm:$0xff] }
 0x8e0   :  { %8241 = vmatprep.subr.bf16.mxu1 %v12198_v48  ;;  %v8361_v48 = vld [vmem:[%s13444_s6 + $0xa8] sm:$0xff] }
 0x8e1   :  { %10425 = vmatprep.subr.mxu0 %v8361_v48 }
 0x8e3   :  { %8242 = vmatpush2.bf16.msra.mxu1 %v12196_v50  ;;  %v8393_v50 = vld [vmem:[%s13444_s6 + $0x1a8] sm:$0xff] }
 0x8e4   :  { %8243 = vmatprep.subr.bf16.mxu1 %v12201_v38  ;;  %v8345_v38 = vld [vmem:[%s13444_s6 + $0x28] sm:$0xff] }
 0x8e5   :  { %10426 = vmatpush3.msra.mxu0 %v8345_v38  ;;  %v8091_v38 = vrot.slane %v7434_v19, %v12665_v6 }
 0x8e7   :  { %8244 = vmatpush2.bf16.msra.mxu1 %v12199_v51  ;;  %v8377_v51 = vld [vmem:[%s13444_s6 + $0x128] sm:$0xff] }
 0x8e8   :  { %8245 = vmatprep.subr.bf16.mxu1 %v12204_v44  ;;  %v8360_v44 = vld [vmem:[%s13444_s6 + $0xa0] sm:$0xff] }
 0x8e9   :  { %10427 = vmatprep.subr.mxu0 %v8360_v44 }
 0x8eb   :  { %8246 = vmatpush2.bf16.msra.mxu1 %v12202_v53  ;;  %v8392_v53 = vld [vmem:[%s13444_s6 + $0x1a0] sm:$0xff] }
 0x8ec   :  { %8247 = vmatprep.subr.bf16.mxu1 %v12207_v54  ;;  %v8344_v54 = vld [vmem:[%s13444_s6 + $0x20] sm:$0xff] }
 0x8ed   :  { %10428 = vmatpush3.msra.mxu0 %v8344_v54 }
 0x8ef   :  { %8248 = vmatpush2.bf16.msra.mxu1 %v12205_v22  ;;  %v8376_v22 = vld [vmem:[%s13444_s6 + $0x120] sm:$0xff] }
 0x8f0   :  { %8249 = vmatprep.subr.bf16.mxu1 %v12210_v55  ;;  %v8359_v55 = vld [vmem:[%s13444_s6 + $0x98] sm:$0xff] }
 0x8f1   :  { %10429 = vmatprep.subr.mxu0 %v8359_v55 }
 0x8f2   :  { %10430 = vmatpush3.msra.mxu0 %v8343_v58 }
 0x8f3   :  { %8250 = vmatpush2.bf16.msra.mxu1 %v12208_v56  ;;  %v8391_v56 = vld [vmem:[%s13444_s6 + $0x198] sm:$0xff]  ;;  %10431 = vmatprep.subr.mxu0 %v8358_v61 }
 0x8f4   :  { %10440 = vmatprep.subr.mxu1 %v8403_v59  ;;  %v8375_v59 = vld [vmem:[%s13444_s6 + $0x118] sm:$0xff]  ;;  %10432 = vmatpush3.msra.mxu0 %v8342_v63 }
 0x8f5   :  { %10433 = vmatprep.subr.mxu0 %v8357_v9 }
 0x8f6   :  { %8252 = vmatmul.mubr.bf16.vlgmr.msra.gmra.mxu1 %v12853_v16  ;;  %10434 = vmatpush3.msra.mxu0 %v8341_v57 }
 0x8f7   :  { %10441 = vmatpush3.msra.mxu1 %v8387_v52  ;;  %v8390_v52 = vld [vmem:[%s13444_s6 + $0x190] sm:$0xff]  ;;  %10435 = vmatprep.subr.mxu0 %v8356_v62 }
 0x8f8   :  { %10442 = vmatprep.subr.mxu1 %v8402_v40  ;;  %v8374_v40 = vld [vmem:[%s13444_s6 + $0x110] sm:$0xff]  ;;  %10436 = vmatpush3.msra.mxu0 %v8340_v7 }
 0x8f9   :  { %10443 = vmatpush3.msra.mxu1 %v8386_v11  ;;  %v8389_v11 = vld [vmem:[%s13444_s6 + $0x188] sm:$0xff] }
 0x8fa   :  { %10444 = vmatprep.subr.mxu1 %v8401_v13  ;;  %v8373_v13 = vld [vmem:[%s13444_s6 + $0x108] sm:$0xff] }
 0x8fb   :  { %10445 = vmatpush3.msra.mxu1 %v8385_v15  ;;  %v8388_v15 = vld [vmem:[%s13444_s6 + $0x180] sm:$0xff] }
 0x8fc   :  { %10446 = vmatprep.subr.mxu1 %v8400_v18  ;;  %v8372_v18 = vld [vmem:[%s13444_s6 + $0x100] sm:$0xff] }
 0x8fd   :  { %10447 = vmatpush3.msra.mxu1 %v8384_v12  ;;  %v8079_v12 = vrot.slane %v7434_v19, %v12656_v3 }
 0x8fe   :  { %10448 = vmatprep.subr.mxu1 %v8399_v49 }
 0x8ff   :  { %10449 = vmatpush3.msra.mxu1 %v8383_v14 }
 0x900   :  { %10450 = vmatprep.subr.mxu1 %v8398_v17 }
 0x901   :  { %10451 = vmatpush3.msra.mxu1 %v8382_v28  ;;  %v8280_v28 = vld [vmem:[#allocation10] sm:$0xf] }
 0x902   :  { %10452 = vmatprep.subr.mxu1 %v8397_v31  ;;  %v8285_v29 = vrot.slane %v8280_v28, %v12656_v3  ;;  %v8289_v39 = vrot.slane %v8280_v28, %v12659_v4  ;;  %v8293_v63 = vrot.slane %v8280_v28, %v12662_v5 }
 0x903   :  { %10453 = vmatpush3.msra.mxu1 %v8381_v33 }
 0x904   :  { %10454 = vmatprep.subr.mxu1 %v8396_v36 }
 0x905   :  { %10455 = vmatpush3.msra.mxu1 %v8380_v25 }
 0x906   :  { %10456 = vmatprep.subr.mxu1 %v8395_v30 }
 0x907   :  { %10457 = vmatpush3.msra.mxu1 %v8379_v43 }
 0x908   :  { %10458 = vmatprep.subr.mxu1 %v8394_v45 }
 0x909   :  { %10459 = vmatpush3.msra.mxu1 %v8378_v47 }
 0x90a   :  { %10460 = vmatprep.subr.mxu1 %v8393_v50  ;;  %v8087_v50 = vrot.slane %v7434_v19, %v12662_v5 }
 0x90b   :  { %10461 = vmatpush3.msra.mxu1 %v8377_v51 }
 0x90c   :  { %10462 = vmatprep.subr.mxu1 %v8392_v53 }
 0x90d   :  { %10463 = vmatpush3.msra.mxu1 %v8376_v22 }
 0x90e   :  { %10464 = vmatprep.subr.mxu1 %v8391_v56 }
 0x90f   :  { %10465 = vmatpush3.msra.mxu1 %v8375_v59  ;;  %v12514_v59 = vmov 1966171168  }
 0x910   :  { %10466 = vmatprep.subr.mxu1 %v8390_v52  ;;  %v8317_v61 = vunpack.c.l.s4 %v12514_v59  ;;  %v8774_v59 = vld [vmem:[%s13448_s10 + $0xc8] sm:$0xff] }
 0x911   :  { %10467 = vmatpush3.msra.mxu1 %v8374_v40 }
 0x912   :  { %10468 = vmatprep.subr.mxu1 %v8389_v11  ;;  %v8318_v62 = vunpack.c.0.s8 %v8317_v61  ;;  %v8758_v61 = vld [vmem:[%s13448_s10 + $0x48] sm:$0xff] }
 0x913   :  { %10469 = vmatpush3.msra.mxu1 %v8373_v13  ;;  %v8297_v13 = vrot.slane %v8280_v28, %v12665_v6 }
 0x914   :  { %10470 = vmatprep.subr.mxu1 %v8388_v15 }
 0x915   :  { %10471 = vmatpush3.msra.mxu1 %v8372_v18 }
 0x916   :  { %10605 = vmatprep.subr.mxu1 %v12513_v1 }
 0x936   :  { %v12882_v35 = vpop.f32.mrf.mxu0 }
 0x937   :  { %v8131_v21 = vadd.f32 %v12882_v35, %v8079_v12 }
 0x938   :  { %v12896_v10 = vpop.f32.mrf.mxu0 }
 0x93a   :  { %v8134_v20 = vpop.f32.mrf.mxu0 }
 0x93b   :  { %v8083_v20 = vrot.slane %v7434_v19, %v12659_v4  ;;  %v8321_v19 = vsub.s32 %v8318_v62, %v12653_v2  ;;  %v8578_v2 = vld [vmem:[#allocation13 + $0x50] sm:$0xff]  ;;  %v8754_v62 = vld [vmem:[%s13448_s10 + $0x28] sm:$0xff] }
 0x93c   :  { %v8135_v16 = vpop.f32.mrf.mxu0  ;;  %8608 = vmatprep.subr.mxu0 %v8578_v2  ;;  %v9110_v2 = vld [vmem:[%s13451_s13 + $0x1f8] sm:$0xff] }
 0x93d   :  { %v8133_v14 = vadd.f32 %v12896_v10, %v8083_v20 }
 0x976   :  { %v8171_v49 = vpop.f32.mrf.mxu1  ;;  %v8212_v23 = vpop.f32.mrf.mxu0 }
 0x977   :  { %v8172_v16 = vadd.f32 %v8171_v49, %v8131_v21  ;;  %v8213_v51 = vadd.f32 %v8212_v23, %v8087_v50  ;;  %v8764_v50 = vld [vmem:[%s13448_s10 + $0x78] sm:$0xff] }
 0x978   :  { %v8173_v24 = vpop.f32.mrf.mxu1  ;;  %v8214_v17 = vpop.f32.mrf.mxu0 }
 0x979   :  { %vm8260_vm14 = vcmp.ge.f32.partialorder %v8172_v16, 0.0  ;;  %v8264_v60 = vmul.f32 0.2, %v8172_v16  ;;  %v8174_v0 = vadd.f32 %v8173_v24, %v8133_v14  ;;  %v8215_v53 = vadd.f32 %v8214_v17, %v8091_v38  ;;  %v8779_v38 = vld [vmem:[%s13448_s10 + $0xf0] sm:$0xff] }
 0x97a   :  { %v8175_v31 = vpop.f32.mrf.mxu1  ;;  %v8216_v32 = vpop.f32.mrf.mxu0 }
 0x97b   :  { %v8268_v33 = vsel %vm8260_vm14, %v8172_v16, %v8264_v60  ;;  %vm8261_vm15 = vcmp.ge.f32.partialorder %v8174_v0, 0.0  ;;  %v8265_v34 = vmul.f32 0.2, %v8174_v0  ;;  %v8572_v31 = vld [vmem:[#allocation13 + $0x20] sm:$0xff]  ;;  %v8571_v32 = vld [vmem:[#allocation13 + $0x18] sm:$0xff] }
 0x97c   :  { %v8272_v36 = vmul.f32 1.4142135, %v8268_v33  ;;  %v8176_v35 = vpop.f32.mrf.mxu1  ;;  %v8217_v25 = vpop.f32.mrf.mxu0  ;;  %v8573_v33 = vld [vmem:[#allocation13 + $0x28] sm:$0xff] }
 0x97d   :  { %v8269_v37 = vsel %vm8261_vm15, %v8174_v0, %v8265_v34  ;;  %v8576_v0 = vld [vmem:[#allocation13 + $0x40] sm:$0xff]  ;;  %v8569_v34 = vld [vmem:[#allocation13 + $0x8] sm:$0xff] }
 0x97e   :  { %v8276_v10 = vadd.f32 %v8272_v36, %v12690_v41  ;;  %v8273_v30 = vmul.f32 1.4142135, %v8269_v37  ;;  %v8568_v36 = vld [vmem:[#allocation13] sm:$0xff]  ;;  %v8780_v35 = vld [vmem:[%s13448_s10 + $0xf8] sm:$0xff] }
 0x97f   :  { %v8784_v25 = vld [vmem:[%s13448_s10 + $0x118] sm:$0xff] }
 0x980   :  { %v8302_v43 = vsub.f32 %v8276_v10, %v8285_v29  ;;  %v8277_v8 = vadd.f32 %v8273_v30, %v12696_v26  ;;  %v8570_v29 = vld [vmem:[#allocation13 + $0x10] sm:$0xff] }
 0x982   :  { %v8303_v45 = vsub.f32 %v8277_v8, %v8289_v39  ;;  %v8306_v46 = vmul.f32 0.7, %v8302_v43 }
 0x984   :  { %v8307_v47 = vmul.f32 0.7, %v8303_v45 }
 0x986   :  { %v8314_v48 = vcombine.low %v8306_v46, %v8307_v47  ;;  %v8566_v46 = vld [vmem:[#allocation12] sm:$0x1] }
 0x988   :  { %v8322_v49 = vrot.slane %v8314_v48, %v8321_v19 }
 0x9b6   :  { %v8253_v44 = vpop.f32.mrf.mxu1 }
 0x9b7   :  { %v8254_v54 = vadd.f32 %v8253_v44, %v8213_v51  ;;  %v8783_v51 = vld [vmem:[%s13448_s10 + $0x110] sm:$0xff] }
 0x9b8   :  { %v8255_v22 = vpop.f32.mrf.mxu1  ;;  %v8763_v44 = vld [vmem:[%s13448_s10 + $0x70] sm:$0xff] }
 0x9b9   :  { %vm8262_vm0 = vcmp.ge.f32.partialorder %v8254_v54, 0.0  ;;  %v8266_v41 = vmul.f32 0.2, %v8254_v54  ;;  %v8256_v55 = vadd.f32 %v8255_v22, %v8215_v53  ;;  %v8778_v53 = vld [vmem:[%s13448_s10 + $0xe8] sm:$0xff]  ;;  %v8777_v22 = vld [vmem:[%s13448_s10 + $0xe0] sm:$0xff] }
 0x9ba   :  { %v8257_v56 = vpop.f32.mrf.mxu1 }
 0x9bb   :  { %v8270_v58 = vsel %vm8262_vm0, %v8254_v54, %v8266_v41  ;;  %vm8263_vm1 = vcmp.ge.f32.partialorder %v8256_v55, 0.0  ;;  %v8267_v26 = vmul.f32 0.2, %v8256_v55  ;;  %v8762_v54 = vld [vmem:[%s13448_s10 + $0x68] sm:$0xff]  ;;  %v8761_v41 = vld [vmem:[%s13448_s10 + $0x60] sm:$0xff]  ;;  %v8760_v56 = vld [vmem:[%s13448_s10 + $0x58] sm:$0xff] }
 0x9bc   :  { %v8274_v52 = vmul.f32 1.4142135, %v8270_v58  ;;  %v8258_v40 = vpop.f32.mrf.mxu1  ;;  %v8775_v58 = vld [vmem:[%s13448_s10 + $0xd0] sm:$0xff] }
 0x9bd   :  { %v8271_v9 = vsel %vm8263_vm1, %v8256_v55, %v8267_v26  ;;  %v8776_v55 = vld [vmem:[%s13448_s10 + $0xd8] sm:$0xff]  ;;  %v8759_v26 = vld [vmem:[%s13448_s10 + $0x50] sm:$0xff] }
 0x9be   :  { %v8278_v11 = vadd.f32 %v8274_v52, %v12692_v42  ;;  %v8275_v57 = vmul.f32 1.4142135, %v8271_v9  ;;  %v8773_v52 = vld [vmem:[%s13448_s10 + $0xc0] sm:$0xff]  ;;  %v8772_v40 = vld [vmem:[%s13448_s10 + $0xb8] sm:$0xff] }
 0x9bf   :  { %v8756_v9 = vld [vmem:[%s13448_s10 + $0x38] sm:$0xff] }
 0x9c0   :  { %v8304_v15 = vsub.f32 %v8278_v11, %v8293_v63  ;;  %v8279_v7 = vadd.f32 %v8275_v57, %v12698_v27  ;;  %v8757_v63 = vld [vmem:[%s13448_s10 + $0x40] sm:$0xff]  ;;  %v8771_v11 = vld [vmem:[%s13448_s10 + $0xb0] sm:$0xff] }
 0x9c1   :  { %v8755_v57 = vld [vmem:[%s13448_s10 + $0x30] sm:$0xff] }
 0x9c2   :  { %v8305_v18 = vsub.f32 %v8279_v7, %v8297_v13  ;;  %v8308_v12 = vmul.f32 0.7, %v8304_v15  ;;  %v8770_v13 = vld [vmem:[%s13448_s10 + $0xa8] sm:$0xff]  ;;  %v8769_v15 = vld [vmem:[%s13448_s10 + $0xa0] sm:$0xff] }
 0x9c3   :  { %v8753_v7 = vld [vmem:[%s13448_s10 + $0x20] sm:$0xff] }
 0x9c4   :  { %v8309_v20 = vmul.f32 0.7, %v8305_v18  ;;  %v8768_v18 = vld [vmem:[%s13448_s10 + $0x98] sm:$0xff] }
 0x9c6   :  { %v8315_v21 = vcombine.low %v8308_v12, %v8309_v20  ;;  %v8767_v12 = vld [vmem:[%s13448_s10 + $0x90] sm:$0xff]  ;;  %v8782_v20 = vld [vmem:[%s13448_s10 + $0x108] sm:$0xff] }
 0x9c8   :  { %v8329_v23 = vrot.slane %v8315_v21, %v8321_v19  ;;  %v8751_v21 = vld [vmem:[%s13448_s10 + $0x10] sm:$0xff] }
 0x9ca   :  { %v8330_v14 = vcombine.low %v8322_v49, %v8329_v23  ;;  %v8766_v49 = vld [vmem:[%s13448_s10 + $0x88] sm:$0xff]  ;;  %v8781_v23 = vld [vmem:[%s13448_s10 + $0x100] sm:$0xff] }
 0x9cc   :  { %v8337_v16 = vrot.slane %v8330_v14, %v8321_v19  ;;  %v8752_v19 = vld [vmem:[%s13448_s10 + $0x18] sm:$0xff]  ;;  %v8750_v14 = vld [vmem:[%s13448_s10 + $0x8] sm:$0xff] }
 0x9ce   :  { %v8339_v24 = vadd.f32 %v8337_v16, %v8280_v28  ;;  %v8575_v28 = vld [vmem:[#allocation13 + $0x38] sm:$0xff] }
 0x9cf   :  { %v8765_v16 = vld [vmem:[%s13448_s10 + $0x80] sm:$0xff] }
 0x9d0   :  { %v13071_v42 = vrot.slane %v8339_v24, %v12659_v4  ;;  %v13074_v17 = vrot.slane %v8339_v24, %v12665_v6  ;;  %v13077_v60 = vrot.slane %v8339_v24, %v12656_v3  ;;  %v13080_v27 = vrot.slane %v8339_v24, %v12662_v5  ;;  %v8577_v4 = vld [vmem:[#allocation13 + $0x48] sm:$0xff]  ;;  %v8579_v6 = vld [vmem:[#allocation13 + $0x58] sm:$0xff]  ;;  %v8574_v5 = vld [vmem:[#allocation13 + $0x30] sm:$0xff] }
 0x9d1   :  { %v8749_v24 = vld [vmem:[%s13448_s10] sm:$0xff] }
 0x9d2   :  { %8489 = vmatprep.mubr.f32.mxu0 %v13071_v42  ;;  %8559 = vmatprep.mubr.f32.mxu1 %v13074_v17 }
 0x9d3   :  { %8490 = vmatmul.mubr.f32.vlgmr.msra.gmra.mxu0 %v13077_v60  ;;  %8560 = vmatmul.mubr.f32.vlgmr.msra.gmra.mxu1 %v13080_v27 }
 0x9d4   :  { %8648 = vmatprep.mubr.f32.mxu0 %v12513_v1  ;;  %8609 = vmatpush1.msra.mxu0 %v8577_v4 }
 0x9d5   :  { %10606 = vmatpush3.msra.mxu1 %v8579_v6  ;;  %8610 = vmatprep.subr.mxu0 %v8575_v28  ;;  %v8727_v28 = vld [vmem:[#allocation15 + $0x10] sm:$0xff] }
 0x9d6   :  { %10607 = vmatprep.subr.mxu1 %v12513_v1  ;;  %8611 = vmatpush1.msra.mxu0 %v8574_v5  ;;  %v8730_v5 = vld [vmem:[#allocation15 + $0x28] sm:$0xff] }
 0x9d7   :  { %10608 = vmatpush3.msra.mxu1 %v8576_v0  ;;  %8612 = vmatprep.subr.mxu0 %v8572_v31 }
 0x9d8   :  { %10609 = vmatprep.subr.mxu1 %v12513_v1  ;;  %8613 = vmatpush1.msra.mxu0 %v8571_v32 }
 0x9d9   :  { %10610 = vmatpush3.msra.mxu1 %v8573_v33  ;;  %8614 = vmatprep.subr.mxu0 %v8569_v34 }
 0x9da   :  { %10611 = vmatprep.subr.mxu1 %v12513_v1  ;;  %8615 = vmatpush1.msra.mxu0 %v8568_v36 }
 0x9db   :  { %10612 = vmatpush3.msra.mxu1 %v8570_v29  ;;  %10613 = vmatprep.mubr.msk.f32.mxu1 %vm12515_vm2, %v12513_v1  ;;  %v8726_v29 = vld [vmem:[#allocation15 + $0x8] sm:$0xff] }
 0x9dc   :  { %10480 = vmatprep.subr.mxu0 %v8780_v35  ;;  %10616 = vmatprep.subr.mxu1 %v8784_v25  ;;  %v8725_v35 = vld [vmem:[#allocation15] sm:$0xff] }
 0xa93   :  { %v10437_v37 = vpop.f32.mrf.mxu0  ;;  %v10472_v10 = vpop.f32.mrf.mxu1 }
 0xa95   :  { %v10438_v30 = vpop.f32.mrf.mxu0  ;;  %v10473_v39 = vpop.f32.mrf.mxu1 }
 0xa96   :  { %v10439_v43 = vadd.f32 %v10438_v30, %v10437_v37  ;;  %v10474_v8 = vadd.f32 %v10473_v39, %v10472_v10  ;;  %v8947_v37 = vld [vmem:[#allocation16 + $0x18] sm:$0xff]  ;;  %v8729_v10 = vld [vmem:[#allocation15 + $0x20] sm:$0xff] }
 0xa97   :  { %v8946_v39 = vld [vmem:[#allocation16 + $0x10] sm:$0xff] }
 0xa98   :  { %v8562_v45 = vadd.f32 %v10474_v8, %v10439_v43  ;;  %v9094_v8 = vld [vmem:[%s13451_s13 + $0x178] sm:$0xff] }
 0xa9a   :  { %v8565_v47 = vmul.f32 0.044194173, %v8562_v45 }
 0xa9c   :  { %v13098_v48 = vadd.f32 %v8566_v46, %v8565_v47  ;;  %v9109_v46 = vld [vmem:[%s13451_s13 + $0x1f0] sm:$0xff]  ;;  %v8728_v47 = vld [vmem:[#allocation15 + $0x18] sm:$0xff] }
 0xa9e   :  { %10396 = vmatmul.mubr.msk.f32.vlgmr.msra.gmra.mxu0 %vm8580_vm3, %v13098_v48  ;;  %10614 = vmatmul.mubr.msk.f32.vlgmr.msra.gmra.mxu1 %vm8580_vm3, %v13098_v48 }
 0xa9f   :  { %10481 = vmatpush3.msra.mxu0 %v8764_v50  ;;  %10617 = vmatpush3.msra.mxu1 %v8784_v25  ;;  %v8945_v50 = vld [vmem:[#allocation16 + $0x8] sm:$0xff] }
 0xaa0   :  { %10482 = vmatprep.subr.mxu0 %v8779_v38  ;;  %10618 = vmatprep.subr.mxu1 %v8783_v51  ;;  %v9093_v38 = vld [vmem:[%s13451_s13 + $0x170] sm:$0xff] }
 0xaa1   :  { %10483 = vmatpush3.msra.mxu0 %v8763_v44  ;;  %10619 = vmatpush3.msra.mxu1 %v8783_v51  ;;  %v9108_v51 = vld [vmem:[%s13451_s13 + $0x1e8] sm:$0xff]  ;;  %v8944_v44 = vld [vmem:[#allocation16] sm:$0xff] }
 0xaa2   :  { %10484 = vmatprep.subr.mxu0 %v8778_v53  ;;  %10620 = vmatprep.subr.mxu1 %v8782_v20 }
 0xaa3   :  { %10485 = vmatpush3.msra.mxu0 %v8762_v54  ;;  %10621 = vmatpush3.msra.mxu1 %v8782_v20  ;;  %v9092_v54 = vld [vmem:[%s13451_s13 + $0x168] sm:$0xff] }
 0xaa4   :  { %10486 = vmatprep.subr.mxu0 %v8777_v22  ;;  %10622 = vmatprep.subr.mxu1 %v8781_v23  ;;  %v8943_v22 = vmul.f32 %v13098_v48, %v13098_v48  ;;  %v9077_v48 = vld [vmem:[%s13451_s13 + $0xf0] sm:$0xff]  ;;  %v9072_v20 = vld [vmem:[%s13451_s13 + $0xc8] sm:$0xff] }
 0xaa5   :  { %10487 = vmatpush3.msra.mxu0 %v8761_v41  ;;  %10623 = vmatpush3.msra.mxu1 %v8781_v23  ;;  %v9078_v41 = vld [vmem:[%s13451_s13 + $0xf8] sm:$0xff]  ;;  %v9085_v23 = vld [vmem:[%s13451_s13 + $0x130] sm:$0xff] }
 0xaa6   :  { %10488 = vmatprep.subr.mxu0 %v8776_v55  ;;  %10627 = vmatprep.subr.mxu1 %v12513_v1  ;;  %v9107_v55 = vld [vmem:[%s13451_s13 + $0x1e0] sm:$0xff] }
 0xaa7   :  { %10489 = vmatpush3.msra.mxu0 %v8760_v56  ;;  %v9062_v56 = vld [vmem:[%s13451_s13 + $0x78] sm:$0xff] }
 0xaa8   :  { %10490 = vmatprep.subr.mxu0 %v8775_v58  ;;  %v9106_v58 = vld [vmem:[%s13451_s13 + $0x1d8] sm:$0xff] }
 0xaa9   :  { %10491 = vmatpush3.msra.mxu0 %v8759_v26  ;;  %v9061_v26 = vld [vmem:[%s13451_s13 + $0x70] sm:$0xff] }
 0xaaa   :  { %10492 = vmatprep.subr.mxu0 %v8774_v59  ;;  %v9090_v59 = vld [vmem:[%s13451_s13 + $0x158] sm:$0xff] }
 0xaab   :  { %10493 = vmatpush3.msra.mxu0 %v8758_v61  ;;  %v9076_v61 = vld [vmem:[%s13451_s13 + $0xe8] sm:$0xff] }
 0xaac   :  { %10494 = vmatprep.subr.mxu0 %v8773_v52  ;;  %v9060_v52 = vld [vmem:[%s13451_s13 + $0x68] sm:$0xff] }
 0xaad   :  { %10495 = vmatpush3.msra.mxu0 %v8757_v63  ;;  %v9089_v63 = vld [vmem:[%s13451_s13 + $0x150] sm:$0xff] }
 0xaae   :  { %10496 = vmatprep.subr.mxu0 %v8772_v40  ;;  %v9104_v40 = vld [vmem:[%s13451_s13 + $0x1c8] sm:$0xff] }
 0xaaf   :  { %10497 = vmatpush3.msra.mxu0 %v8756_v9  ;;  %v9059_v9 = vld [vmem:[%s13451_s13 + $0x60] sm:$0xff] }
 0xab0   :  { %10498 = vmatprep.subr.mxu0 %v8771_v11  ;;  %v9088_v11 = vld [vmem:[%s13451_s13 + $0x148] sm:$0xff] }
 0xab1   :  { %10499 = vmatpush3.msra.mxu0 %v8755_v57  ;;  %v9074_v57 = vld [vmem:[%s13451_s13 + $0xd8] sm:$0xff] }
 0xab2   :  { %10500 = vmatprep.subr.mxu0 %v8770_v13  ;;  %v9103_v13 = vld [vmem:[%s13451_s13 + $0x1c0] sm:$0xff] }
 0xab3   :  { %10501 = vmatpush3.msra.mxu0 %v8754_v62  ;;  %v9058_v62 = vld [vmem:[%s13451_s13 + $0x58] sm:$0xff] }
 0xab4   :  { %10502 = vmatprep.subr.mxu0 %v8769_v15  ;;  %v9087_v15 = vld [vmem:[%s13451_s13 + $0x140] sm:$0xff] }
 0xab5   :  { %10503 = vmatpush3.msra.mxu0 %v8753_v7  ;;  %v9073_v7 = vld [vmem:[%s13451_s13 + $0xd0] sm:$0xff] }
 0xab6   :  { %10504 = vmatprep.subr.mxu0 %v8768_v18  ;;  %v9102_v18 = vld [vmem:[%s13451_s13 + $0x1b8] sm:$0xff] }
 0xab7   :  { %10505 = vmatpush3.msra.mxu0 %v8752_v19  ;;  %v9057_v19 = vld [vmem:[%s13451_s13 + $0x50] sm:$0xff] }
 0xab8   :  { %10506 = vmatprep.subr.mxu0 %v8767_v12  ;;  %v9086_v12 = vld [vmem:[%s13451_s13 + $0x138] sm:$0xff] }
 0xab9   :  { %10507 = vmatpush3.msra.mxu0 %v8751_v21  ;;  %v9101_v21 = vld [vmem:[%s13451_s13 + $0x1b0] sm:$0xff] }
 0xaba   :  { %10508 = vmatprep.subr.mxu0 %v8766_v49  ;;  %v9056_v49 = vld [vmem:[%s13451_s13 + $0x48] sm:$0xff] }
 0xabb   :  { %10509 = vmatpush3.msra.mxu0 %v8750_v14  ;;  %v9071_v14 = vld [vmem:[%s13451_s13 + $0xc0] sm:$0xff] }
 0xabc   :  { %10510 = vmatprep.subr.mxu0 %v8765_v16  ;;  %v9100_v16 = vld [vmem:[%s13451_s13 + $0x1a8] sm:$0xff] }
 0xabd   :  { %10511 = vmatpush3.msra.mxu0 %v8749_v24  ;;  %v9055_v24 = vld [vmem:[%s13451_s13 + $0x40] sm:$0xff] }
 0xabe   :  { %10564 = vmatprep.subr.mxu0 %v9110_v2  ;;  %v9084_v2 = vld [vmem:[%s13451_s13 + $0x128] sm:$0xff] }
 0xb5e   :  { %v8650_v4 = vpop.f32.mrf.mxu0  ;;  %v8721_v6 = vpop.f32.mrf.mxu1 }
 0xb5f   :  { %v8742_v0 = vrot.slane %v8721_v6, %v12656_v3  ;;  %v8734_v33 = vrot.slane %v8650_v4, %v12656_v3  ;;  %v9070_v4 = vld [vmem:[%s13451_s13 + $0xb8] sm:$0xff]  ;;  %v9099_v6 = vld [vmem:[%s13451_s13 + $0x1a0] sm:$0xff] }
 0xb60   :  { %v8652_v31 = vpop.f32.mrf.mxu0  ;;  %v10615_v32 = vpop.f32.mrf.mxu1 }
 0xb61   :  { %v8745_v34 = vmul.f32 %v8742_v0, %v8727_v28  ;;  %v8748_v36 = vmul.f32 %v8742_v0, %v8730_v5  ;;  %v8738_v25 = vrot.slane %v8652_v31, %v12656_v3  ;;  %v8743_v43 = vmul.f32 %v8734_v33, %v8725_v35  ;;  %v9054_v28 = vld [vmem:[%s13451_s13 + $0x38] sm:$0xff]  ;;  %v9083_v5 = vld [vmem:[%s13451_s13 + $0x120] sm:$0xff]  ;;  %v9069_v0 = vld [vmem:[%s13451_s13 + $0xb0] sm:$0xff] }
 0xb62   :  { %v8746_v53 = vmul.f32 %v8734_v33, %v8728_v47  ;;  %v9098_v31 = vld [vmem:[%s13451_s13 + $0x198] sm:$0xff]  ;;  %v9053_v32 = vld [vmem:[%s13451_s13 + $0x30] sm:$0xff] }
 0xb63   :  { %10624 = vmatprep.mubr.msk.f32.mxu1 %vm8580_vm3, %v8745_v34  ;;  %v8744_v30 = vmul.f32 %v8738_v25, %v8726_v29  ;;  %v8747_v45 = vmul.f32 %v8738_v25, %v8729_v10  ;;  %v9082_v33 = vld [vmem:[%s13451_s13 + $0x118] sm:$0xff]  ;;  %v9068_v34 = vld [vmem:[%s13451_s13 + $0xa8] sm:$0xff]  ;;  %v9081_v35 = vld [vmem:[%s13451_s13 + $0x110] sm:$0xff] }
 0xb64   :  { %10625 = vmatmul.mubr.msk.f32.vlgmr.msra.gmra.mxu1 %vm8580_vm3, %v8748_v36  ;;  %v9097_v36 = vld [vmem:[%s13451_s13 + $0x190] sm:$0xff]  ;;  %v9052_v29 = vld [vmem:[%s13451_s13 + $0x28] sm:$0xff]  ;;  %v9067_v25 = vld [vmem:[%s13451_s13 + $0xa0] sm:$0xff] }
 0xb65   :  { %10628 = vmatpush3.msra.mxu1 %v8947_v37  ;;  %10635 = vmatprep.mubr.msk.f32.mxu1 %vm12515_vm2, %v12513_v1  ;;  %v9096_v37 = vld [vmem:[%s13451_s13 + $0x188] sm:$0xff]  ;;  %v9051_v10 = vld [vmem:[%s13451_s13 + $0x20] sm:$0xff]  ;;  %v9049_v47 = vld [vmem:[%s13451_s13 + $0x10] sm:$0xff] }
 0xb66   :  { %8855 = vmatprep.mubr.f32.mxu0 %v8744_v30  ;;  %10629 = vmatprep.subr.mxu1 %v12513_v1  ;;  %v9080_v30 = vld [vmem:[%s13451_s13 + $0x108] sm:$0xff] }
 0xb67   :  { %8856 = vmatmul.mubr.f32.vlgmr.msra.gmra.mxu0 %v8743_v43  ;;  %10630 = vmatpush3.msra.mxu1 %v8946_v39  ;;  %v9066_v39 = vld [vmem:[%s13451_s13 + $0x98] sm:$0xff]  ;;  %v9095_v43 = vld [vmem:[%s13451_s13 + $0x180] sm:$0xff] }
 0xb68   :  { %10565 = vmatpush3.msra.mxu0 %v9094_v8  ;;  %8860 = vmatprep.mubr.f32.mxu0 %v8747_v45  ;;  %v9050_v8 = vld [vmem:[%s13451_s13 + $0x18] sm:$0xff]  ;;  %v9079_v45 = vld [vmem:[%s13451_s13 + $0x100] sm:$0xff] }
 0xb69   :  { %10631 = vmatprep.subr.mxu1 %v12513_v1  ;;  %10566 = vmatprep.subr.mxu0 %v9109_v46  ;;  %v9065_v46 = vld [vmem:[%s13451_s13 + $0x90] sm:$0xff] }
 0xb6a   :  { %10632 = vmatpush3.msra.mxu1 %v8945_v50  ;;  %10567 = vmatpush3.msra.mxu0 %v9093_v38  ;;  %v9064_v50 = vld [vmem:[%s13451_s13 + $0x88] sm:$0xff] }
 0xb6b   :  { %10633 = vmatprep.subr.mxu1 %v12513_v1  ;;  %10568 = vmatprep.subr.mxu0 %v9108_v51  ;;  %v9091_v1 = vld [vmem:[%s13451_s13 + $0x160] sm:$0xff]  ;;  %v9048_v38 = vld [vmem:[%s13451_s13 + $0x8] sm:$0xff] }
 0xb6c   :  { %8861 = vmatmul.mubr.f32.gmra.mxu0 %v8746_v53  ;;  %10634 = vmatpush3.msra.mxu1 %v8944_v44  ;;  %v9063_v51 = vld [vmem:[%s13451_s13 + $0x80] sm:$0xff]  ;;  %v9262_v53 = vld [vmem:[%s13453_s15 + $0x10] sm:$0xff] }
 0xb6d   :  { %10569 = vmatpush3.msra.mxu0 %v9092_v54  ;;  %10636 = vmatmul.mubr.msk.f32.vlgmr.msra.gmra.mxu1 %vm8580_vm3, %v8943_v22  ;;  %v9047_v44 = vld [vmem:[%s13451_s13] sm:$0xff]  ;;  %v9261_v54 = vld [vmem:[%s13453_s15 + $0x8] sm:$0xff] }
 0xb6e   :  { %10529 = vmatprep.subr.mxu1 %v9078_v41  ;;  %10570 = vmatprep.subr.mxu0 %v9107_v55 }
 0xb6f   :  { %9245 = vmatprep.mubr.f32.mxu0 %v13074_v17  ;;  %10530 = vmatpush3.msra.mxu1 %v9062_v56  ;;  %v9105_v17 = vld [vmem:[%s13451_s13 + $0x1d0] sm:$0xff] }
 0xb70   :  { %9175 = vmatprep.mubr.f32.mxu1 %v13071_v42  ;;  %10571 = vmatpush3.msra.mxu0 %v9091_v1  ;;  %v9075_v42 = vld [vmem:[%s13451_s13 + $0xe0] sm:$0xff] }
 0xb71   :  { %10531 = vmatprep.subr.mxu1 %v9077_v48  ;;  %10572 = vmatprep.subr.mxu0 %v9106_v58 }
 0xb72   :  { %10532 = vmatpush3.msra.mxu1 %v9061_v26  ;;  %10573 = vmatpush3.msra.mxu0 %v9090_v59 }
 0xb73   :  { %10533 = vmatprep.subr.mxu1 %v9076_v61  ;;  %10574 = vmatprep.subr.mxu0 %v9105_v17 }
 0xb74   :  { %10534 = vmatpush3.msra.mxu1 %v9060_v52  ;;  %10575 = vmatpush3.msra.mxu0 %v9089_v63 }
 0xb75   :  { %10535 = vmatprep.subr.mxu1 %v9075_v42  ;;  %10576 = vmatprep.subr.mxu0 %v9104_v40 }
 0xb76   :  { %10536 = vmatpush3.msra.mxu1 %v9059_v9  ;;  %10577 = vmatpush3.msra.mxu0 %v9088_v11 }
 0xb77   :  { %10537 = vmatprep.subr.mxu1 %v9074_v57  ;;  %10578 = vmatprep.subr.mxu0 %v9103_v13 }
 0xb78   :  { %10538 = vmatpush3.msra.mxu1 %v9058_v62  ;;  %10579 = vmatpush3.msra.mxu0 %v9087_v15 }
 0xb79   :  { %10539 = vmatprep.subr.mxu1 %v9073_v7  ;;  %10580 = vmatprep.subr.mxu0 %v9102_v18  ;;  %v10401_v7 = vld [vmem:[#allocation18] ss:$0 sm:$0xff] }
 0xb7a   :  { %10540 = vmatpush3.msra.mxu1 %v9057_v19  ;;  %10581 = vmatpush3.msra.mxu0 %v9086_v12 }
 0xb7b   :  { %10541 = vmatprep.subr.mxu1 %v9072_v20  ;;  %10582 = vmatprep.subr.mxu0 %v9101_v21 }
 0xb7c   :  { %10542 = vmatpush3.msra.mxu1 %v9056_v49  ;;  %10583 = vmatpush3.msra.mxu0 %v9085_v23 }
 0xb7d   :  { %10543 = vmatprep.subr.mxu1 %v9071_v14  ;;  %10584 = vmatprep.subr.mxu0 %v9100_v16 }
 0xb7e   :  { %10544 = vmatpush3.msra.mxu1 %v9055_v24  ;;  %10585 = vmatpush3.msra.mxu0 %v9084_v2  ;;  %v9252_v2 = vld [vmem:[#allocation19] sm:$0x1] }
 0xb7f   :  { %10545 = vmatprep.subr.mxu1 %v9070_v4  ;;  %10586 = vmatprep.subr.mxu0 %v9099_v6 }
 0xb80   :  { %10546 = vmatpush3.msra.mxu1 %v9054_v28  ;;  %10587 = vmatpush3.msra.mxu0 %v9083_v5 }
 0xb81   :  { %10547 = vmatprep.subr.mxu1 %v9069_v0  ;;  %10588 = vmatprep.subr.mxu0 %v9098_v31 }
 0xb82   :  { %10548 = vmatpush3.msra.mxu1 %v9053_v32  ;;  %10589 = vmatpush3.msra.mxu0 %v9082_v33 }
 0xb83   :  { %10549 = vmatprep.subr.mxu1 %v9068_v34  ;;  %10590 = vmatprep.subr.mxu0 %v9097_v36 }
 0xb84   :  { %10550 = vmatpush3.msra.mxu1 %v9052_v29  ;;  %10591 = vmatpush3.msra.mxu0 %v9081_v35  ;;  %v10404_v29 = vld [vmem:[#allocation21] ss:$0 sm:$0xff] }
 0xb85   :  { %10551 = vmatprep.subr.mxu1 %v9067_v25  ;;  %10592 = vmatprep.subr.mxu0 %v9096_v37 }
 0xb86   :  { %10552 = vmatpush3.msra.mxu1 %v9051_v10  ;;  %10593 = vmatpush3.msra.mxu0 %v9080_v30 }
 0xb87   :  { %10553 = vmatprep.subr.mxu1 %v9066_v39  ;;  %10594 = vmatprep.subr.mxu0 %v9095_v43 }
 0xb88   :  { %10554 = vmatpush3.msra.mxu1 %v9050_v8  ;;  %10595 = vmatpush3.msra.mxu0 %v9079_v45 }
 0xb89   :  { %10555 = vmatprep.subr.mxu1 %v9065_v46  ;;  %9246 = vmatmul.mubr.f32.vlgmr.msra.gmra.mxu0 %v13080_v27  ;;  %v9263_v27 = vld [vmem:[%s13453_s15 + $0x18] sm:$0xff] }
 0xb8a   :  { %10556 = vmatpush3.msra.mxu1 %v9049_v47 }
 0xb8b   :  { %10557 = vmatprep.subr.mxu1 %v9064_v50 }
 0xb8c   :  { %10558 = vmatpush3.msra.mxu1 %v9048_v38 }
 0xb8d   :  { %10559 = vmatprep.subr.mxu1 %v9063_v51 }
 0xb8e   :  { %10560 = vmatpush3.msra.mxu1 %v9047_v44 }
 0xb8f   :  { %9176 = vmatmul.mubr.f32.vlgmr.msra.gmra.mxu1 %v13077_v60  ;;  %10638 = vmatprep.subr.mxu1 %v9263_v27  ;;  %v9260_v60 = vld [vmem:[%s13453_s15] sm:$0xff] }
 0xb90   :  { %10639 = vmatpush3.msra.mxu1 %v9263_v27 }
 0xb91   :  { %10640 = vmatprep.subr.mxu1 %v9262_v53 }
 0xb92   :  { %10641 = vmatpush3.msra.mxu1 %v9262_v53 }
 0xb93   :  { %10642 = vmatprep.subr.mxu1 %v9261_v54 }
 0xb94   :  { %10643 = vmatpush3.msra.mxu1 %v9261_v54 }
 0xb95   :  { %10644 = vmatprep.subr.mxu1 %v9260_v60 }
 0xb96   :  { %10645 = vmatpush3.msra.mxu1 %v9260_v60 }
 0xc24   :  { %v10626_v22 = vpop.f32.mrf.mxu1 }
 0xc26   :  { %v8932_v41 = vpop.f32.mrf.mxu1 }
 0xc27   :  { %v10512_v48 = vpop.f32.mrf.mxu0 }
 0xc29   :  { %v10513_v26 = vpop.f32.mrf.mxu0 }
 0xc2a   :  { %v10514_v17 = vadd.f32 %v10513_v26, %v10512_v48 }
 0xc2c   :  { %v10515_v59 = vpop.f32.mrf.mxu0  ;;  %v8933_v42 = vadd.f32 %v10514_v17, %v8932_v41 }
 0xc2d   :  { %v9017_v55 = vpop.f32.mrf.mxu1 }
 0xc2e   :  { %v9021_v56 = vmul.f32 0.0034722222, %v9017_v55  ;;  %v10516_v61 = vpop.f32.mrf.mxu0  ;;  %v8941_v11 = vmul.f32 0.058925565, %v8933_v42 }
 0xc2f   :  { %v10637_v1 = vpop.f32.mrf.mxu1  ;;  %v10517_v52 = vadd.f32 %v10516_v61, %v10515_v59 }
 0xc30   :  { %v9022_v58 = vadd.f32 1e-08, %v9021_v56 }
 0xc31   :  { %v8938_v40 = vadd.f32 %v10626_v22, %v10517_v52 }
 0xc32   :  { %12213 = vrsqrt.f32 %v9022_v58 }
 0xc33   :  { %v8942_v57 = vmul.f32 0.058925565, %v8938_v40 }
 0xc3f   :  { %v12214_v63 = vpop.eup %12213 }
 0xc40   :  { %v9027_v9 = vrot.slane %v12214_v63, %v12656_v3 }
 0xc42   :  { %v9028_v13 = vmul.f32 %v9027_v9, %v8941_v11  ;;  %v9029_v62 = vmul.f32 %v9027_v9, %v8942_v57 }
 0xc44   :  { %v9037_v18 = vadd.f32 %v10401_v7, %v9028_v13  ;;  %v9038_v19 = vadd.f32 %v10401_v7, %v9029_v62 }
 0xc46   :  { %v9041_v14 = vmul.f32 0.2, %v9037_v18  ;;  %v9042_v16 = vmul.f32 0.2, %v9038_v19  ;;  %vm9040_vm4 = vcmp.ge.f32.partialorder %v9038_v19, 0.0  ;;  %vm9039_vm5 = vcmp.ge.f32.partialorder %v9037_v18, 0.0 }
 0xc48   :  { %v9044_v6 = vsel %vm9040_vm4, %v9038_v19, %v9042_v16  ;;  %v9043_v28 = vsel %vm9039_vm5, %v9037_v18, %v9041_v14 }
 0xc49   :  { %v10596_v15 = vpop.f32.mrf.mxu0  ;;  %v9046_v0 = vmul.f32 1.4142135, %v9044_v6  ;;  %v9045_v32 = vmul.f32 1.4142135, %v9043_v28 }
 0xc4b   :  { %v10597_v12 = vpop.f32.mrf.mxu0 }
 0xc4c   :  { %v10598_v49 = vadd.f32 %v10597_v12, %v10596_v15 }
 0xc4f   :  { %v10561_v20 = vpop.f32.mrf.mxu1 }
 0xc51   :  { %v10562_v21 = vpop.f32.mrf.mxu1 }
 0xc52   :  { %v10563_v23 = vadd.f32 %v10562_v21, %v10561_v20 }
 0xc54   :  { %v9248_v24 = vadd.f32 %v10598_v49, %v10563_v23 }
 0xc56   :  { %v9251_v4 = vmul.f32 0.044194173, %v9248_v24 }
 0xc58   :  { %v9253_v5 = vadd.f32 %v9252_v2, %v9251_v4 }
 0xc5a   :  { %v9257_v31 = vrot.slane %v9253_v5, %v12656_v3 }
 0xc5c   :  { %v9259_v33 = vmul.f32 %v9257_v31, %v9046_v0  ;;  %v9258_v34 = vmul.f32 %v9257_v31, %v9045_v32 }
 0xc5e   :  { %10646 = vmatprep.mubr.msk.f32.mxu1 %vm8580_vm3, %v9258_v34 }
 0xc5f   :  { %10647 = vmatmul.mubr.msk.f32.vlgmr.msra.gmra.mxu1 %vm8580_vm3, %v9259_v33 }
 0xd1f   :  { %v10648_v36 = vpop.f32.mrf.mxu1 }
 0xd20   :  { %v9346_v35 = vmul.f32 0.17677669, %v10648_v36 }
 0xd21   :  { %v9336_v25 = vpop.f32.mrf.mxu1 }
 0xd22   :  { %v9355_v37 = vadd.f32 %v10404_v29, %v9346_v35  ;;  %v9345_v10 = vmul.f32 0.17677669, %v9336_v25 }
 0xd24   :  { %9358 = vst.msk [vmem:[%s13455_s17 + $0x8] sm:$0xff] %vm9356_vm6, %v9355_v37  ;;  %v9354_v30 = vadd.f32 %v10404_v29, %v9345_v10 }
 0xd26   :  { %9357 = vst.msk [vmem:[%s13455_s17] sm:$0xff] %vm9356_vm6, %v9354_v30 }
 0xd27   :  { %9363 = vsyncpa [#allocation3], 1 }
 0xd28   :  { %9364 = vsyncpa [#allocation5], 1 }
 0xd29   :  { %9365 = vsyncpa [#allocation8], 1 }
 0xd2a   :  { %9366 = vsyncpa [#allocation11], 1 }
 0xd2b   :  { %9367 = vsyncpa [#allocation14], 1 }
 0xd2c   :  { %9368 = vsyncpa [#allocation17], 1 }
 0xd2d   :  { %9369 = vsyncpa [#allocation20], 1 }

</bundles_post_ra>
